<compile_context>
chip_gen: v7x
topology: tpu7x:2x2x1
jax: 0.10.0
libtpu: 0.0.40
codegen_flags: <defaults>
</compile_context>

<pallas_src>
import functools

import jax
import jax.numpy as jnp
from jax.experimental import pallas as pl
from jax.experimental.pallas import tpu as pltpu


def _round_up(a, b):
    return (a + b - 1) // b * b


def _geometry(H, W, KH1, KW1, KH2, KW2):
    """Static canvas geometry shared by the wrapper and the mask builder."""
    padh1, padw1 = KH1 // 2, KW1 // 2
    padh2, padw2 = KH2 // 2, KW2 // 2
    # Canvas width: wide enough for the largest halo, sublane-friendly.
    WC = _round_up(W + max(KW1, KW2) - 1, 8)            # 24 for W=16
    L = H * WC                                          # 384 = 3 * 128 lanes
    rows0 = H + KH1                                     # conv1 canvas rows (+1 guard)
    L0 = _round_up(rows0 * WC, 128)                     # 504 -> 512 (tile aligned)
    # conv1-out -> conv2-canvas placement, rounded to a 128-lane boundary so
    # the handoff store is a fully aligned, unmasked vst.
    pado_raw = padh2 * WC + padw2                       # 75
    PADO = _round_up(pado_raw, 128)                     # 128
    DELTA = PADO - pado_raw                             # 53 (added to conv2 taps)
    XP2_L = _round_up(max(PADO + L,
                          DELTA + (KH2 - 1) * WC + (KW2 - 1) + L), 128)  # 640
    return WC, L, rows0, L0, PADO, DELTA, XP2_L, padh1, padw1


def _encoder_fused_kernel(x_ref, w1_ref, b1_ref, w2_ref, b2_ref, m_ref,
                          o_ref, xp2_ref, *,
                          WC, L, KH1, KW1, KH2, KW2, PADO, DELTA):
    """Fused conv1 -> conv2 for one batch element.

    x_ref  : (1, C0, L0)  bf16       conv1 input on a WC-wide zero-padded canvas
    w1_ref : (KH1*KW1, C1, C0) bf16  conv1 weights, tap-major
    b1_ref : (C1, 1) f32
    w2_ref : (KH2*KW2, C2, C1) bf16  conv2 weights, tap-major
    b2_ref : (C2, 1) f32
    m_ref  : (1, L) f32              1.0 on real output columns, 0.0 elsewhere
    o_ref  : (1, C2, L) f32          conv2 output on the same canvas (lane-dense)
    xp2_ref: (C1, XP2_L) bf16 VMEM   conv2 padded-input canvas (scratch)
    """
    # ---------------- conv1: sum of lane-shifted tap matmuls ----------------
    x0 = x_ref[0]                                       # (C0, L0) bf16
    c1 = w1_ref.shape[1]
    acc1 = jnp.zeros((c1, L), jnp.float32)
    for t in range(KH1 * KW1):
        kh, kw = divmod(t, KW1)
        s = kh * WC + kw                                # static lane offset
        acc1 = acc1 + jnp.dot(w1_ref[t], x0[:, s:s + L],
                              preferred_element_type=jnp.float32)
    # bias (per-sublane) + zero the canvas-garbage columns -> this masking IS
    # the zero padding conv2 expects around the conv1 feature map.
    y1 = (acc1 + b1_ref[...]) * m_ref[...]

    # conv1 -> conv2 handoff.  Only the border lanes need zeros (the interior
    # [PADO, PADO+L) is fully rewritten every step).  Never gate this on
    # program_id: scratch is per-core, so under megacore the core handling a
    # later step would otherwise see uninitialized borders.  PADO and PADO+L
    # are multiples of 128, so all three stores are lane-aligned vsts.
    xp2_ref[:, :PADO] = jnp.zeros((c1, PADO), xp2_ref.dtype)
    xp2_ref[:, PADO + L:] = jnp.zeros((c1, xp2_ref.shape[1] - PADO - L),
                                      xp2_ref.dtype)
    xp2_ref[:, PADO:PADO + L] = y1.astype(xp2_ref.dtype)

    # ---------------- conv2: same structure (offsets shifted by DELTA) ------
    c2 = w2_ref.shape[1]
    acc2 = jnp.zeros((c2, L), jnp.float32)
    for t in range(KH2 * KW2):
        kh, kw = divmod(t, KW2)
        s = kh * WC + kw + DELTA
        acc2 = acc2 + jnp.dot(w2_ref[t], xp2_ref[:, s:s + L],
                              preferred_element_type=jnp.float32)
    o_ref[0] = (acc2 + b2_ref[...]).astype(o_ref.dtype)


@functools.partial(jax.jit, static_argnames=("KH1", "KW1", "KH2", "KW2"))
def encoder_forward_pallas(x_nchw, w1f, b1c, w2f, b2c, mask, *,
                           KH1, KW1, KH2, KW2):
    """x_nchw: (N, C0, H, W) f32; w*f tap-major bf16; returns NCHW f32."""
    N, C0, H, W = x_nchw.shape
    taps1, C1, C0w = w1f.shape
    taps2, C2, C1w = w2f.shape
    assert C0 == C0w and C1 == C1w
    assert taps1 == KH1 * KW1 and taps2 == KH2 * KW2

    WC, L, rows0, L0, PADO, DELTA, XP2_L, padh1, padw1 = _geometry(
        H, W, KH1, KW1, KH2, KW2)

    # Place the image on the canvas (pixel (r,c) -> canvas (r+padh1, c+padw1)),
    # flatten rows into lanes, pad the slab tail to a 128-lane boundary and
    # cast to bf16 (MXU operand dtype).  XLA fuses pad/reshape/pad/convert.
    xg = jnp.pad(x_nchw, ((0, 0), (0, 0),
                          (padh1, rows0 - padh1 - H),
                          (padw1, WC - padw1 - W)))
    xg = xg.reshape(N, C0, rows0 * WC)
    xg = jnp.pad(xg, ((0, 0), (0, 0), (0, L0 - rows0 * WC)))
    xg = xg.astype(jnp.bfloat16)

    kernel = functools.partial(_encoder_fused_kernel, WC=WC, L=L,
                               KH1=KH1, KW1=KW1, KH2=KH2, KW2=KW2,
                               PADO=PADO, DELTA=DELTA)

    flops = 2 * N * L * (taps1 * C0 * C1 + taps2 * C1 * C2)
    bytes_accessed = (2 * (xg.size + w1f.size + w2f.size)
                      + 4 * (b1c.size + b2c.size + mask.size)
                      + 4 * N * C2 * L)
    cost = pl.CostEstimate(flops=flops, transcendentals=0,
                           bytes_accessed=bytes_accessed)

    o = pl.pallas_call(
        kernel,
        out_shape=jax.ShapeDtypeStruct((N, C2, L), jnp.float32),
        grid_spec=pltpu.PrefetchScalarGridSpec(
            num_scalar_prefetch=0,
            grid=(N,),
            in_specs=[
                pl.BlockSpec((1, C0, L0), lambda n: (n, 0, 0)),
                pl.BlockSpec((taps1, C1, C0), lambda n: (0, 0, 0)),
                pl.BlockSpec((C1, 1), lambda n: (0, 0)),
                pl.BlockSpec((taps2, C2, C1), lambda n: (0, 0, 0)),
                pl.BlockSpec((C2, 1), lambda n: (0, 0)),
                pl.BlockSpec((1, L), lambda n: (0, 0)),
            ],
            out_specs=pl.BlockSpec((1, C2, L), lambda n: (n, 0, 0)),
            scratch_shapes=[pltpu.VMEM((C1, XP2_L), jnp.bfloat16)],
        ),
        compiler_params=pltpu.CompilerParams(
            dimension_semantics=("parallel",)),
        cost_estimate=cost,
    )(xg, w1f, b1c, w2f, b2c, mask)

    # Canvas -> NCHW: drop the (WC - W) padded columns.  No transposes needed.
    return o.reshape(N, C2, H, WC)[:, :, :, :W]


class EncoderPallas:
    """Mirrors the PyTorch Encoder: Conv2d(C0,16,5,p=2) -> Conv2d(16,32,7,p=3)."""

    def __init__(self, in_channels, key):
        k1, k2, k3, k4 = jax.random.split(key, 4)
        # OIHW weights (PyTorch layout), deterministic synthetic init (f32 master).
        self.w1 = 0.1 * jax.random.normal(k1, (16, in_channels, 5, 5), jnp.float32)
        self.b1 = 0.1 * jax.random.normal(k2, (16,), jnp.float32)
        self.w2 = 0.1 * jax.random.normal(k3, (32, 16, 7, 7), jnp.float32)
        self.b2 = 0.1 * jax.random.normal(k4, (32,), jnp.float32)
        self.kdims = (5, 5, 7, 7)  # KH1, KW1, KH2, KW2

        # Hoisted parameter prep (perf review): tap-major bf16 weight slabs and
        # column-vector biases, computed ONCE instead of per forward call.
        KH1, KW1, KH2, KW2 = self.kdims
        self.w1f = jnp.transpose(self.w1, (2, 3, 0, 1)) \
                      .reshape(KH1 * KW1, 16, in_channels).astype(jnp.bfloat16)
        self.w2f = jnp.transpose(self.w2, (2, 3, 0, 1)) \
                      .reshape(KH2 * KW2, 32, 16).astype(jnp.bfloat16)
        self.b1c = self.b1.reshape(16, 1)
        self.b2c = self.b2.reshape(32, 1)
        self._masks = {}  # (H, W) -> lane mask, built once per spatial size

    def _mask(self, H, W):
        key = (H, W)
        if key not in self._masks:
            KH1, KW1, KH2, KW2 = self.kdims
            WC, L, *_ = _geometry(H, W, KH1, KW1, KH2, KW2)
            self._masks[key] = (jnp.arange(L) % WC < W) \
                .astype(jnp.float32).reshape(1, L)
        return self._masks[key]

    def __call__(self, x_nchw):
        H, W = x_nchw.shape[2], x_nchw.shape[3]
        KH1, KW1, KH2, KW2 = self.kdims
        return encoder_forward_pallas(
            x_nchw, self.w1f, self.b1c, self.w2f, self.b2c, self._mask(H, W),
            KH1=KH1, KW1=KW1, KH2=KH2, KW2=KW2)


def _reference_forward(x_nchw, enc):
    """Plain-JAX reference (lax conv, NCHW/OIHW, f32) for numerical sanity check."""
    def conv(x, w, b, pad):
        y = jax.lax.conv_general_dilated(
            x, w, window_strides=(1, 1),
            padding=[(pad, pad), (pad, pad)],
            dimension_numbers=("NCHW", "OIHW", "NCHW"))
        return y + b.reshape(1, -1, 1, 1)

    x = conv(x_nchw, enc.w1, enc.b1, 2)
    x = conv(x, enc.w2, enc.b2, 3)
    return x


if __name__ == "__main__":
    key = jax.random.PRNGKey(0)
    k_param, k_data = jax.random.split(key)

    in_channels = 4
    enc = EncoderPallas(in_channels, k_param)

    x = jax.random.normal(k_data, (2, in_channels, 16, 16), jnp.float32)

    out = jax.block_until_ready(enc(x))
    assert out.shape == (2, 32, 16, 16), out.shape

    ref = jax.block_until_ready(_reference_forward(x, enc))
    # bf16 MXU operands with f32 accumulation: validate at bf16-level tolerance.
    err = float(jnp.max(jnp.abs(out - ref)))
    assert jnp.allclose(out, ref, atol=1e-1, rtol=2e-2), err

    print("KERNEL_OK")
</pallas_src>

<mosaic_0001>
module attributes {stable_mosaic.version = 11 : i64} {
  func.func @_encoder_fused_kernel(%arg0: i32, %arg1: memref<1x4x512xbf16, #tpu.memory_space<vmem>>, %arg2: memref<25x16x4xbf16, #tpu.memory_space<vmem>>, %arg3: memref<16x1xf32, #tpu.memory_space<vmem>>, %arg4: memref<49x32x16xbf16, #tpu.memory_space<vmem>>, %arg5: memref<32x1xf32, #tpu.memory_space<vmem>>, %arg6: memref<1x384xf32, #tpu.memory_space<vmem>>, %arg7: memref<1x32x384xf32, #tpu.memory_space<vmem>>, %arg8: memref<16x640xbf16, #tpu.memory_space<vmem>>) attributes {dimension_semantics = [#tpu.dimension_semantics<parallel>], iteration_bounds = array<i64: 2>, scalar_prefetch = 0 : i64, scratch_operands = 1 : i64, tpu.core_type = #tpu.core_type<tc>, window_params = [{transform_indices = @transform_0, window_bounds = array<i64: 1, 4, 512>}, {pipeline_mode = #tpu.pipeline_mode<synchronous>, transform_indices = @transform_1, window_bounds = array<i64: 25, 16, 4>}, {pipeline_mode = #tpu.pipeline_mode<synchronous>, transform_indices = @transform_2, window_bounds = array<i64: 16, 1>}, {pipeline_mode = #tpu.pipeline_mode<synchronous>, transform_indices = @transform_3, window_bounds = array<i64: 49, 32, 16>}, {pipeline_mode = #tpu.pipeline_mode<synchronous>, transform_indices = @transform_4, window_bounds = array<i64: 32, 1>}, {pipeline_mode = #tpu.pipeline_mode<synchronous>, transform_indices = @transform_5, window_bounds = array<i64: 1, 384>}, {transform_indices = @transform_6, window_bounds = array<i64: 1, 32, 384>}]} {
    %c0 = arith.constant 0 : index
    %c0_0 = arith.constant 0 : index
    %c0_1 = arith.constant 0 : index
    %0 = vector.load %arg1[%c0, %c0_0, %c0_1] : memref<1x4x512xbf16, #tpu.memory_space<vmem>>, vector<1x4x512xbf16>
    %1 = vector.shape_cast %0 : vector<1x4x512xbf16> to vector<4x512xbf16>
    %cst = arith.constant 0.000000e+00 : f32
    %2 = vector.broadcast %cst : f32 to vector<16x384xf32>
    %c0_2 = arith.constant 0 : index
    %c0_3 = arith.constant 0 : index
    %c0_4 = arith.constant 0 : index
    %3 = vector.load %arg2[%c0_2, %c0_3, %c0_4] : memref<25x16x4xbf16, #tpu.memory_space<vmem>>, vector<1x16x4xbf16>
    %4 = vector.shape_cast %3 : vector<1x16x4xbf16> to vector<16x4xbf16>
    %5 = vector.extract_strided_slice %1 {offsets = [0, 0], sizes = [4, 384], strides = [1, 1]} : vector<4x512xbf16> to vector<4x384xbf16>
    %cst_5 = arith.constant dense<0.000000e+00> : vector<16x384xf32>
    %6 = tpu.matmul %4, %5, %cst_5 {dimension_numbers = #tpu.dot_dimension_numbers<[1], [0], [0], [1], [0, 0, 1, 1], [], []>} : vector<16x4xbf16>, vector<4x384xbf16>, vector<16x384xf32> -> vector<16x384xf32>
    %7 = arith.addf %2, %6 : vector<16x384xf32>
    %c1 = arith.constant 1 : index
    %c0_6 = arith.constant 0 : index
    %c0_7 = arith.constant 0 : index
    %8 = vector.load %arg2[%c1, %c0_6, %c0_7] : memref<25x16x4xbf16, #tpu.memory_space<vmem>>, vector<1x16x4xbf16>
    %9 = vector.shape_cast %8 : vector<1x16x4xbf16> to vector<16x4xbf16>
    %10 = vector.extract_strided_slice %1 {offsets = [0, 1], sizes = [4, 384], strides = [1, 1]} : vector<4x512xbf16> to vector<4x384xbf16>
    %cst_8 = arith.constant dense<0.000000e+00> : vector<16x384xf32>
    %11 = tpu.matmul %9, %10, %cst_8 {dimension_numbers = #tpu.dot_dimension_numbers<[1], [0], [0], [1], [0, 0, 1, 1], [], []>} : vector<16x4xbf16>, vector<4x384xbf16>, vector<16x384xf32> -> vector<16x384xf32>
    %12 = arith.addf %7, %11 : vector<16x384xf32>
    %c2 = arith.constant 2 : index
    %c0_9 = arith.constant 0 : index
    %c0_10 = arith.constant 0 : index
    %13 = vector.load %arg2[%c2, %c0_9, %c0_10] : memref<25x16x4xbf16, #tpu.memory_space<vmem>>, vector<1x16x4xbf16>
    %14 = vector.shape_cast %13 : vector<1x16x4xbf16> to vector<16x4xbf16>
    %15 = vector.extract_strided_slice %1 {offsets = [0, 2], sizes = [4, 384], strides = [1, 1]} : vector<4x512xbf16> to vector<4x384xbf16>
    %cst_11 = arith.constant dense<0.000000e+00> : vector<16x384xf32>
    %16 = tpu.matmul %14, %15, %cst_11 {dimension_numbers = #tpu.dot_dimension_numbers<[1], [0], [0], [1], [0, 0, 1, 1], [], []>} : vector<16x4xbf16>, vector<4x384xbf16>, vector<16x384xf32> -> vector<16x384xf32>
    %17 = arith.addf %12, %16 : vector<16x384xf32>
    %c3 = arith.constant 3 : index
    %c0_12 = arith.constant 0 : index
    %c0_13 = arith.constant 0 : index
    %18 = vector.load %arg2[%c3, %c0_12, %c0_13] : memref<25x16x4xbf16, #tpu.memory_space<vmem>>, vector<1x16x4xbf16>
    %19 = vector.shape_cast %18 : vector<1x16x4xbf16> to vector<16x4xbf16>
    %20 = vector.extract_strided_slice %1 {offsets = [0, 3], sizes = [4, 384], strides = [1, 1]} : vector<4x512xbf16> to vector<4x384xbf16>
    %cst_14 = arith.constant dense<0.000000e+00> : vector<16x384xf32>
    %21 = tpu.matmul %19, %20, %cst_14 {dimension_numbers = #tpu.dot_dimension_numbers<[1], [0], [0], [1], [0, 0, 1, 1], [], []>} : vector<16x4xbf16>, vector<4x384xbf16>, vector<16x384xf32> -> vector<16x384xf32>
    %22 = arith.addf %17, %21 : vector<16x384xf32>
    %c4 = arith.constant 4 : index
    %c0_15 = arith.constant 0 : index
    %c0_16 = arith.constant 0 : index
    %23 = vector.load %arg2[%c4, %c0_15, %c0_16] : memref<25x16x4xbf16, #tpu.memory_space<vmem>>, vector<1x16x4xbf16>
    %24 = vector.shape_cast %23 : vector<1x16x4xbf16> to vector<16x4xbf16>
    %25 = vector.extract_strided_slice %1 {offsets = [0, 4], sizes = [4, 384], strides = [1, 1]} : vector<4x512xbf16> to vector<4x384xbf16>
    %cst_17 = arith.constant dense<0.000000e+00> : vector<16x384xf32>
    %26 = tpu.matmul %24, %25, %cst_17 {dimension_numbers = #tpu.dot_dimension_numbers<[1], [0], [0], [1], [0, 0, 1, 1], [], []>} : vector<16x4xbf16>, vector<4x384xbf16>, vector<16x384xf32> -> vector<16x384xf32>
    %27 = arith.addf %22, %26 : vector<16x384xf32>
    %c5 = arith.constant 5 : index
    %c0_18 = arith.constant 0 : index
    %c0_19 = arith.constant 0 : index
    %28 = vector.load %arg2[%c5, %c0_18, %c0_19] : memref<25x16x4xbf16, #tpu.memory_space<vmem>>, vector<1x16x4xbf16>
    %29 = vector.shape_cast %28 : vector<1x16x4xbf16> to vector<16x4xbf16>
    %30 = vector.extract_strided_slice %1 {offsets = [0, 24], sizes = [4, 384], strides = [1, 1]} : vector<4x512xbf16> to vector<4x384xbf16>
    %cst_20 = arith.constant dense<0.000000e+00> : vector<16x384xf32>
    %31 = tpu.matmul %29, %30, %cst_20 {dimension_numbers = #tpu.dot_dimension_numbers<[1], [0], [0], [1], [0, 0, 1, 1], [], []>} : vector<16x4xbf16>, vector<4x384xbf16>, vector<16x384xf32> -> vector<16x384xf32>
    %32 = arith.addf %27, %31 : vector<16x384xf32>
    %c6 = arith.constant 6 : index
    %c0_21 = arith.constant 0 : index
    %c0_22 = arith.constant 0 : index
    %33 = vector.load %arg2[%c6, %c0_21, %c0_22] : memref<25x16x4xbf16, #tpu.memory_space<vmem>>, vector<1x16x4xbf16>
    %34 = vector.shape_cast %33 : vector<1x16x4xbf16> to vector<16x4xbf16>
    %35 = vector.extract_strided_slice %1 {offsets = [0, 25], sizes = [4, 384], strides = [1, 1]} : vector<4x512xbf16> to vector<4x384xbf16>
    %cst_23 = arith.constant dense<0.000000e+00> : vector<16x384xf32>
    %36 = tpu.matmul %34, %35, %cst_23 {dimension_numbers = #tpu.dot_dimension_numbers<[1], [0], [0], [1], [0, 0, 1, 1], [], []>} : vector<16x4xbf16>, vector<4x384xbf16>, vector<16x384xf32> -> vector<16x384xf32>
    %37 = arith.addf %32, %36 : vector<16x384xf32>
    %c7 = arith.constant 7 : index
    %c0_24 = arith.constant 0 : index
    %c0_25 = arith.constant 0 : index
    %38 = vector.load %arg2[%c7, %c0_24, %c0_25] : memref<25x16x4xbf16, #tpu.memory_space<vmem>>, vector<1x16x4xbf16>
    %39 = vector.shape_cast %38 : vector<1x16x4xbf16> to vector<16x4xbf16>
    %40 = vector.extract_strided_slice %1 {offsets = [0, 26], sizes = [4, 384], strides = [1, 1]} : vector<4x512xbf16> to vector<4x384xbf16>
    %cst_26 = arith.constant dense<0.000000e+00> : vector<16x384xf32>
    %41 = tpu.matmul %39, %40, %cst_26 {dimension_numbers = #tpu.dot_dimension_numbers<[1], [0], [0], [1], [0, 0, 1, 1], [], []>} : vector<16x4xbf16>, vector<4x384xbf16>, vector<16x384xf32> -> vector<16x384xf32>
    %42 = arith.addf %37, %41 : vector<16x384xf32>
    %c8 = arith.constant 8 : index
    %c0_27 = arith.constant 0 : index
    %c0_28 = arith.constant 0 : index
    %43 = vector.load %arg2[%c8, %c0_27, %c0_28] : memref<25x16x4xbf16, #tpu.memory_space<vmem>>, vector<1x16x4xbf16>
    %44 = vector.shape_cast %43 : vector<1x16x4xbf16> to vector<16x4xbf16>
    %45 = vector.extract_strided_slice %1 {offsets = [0, 27], sizes = [4, 384], strides = [1, 1]} : vector<4x512xbf16> to vector<4x384xbf16>
    %cst_29 = arith.constant dense<0.000000e+00> : vector<16x384xf32>
    %46 = tpu.matmul %44, %45, %cst_29 {dimension_numbers = #tpu.dot_dimension_numbers<[1], [0], [0], [1], [0, 0, 1, 1], [], []>} : vector<16x4xbf16>, vector<4x384xbf16>, vector<16x384xf32> -> vector<16x384xf32>
    %47 = arith.addf %42, %46 : vector<16x384xf32>
    %c9 = arith.constant 9 : index
    %c0_30 = arith.constant 0 : index
    %c0_31 = arith.constant 0 : index
    %48 = vector.load %arg2[%c9, %c0_30, %c0_31] : memref<25x16x4xbf16, #tpu.memory_space<vmem>>, vector<1x16x4xbf16>
    %49 = vector.shape_cast %48 : vector<1x16x4xbf16> to vector<16x4xbf16>
    %50 = vector.extract_strided_slice %1 {offsets = [0, 28], sizes = [4, 384], strides = [1, 1]} : vector<4x512xbf16> to vector<4x384xbf16>
    %cst_32 = arith.constant dense<0.000000e+00> : vector<16x384xf32>
    %51 = tpu.matmul %49, %50, %cst_32 {dimension_numbers = #tpu.dot_dimension_numbers<[1], [0], [0], [1], [0, 0, 1, 1], [], []>} : vector<16x4xbf16>, vector<4x384xbf16>, vector<16x384xf32> -> vector<16x384xf32>
    %52 = arith.addf %47, %51 : vector<16x384xf32>
    %c10 = arith.constant 10 : index
    %c0_33 = arith.constant 0 : index
    %c0_34 = arith.constant 0 : index
    %53 = vector.load %arg2[%c10, %c0_33, %c0_34] : memref<25x16x4xbf16, #tpu.memory_space<vmem>>, vector<1x16x4xbf16>
    %54 = vector.shape_cast %53 : vector<1x16x4xbf16> to vector<16x4xbf16>
    %55 = vector.extract_strided_slice %1 {offsets = [0, 48], sizes = [4, 384], strides = [1, 1]} : vector<4x512xbf16> to vector<4x384xbf16>
    %cst_35 = arith.constant dense<0.000000e+00> : vector<16x384xf32>
    %56 = tpu.matmul %54, %55, %cst_35 {dimension_numbers = #tpu.dot_dimension_numbers<[1], [0], [0], [1], [0, 0, 1, 1], [], []>} : vector<16x4xbf16>, vector<4x384xbf16>, vector<16x384xf32> -> vector<16x384xf32>
    %57 = arith.addf %52, %56 : vector<16x384xf32>
    %c11 = arith.constant 11 : index
    %c0_36 = arith.constant 0 : index
    %c0_37 = arith.constant 0 : index
    %58 = vector.load %arg2[%c11, %c0_36, %c0_37] : memref<25x16x4xbf16, #tpu.memory_space<vmem>>, vector<1x16x4xbf16>
    %59 = vector.shape_cast %58 : vector<1x16x4xbf16> to vector<16x4xbf16>
    %60 = vector.extract_strided_slice %1 {offsets = [0, 49], sizes = [4, 384], strides = [1, 1]} : vector<4x512xbf16> to vector<4x384xbf16>
    %cst_38 = arith.constant dense<0.000000e+00> : vector<16x384xf32>
    %61 = tpu.matmul %59, %60, %cst_38 {dimension_numbers = #tpu.dot_dimension_numbers<[1], [0], [0], [1], [0, 0, 1, 1], [], []>} : vector<16x4xbf16>, vector<4x384xbf16>, vector<16x384xf32> -> vector<16x384xf32>
    %62 = arith.addf %57, %61 : vector<16x384xf32>
    %c12 = arith.constant 12 : index
    %c0_39 = arith.constant 0 : index
    %c0_40 = arith.constant 0 : index
    %63 = vector.load %arg2[%c12, %c0_39, %c0_40] : memref<25x16x4xbf16, #tpu.memory_space<vmem>>, vector<1x16x4xbf16>
    %64 = vector.shape_cast %63 : vector<1x16x4xbf16> to vector<16x4xbf16>
    %65 = vector.extract_strided_slice %1 {offsets = [0, 50], sizes = [4, 384], strides = [1, 1]} : vector<4x512xbf16> to vector<4x384xbf16>
    %cst_41 = arith.constant dense<0.000000e+00> : vector<16x384xf32>
    %66 = tpu.matmul %64, %65, %cst_41 {dimension_numbers = #tpu.dot_dimension_numbers<[1], [0], [0], [1], [0, 0, 1, 1], [], []>} : vector<16x4xbf16>, vector<4x384xbf16>, vector<16x384xf32> -> vector<16x384xf32>
    %67 = arith.addf %62, %66 : vector<16x384xf32>
    %c13 = arith.constant 13 : index
    %c0_42 = arith.constant 0 : index
    %c0_43 = arith.constant 0 : index
    %68 = vector.load %arg2[%c13, %c0_42, %c0_43] : memref<25x16x4xbf16, #tpu.memory_space<vmem>>, vector<1x16x4xbf16>
    %69 = vector.shape_cast %68 : vector<1x16x4xbf16> to vector<16x4xbf16>
    %70 = vector.extract_strided_slice %1 {offsets = [0, 51], sizes = [4, 384], strides = [1, 1]} : vector<4x512xbf16> to vector<4x384xbf16>
    %cst_44 = arith.constant dense<0.000000e+00> : vector<16x384xf32>
    %71 = tpu.matmul %69, %70, %cst_44 {dimension_numbers = #tpu.dot_dimension_numbers<[1], [0], [0], [1], [0, 0, 1, 1], [], []>} : vector<16x4xbf16>, vector<4x384xbf16>, vector<16x384xf32> -> vector<16x384xf32>
    %72 = arith.addf %67, %71 : vector<16x384xf32>
    %c14 = arith.constant 14 : index
    %c0_45 = arith.constant 0 : index
    %c0_46 = arith.constant 0 : index
    %73 = vector.load %arg2[%c14, %c0_45, %c0_46] : memref<25x16x4xbf16, #tpu.memory_space<vmem>>, vector<1x16x4xbf16>
    %74 = vector.shape_cast %73 : vector<1x16x4xbf16> to vector<16x4xbf16>
    %75 = vector.extract_strided_slice %1 {offsets = [0, 52], sizes = [4, 384], strides = [1, 1]} : vector<4x512xbf16> to vector<4x384xbf16>
    %cst_47 = arith.constant dense<0.000000e+00> : vector<16x384xf32>
    %76 = tpu.matmul %74, %75, %cst_47 {dimension_numbers = #tpu.dot_dimension_numbers<[1], [0], [0], [1], [0, 0, 1, 1], [], []>} : vector<16x4xbf16>, vector<4x384xbf16>, vector<16x384xf32> -> vector<16x384xf32>
    %77 = arith.addf %72, %76 : vector<16x384xf32>
    %c15 = arith.constant 15 : index
    %c0_48 = arith.constant 0 : index
    %c0_49 = arith.constant 0 : index
    %78 = vector.load %arg2[%c15, %c0_48, %c0_49] : memref<25x16x4xbf16, #tpu.memory_space<vmem>>, vector<1x16x4xbf16>
    %79 = vector.shape_cast %78 : vector<1x16x4xbf16> to vector<16x4xbf16>
    %80 = vector.extract_strided_slice %1 {offsets = [0, 72], sizes = [4, 384], strides = [1, 1]} : vector<4x512xbf16> to vector<4x384xbf16>
    %cst_50 = arith.constant dense<0.000000e+00> : vector<16x384xf32>
    %81 = tpu.matmul %79, %80, %cst_50 {dimension_numbers = #tpu.dot_dimension_numbers<[1], [0], [0], [1], [0, 0, 1, 1], [], []>} : vector<16x4xbf16>, vector<4x384xbf16>, vector<16x384xf32> -> vector<16x384xf32>
    %82 = arith.addf %77, %81 : vector<16x384xf32>
    %c16 = arith.constant 16 : index
    %c0_51 = arith.constant 0 : index
    %c0_52 = arith.constant 0 : index
    %83 = vector.load %arg2[%c16, %c0_51, %c0_52] : memref<25x16x4xbf16, #tpu.memory_space<vmem>>, vector<1x16x4xbf16>
    %84 = vector.shape_cast %83 : vector<1x16x4xbf16> to vector<16x4xbf16>
    %85 = vector.extract_strided_slice %1 {offsets = [0, 73], sizes = [4, 384], strides = [1, 1]} : vector<4x512xbf16> to vector<4x384xbf16>
    %cst_53 = arith.constant dense<0.000000e+00> : vector<16x384xf32>
    %86 = tpu.matmul %84, %85, %cst_53 {dimension_numbers = #tpu.dot_dimension_numbers<[1], [0], [0], [1], [0, 0, 1, 1], [], []>} : vector<16x4xbf16>, vector<4x384xbf16>, vector<16x384xf32> -> vector<16x384xf32>
    %87 = arith.addf %82, %86 : vector<16x384xf32>
    %c17 = arith.constant 17 : index
    %c0_54 = arith.constant 0 : index
    %c0_55 = arith.constant 0 : index
    %88 = vector.load %arg2[%c17, %c0_54, %c0_55] : memref<25x16x4xbf16, #tpu.memory_space<vmem>>, vector<1x16x4xbf16>
    %89 = vector.shape_cast %88 : vector<1x16x4xbf16> to vector<16x4xbf16>
    %90 = vector.extract_strided_slice %1 {offsets = [0, 74], sizes = [4, 384], strides = [1, 1]} : vector<4x512xbf16> to vector<4x384xbf16>
    %cst_56 = arith.constant dense<0.000000e+00> : vector<16x384xf32>
    %91 = tpu.matmul %89, %90, %cst_56 {dimension_numbers = #tpu.dot_dimension_numbers<[1], [0], [0], [1], [0, 0, 1, 1], [], []>} : vector<16x4xbf16>, vector<4x384xbf16>, vector<16x384xf32> -> vector<16x384xf32>
    %92 = arith.addf %87, %91 : vector<16x384xf32>
    %c18 = arith.constant 18 : index
    %c0_57 = arith.constant 0 : index
    %c0_58 = arith.constant 0 : index
    %93 = vector.load %arg2[%c18, %c0_57, %c0_58] : memref<25x16x4xbf16, #tpu.memory_space<vmem>>, vector<1x16x4xbf16>
    %94 = vector.shape_cast %93 : vector<1x16x4xbf16> to vector<16x4xbf16>
    %95 = vector.extract_strided_slice %1 {offsets = [0, 75], sizes = [4, 384], strides = [1, 1]} : vector<4x512xbf16> to vector<4x384xbf16>
    %cst_59 = arith.constant dense<0.000000e+00> : vector<16x384xf32>
    %96 = tpu.matmul %94, %95, %cst_59 {dimension_numbers = #tpu.dot_dimension_numbers<[1], [0], [0], [1], [0, 0, 1, 1], [], []>} : vector<16x4xbf16>, vector<4x384xbf16>, vector<16x384xf32> -> vector<16x384xf32>
    %97 = arith.addf %92, %96 : vector<16x384xf32>
    %c19 = arith.constant 19 : index
    %c0_60 = arith.constant 0 : index
    %c0_61 = arith.constant 0 : index
    %98 = vector.load %arg2[%c19, %c0_60, %c0_61] : memref<25x16x4xbf16, #tpu.memory_space<vmem>>, vector<1x16x4xbf16>
    %99 = vector.shape_cast %98 : vector<1x16x4xbf16> to vector<16x4xbf16>
    %100 = vector.extract_strided_slice %1 {offsets = [0, 76], sizes = [4, 384], strides = [1, 1]} : vector<4x512xbf16> to vector<4x384xbf16>
    %cst_62 = arith.constant dense<0.000000e+00> : vector<16x384xf32>
    %101 = tpu.matmul %99, %100, %cst_62 {dimension_numbers = #tpu.dot_dimension_numbers<[1], [0], [0], [1], [0, 0, 1, 1], [], []>} : vector<16x4xbf16>, vector<4x384xbf16>, vector<16x384xf32> -> vector<16x384xf32>
    %102 = arith.addf %97, %101 : vector<16x384xf32>
    %c20 = arith.constant 20 : index
    %c0_63 = arith.constant 0 : index
    %c0_64 = arith.constant 0 : index
    %103 = vector.load %arg2[%c20, %c0_63, %c0_64] : memref<25x16x4xbf16, #tpu.memory_space<vmem>>, vector<1x16x4xbf16>
    %104 = vector.shape_cast %103 : vector<1x16x4xbf16> to vector<16x4xbf16>
    %105 = vector.extract_strided_slice %1 {offsets = [0, 96], sizes = [4, 384], strides = [1, 1]} : vector<4x512xbf16> to vector<4x384xbf16>
    %cst_65 = arith.constant dense<0.000000e+00> : vector<16x384xf32>
    %106 = tpu.matmul %104, %105, %cst_65 {dimension_numbers = #tpu.dot_dimension_numbers<[1], [0], [0], [1], [0, 0, 1, 1], [], []>} : vector<16x4xbf16>, vector<4x384xbf16>, vector<16x384xf32> -> vector<16x384xf32>
    %107 = arith.addf %102, %106 : vector<16x384xf32>
    %c21 = arith.constant 21 : index
    %c0_66 = arith.constant 0 : index
    %c0_67 = arith.constant 0 : index
    %108 = vector.load %arg2[%c21, %c0_66, %c0_67] : memref<25x16x4xbf16, #tpu.memory_space<vmem>>, vector<1x16x4xbf16>
    %109 = vector.shape_cast %108 : vector<1x16x4xbf16> to vector<16x4xbf16>
    %110 = vector.extract_strided_slice %1 {offsets = [0, 97], sizes = [4, 384], strides = [1, 1]} : vector<4x512xbf16> to vector<4x384xbf16>
    %cst_68 = arith.constant dense<0.000000e+00> : vector<16x384xf32>
    %111 = tpu.matmul %109, %110, %cst_68 {dimension_numbers = #tpu.dot_dimension_numbers<[1], [0], [0], [1], [0, 0, 1, 1], [], []>} : vector<16x4xbf16>, vector<4x384xbf16>, vector<16x384xf32> -> vector<16x384xf32>
    %112 = arith.addf %107, %111 : vector<16x384xf32>
    %c22 = arith.constant 22 : index
    %c0_69 = arith.constant 0 : index
    %c0_70 = arith.constant 0 : index
    %113 = vector.load %arg2[%c22, %c0_69, %c0_70] : memref<25x16x4xbf16, #tpu.memory_space<vmem>>, vector<1x16x4xbf16>
    %114 = vector.shape_cast %113 : vector<1x16x4xbf16> to vector<16x4xbf16>
    %115 = vector.extract_strided_slice %1 {offsets = [0, 98], sizes = [4, 384], strides = [1, 1]} : vector<4x512xbf16> to vector<4x384xbf16>
    %cst_71 = arith.constant dense<0.000000e+00> : vector<16x384xf32>
    %116 = tpu.matmul %114, %115, %cst_71 {dimension_numbers = #tpu.dot_dimension_numbers<[1], [0], [0], [1], [0, 0, 1, 1], [], []>} : vector<16x4xbf16>, vector<4x384xbf16>, vector<16x384xf32> -> vector<16x384xf32>
    %117 = arith.addf %112, %116 : vector<16x384xf32>
    %c23 = arith.constant 23 : index
    %c0_72 = arith.constant 0 : index
    %c0_73 = arith.constant 0 : index
    %118 = vector.load %arg2[%c23, %c0_72, %c0_73] : memref<25x16x4xbf16, #tpu.memory_space<vmem>>, vector<1x16x4xbf16>
    %119 = vector.shape_cast %118 : vector<1x16x4xbf16> to vector<16x4xbf16>
    %120 = vector.extract_strided_slice %1 {offsets = [0, 99], sizes = [4, 384], strides = [1, 1]} : vector<4x512xbf16> to vector<4x384xbf16>
    %cst_74 = arith.constant dense<0.000000e+00> : vector<16x384xf32>
    %121 = tpu.matmul %119, %120, %cst_74 {dimension_numbers = #tpu.dot_dimension_numbers<[1], [0], [0], [1], [0, 0, 1, 1], [], []>} : vector<16x4xbf16>, vector<4x384xbf16>, vector<16x384xf32> -> vector<16x384xf32>
    %122 = arith.addf %117, %121 : vector<16x384xf32>
    %c24 = arith.constant 24 : index
    %c0_75 = arith.constant 0 : index
    %c0_76 = arith.constant 0 : index
    %123 = vector.load %arg2[%c24, %c0_75, %c0_76] : memref<25x16x4xbf16, #tpu.memory_space<vmem>>, vector<1x16x4xbf16>
    %124 = vector.shape_cast %123 : vector<1x16x4xbf16> to vector<16x4xbf16>
    %125 = vector.extract_strided_slice %1 {offsets = [0, 100], sizes = [4, 384], strides = [1, 1]} : vector<4x512xbf16> to vector<4x384xbf16>
    %cst_77 = arith.constant dense<0.000000e+00> : vector<16x384xf32>
    %126 = tpu.matmul %124, %125, %cst_77 {dimension_numbers = #tpu.dot_dimension_numbers<[1], [0], [0], [1], [0, 0, 1, 1], [], []>} : vector<16x4xbf16>, vector<4x384xbf16>, vector<16x384xf32> -> vector<16x384xf32>
    %127 = arith.addf %122, %126 : vector<16x384xf32>
    %c0_78 = arith.constant 0 : index
    %c0_79 = arith.constant 0 : index
    %128 = vector.load %arg3[%c0_78, %c0_79] : memref<16x1xf32, #tpu.memory_space<vmem>>, vector<16x1xf32>
    %129 = vector.broadcast %128 : vector<16x1xf32> to vector<16x384xf32>
    %130 = arith.addf %127, %129 : vector<16x384xf32>
    %c0_80 = arith.constant 0 : index
    %c0_81 = arith.constant 0 : index
    %131 = vector.load %arg6[%c0_80, %c0_81] : memref<1x384xf32, #tpu.memory_space<vmem>>, vector<1x384xf32>
    %132 = vector.broadcast %131 : vector<1x384xf32> to vector<16x384xf32>
    %133 = arith.mulf %130, %132 : vector<16x384xf32>
    %cst_82 = arith.constant 0.000000e+00 : bf16
    %134 = vector.broadcast %cst_82 : bf16 to vector<16x128xbf16>
    %c0_83 = arith.constant 0 : index
    %c0_84 = arith.constant 0 : index
    %135 = vector.load %arg8[%c0_83, %c0_84] : memref<16x640xbf16, #tpu.memory_space<vmem>>, vector<16x128xbf16>
    tpu.vector_store %arg8[%c0_83, %c0_84], %134 {strides = array<i32>} : memref<16x640xbf16, #tpu.memory_space<vmem>>, vector<16x128xbf16>,
    %cst_85 = arith.constant 0.000000e+00 : bf16
    %136 = vector.broadcast %cst_85 : bf16 to vector<16x128xbf16>
    %c0_86 = arith.constant 0 : index
    %c512 = arith.constant 512 : index
    %137 = vector.load %arg8[%c0_86, %c512] : memref<16x640xbf16, #tpu.memory_space<vmem>>, vector<16x128xbf16>
    tpu.vector_store %arg8[%c0_86, %c512], %136 {strides = array<i32>} : memref<16x640xbf16, #tpu.memory_space<vmem>>, vector<16x128xbf16>,
    %138 = arith.truncf %133 : vector<16x384xf32> to vector<16x384xbf16>
    %c0_87 = arith.constant 0 : index
    %c128 = arith.constant 128 : index
    %139 = vector.load %arg8[%c0_87, %c128] : memref<16x640xbf16, #tpu.memory_space<vmem>>, vector<16x384xbf16>
    tpu.vector_store %arg8[%c0_87, %c128], %138 {strides = array<i32>} : memref<16x640xbf16, #tpu.memory_space<vmem>>, vector<16x384xbf16>,
    %cst_88 = arith.constant 0.000000e+00 : f32
    %140 = vector.broadcast %cst_88 : f32 to vector<32x384xf32>
    %c0_89 = arith.constant 0 : index
    %c0_90 = arith.constant 0 : index
    %c0_91 = arith.constant 0 : index
    %141 = vector.load %arg4[%c0_89, %c0_90, %c0_91] : memref<49x32x16xbf16, #tpu.memory_space<vmem>>, vector<1x32x16xbf16>
    %142 = vector.shape_cast %141 : vector<1x32x16xbf16> to vector<32x16xbf16>
    %c0_92 = arith.constant 0 : index
    %c53 = arith.constant 53 : index
    %143 = vector.load %arg8[%c0_92, %c53] : memref<16x640xbf16, #tpu.memory_space<vmem>>, vector<16x384xbf16>
    %cst_93 = arith.constant dense<0.000000e+00> : vector<32x384xf32>
    %144 = tpu.matmul %142, %143, %cst_93 {dimension_numbers = #tpu.dot_dimension_numbers<[1], [0], [0], [1], [0, 0, 1, 1], [], []>} : vector<32x16xbf16>, vector<16x384xbf16>, vector<32x384xf32> -> vector<32x384xf32>
    %145 = arith.addf %140, %144 : vector<32x384xf32>
    %c1_94 = arith.constant 1 : index
    %c0_95 = arith.constant 0 : index
    %c0_96 = arith.constant 0 : index
    %146 = vector.load %arg4[%c1_94, %c0_95, %c0_96] : memref<49x32x16xbf16, #tpu.memory_space<vmem>>, vector<1x32x16xbf16>
    %147 = vector.shape_cast %146 : vector<1x32x16xbf16> to vector<32x16xbf16>
    %c0_97 = arith.constant 0 : index
    %c54 = arith.constant 54 : index
    %148 = vector.load %arg8[%c0_97, %c54] : memref<16x640xbf16, #tpu.memory_space<vmem>>, vector<16x384xbf16>
    %cst_98 = arith.constant dense<0.000000e+00> : vector<32x384xf32>
    %149 = tpu.matmul %147, %148, %cst_98 {dimension_numbers = #tpu.dot_dimension_numbers<[1], [0], [0], [1], [0, 0, 1, 1], [], []>} : vector<32x16xbf16>, vector<16x384xbf16>, vector<32x384xf32> -> vector<32x384xf32>
    %150 = arith.addf %145, %149 : vector<32x384xf32>
    %c2_99 = arith.constant 2 : index
    %c0_100 = arith.constant 0 : index
    %c0_101 = arith.constant 0 : index
    %151 = vector.load %arg4[%c2_99, %c0_100, %c0_101] : memref<49x32x16xbf16, #tpu.memory_space<vmem>>, vector<1x32x16xbf16>
    %152 = vector.shape_cast %151 : vector<1x32x16xbf16> to vector<32x16xbf16>
    %c0_102 = arith.constant 0 : index
    %c55 = arith.constant 55 : index
    %153 = vector.load %arg8[%c0_102, %c55] : memref<16x640xbf16, #tpu.memory_space<vmem>>, vector<16x384xbf16>
    %cst_103 = arith.constant dense<0.000000e+00> : vector<32x384xf32>
    %154 = tpu.matmul %152, %153, %cst_103 {dimension_numbers = #tpu.dot_dimension_numbers<[1], [0], [0], [1], [0, 0, 1, 1], [], []>} : vector<32x16xbf16>, vector<16x384xbf16>, vector<32x384xf32> -> vector<32x384xf32>
    %155 = arith.addf %150, %154 : vector<32x384xf32>
    %c3_104 = arith.constant 3 : index
    %c0_105 = arith.constant 0 : index
    %c0_106 = arith.constant 0 : index
    %156 = vector.load %arg4[%c3_104, %c0_105, %c0_106] : memref<49x32x16xbf16, #tpu.memory_space<vmem>>, vector<1x32x16xbf16>
    %157 = vector.shape_cast %156 : vector<1x32x16xbf16> to vector<32x16xbf16>
    %c0_107 = arith.constant 0 : index
    %c56 = arith.constant 56 : index
    %158 = vector.load %arg8[%c0_107, %c56] : memref<16x640xbf16, #tpu.memory_space<vmem>>, vector<16x384xbf16>
    %cst_108 = arith.constant dense<0.000000e+00> : vector<32x384xf32>
    %159 = tpu.matmul %157, %158, %cst_108 {dimension_numbers = #tpu.dot_dimension_numbers<[1], [0], [0], [1], [0, 0, 1, 1], [], []>} : vector<32x16xbf16>, vector<16x384xbf16>, vector<32x384xf32> -> vector<32x384xf32>
    %160 = arith.addf %155, %159 : vector<32x384xf32>
    %c4_109 = arith.constant 4 : index
    %c0_110 = arith.constant 0 : index
    %c0_111 = arith.constant 0 : index
    %161 = vector.load %arg4[%c4_109, %c0_110, %c0_111] : memref<49x32x16xbf16, #tpu.memory_space<vmem>>, vector<1x32x16xbf16>
    %162 = vector.shape_cast %161 : vector<1x32x16xbf16> to vector<32x16xbf16>
    %c0_112 = arith.constant 0 : index
    %c57 = arith.constant 57 : index
    %163 = vector.load %arg8[%c0_112, %c57] : memref<16x640xbf16, #tpu.memory_space<vmem>>, vector<16x384xbf16>
    %cst_113 = arith.constant dense<0.000000e+00> : vector<32x384xf32>
    %164 = tpu.matmul %162, %163, %cst_113 {dimension_numbers = #tpu.dot_dimension_numbers<[1], [0], [0], [1], [0, 0, 1, 1], [], []>} : vector<32x16xbf16>, vector<16x384xbf16>, vector<32x384xf32> -> vector<32x384xf32>
    %165 = arith.addf %160, %164 : vector<32x384xf32>
    %c5_114 = arith.constant 5 : index
    %c0_115 = arith.constant 0 : index
    %c0_116 = arith.constant 0 : index
    %166 = vector.load %arg4[%c5_114, %c0_115, %c0_116] : memref<49x32x16xbf16, #tpu.memory_space<vmem>>, vector<1x32x16xbf16>
    %167 = vector.shape_cast %166 : vector<1x32x16xbf16> to vector<32x16xbf16>
    %c0_117 = arith.constant 0 : index
    %c58 = arith.constant 58 : index
    %168 = vector.load %arg8[%c0_117, %c58] : memref<16x640xbf16, #tpu.memory_space<vmem>>, vector<16x384xbf16>
    %cst_118 = arith.constant dense<0.000000e+00> : vector<32x384xf32>
    %169 = tpu.matmul %167, %168, %cst_118 {dimension_numbers = #tpu.dot_dimension_numbers<[1], [0], [0], [1], [0, 0, 1, 1], [], []>} : vector<32x16xbf16>, vector<16x384xbf16>, vector<32x384xf32> -> vector<32x384xf32>
    %170 = arith.addf %165, %169 : vector<32x384xf32>
    %c6_119 = arith.constant 6 : index
    %c0_120 = arith.constant 0 : index
    %c0_121 = arith.constant 0 : index
    %171 = vector.load %arg4[%c6_119, %c0_120, %c0_121] : memref<49x32x16xbf16, #tpu.memory_space<vmem>>, vector<1x32x16xbf16>
    %172 = vector.shape_cast %171 : vector<1x32x16xbf16> to vector<32x16xbf16>
    %c0_122 = arith.constant 0 : index
    %c59 = arith.constant 59 : index
    %173 = vector.load %arg8[%c0_122, %c59] : memref<16x640xbf16, #tpu.memory_space<vmem>>, vector<16x384xbf16>
    %cst_123 = arith.constant dense<0.000000e+00> : vector<32x384xf32>
    %174 = tpu.matmul %172, %173, %cst_123 {dimension_numbers = #tpu.dot_dimension_numbers<[1], [0], [0], [1], [0, 0, 1, 1], [], []>} : vector<32x16xbf16>, vector<16x384xbf16>, vector<32x384xf32> -> vector<32x384xf32>
    %175 = arith.addf %170, %174 : vector<32x384xf32>
    %c7_124 = arith.constant 7 : index
    %c0_125 = arith.constant 0 : index
    %c0_126 = arith.constant 0 : index
    %176 = vector.load %arg4[%c7_124, %c0_125, %c0_126] : memref<49x32x16xbf16, #tpu.memory_space<vmem>>, vector<1x32x16xbf16>
    %177 = vector.shape_cast %176 : vector<1x32x16xbf16> to vector<32x16xbf16>
    %c0_127 = arith.constant 0 : index
    %c77 = arith.constant 77 : index
    %178 = vector.load %arg8[%c0_127, %c77] : memref<16x640xbf16, #tpu.memory_space<vmem>>, vector<16x384xbf16>
    %cst_128 = arith.constant dense<0.000000e+00> : vector<32x384xf32>
    %179 = tpu.matmul %177, %178, %cst_128 {dimension_numbers = #tpu.dot_dimension_numbers<[1], [0], [0], [1], [0, 0, 1, 1], [], []>} : vector<32x16xbf16>, vector<16x384xbf16>, vector<32x384xf32> -> vector<32x384xf32>
    %180 = arith.addf %175, %179 : vector<32x384xf32>
    %c8_129 = arith.constant 8 : index
    %c0_130 = arith.constant 0 : index
    %c0_131 = arith.constant 0 : index
    %181 = vector.load %arg4[%c8_129, %c0_130, %c0_131] : memref<49x32x16xbf16, #tpu.memory_space<vmem>>, vector<1x32x16xbf16>
    %182 = vector.shape_cast %181 : vector<1x32x16xbf16> to vector<32x16xbf16>
    %c0_132 = arith.constant 0 : index
    %c78 = arith.constant 78 : index
    %183 = vector.load %arg8[%c0_132, %c78] : memref<16x640xbf16, #tpu.memory_space<vmem>>, vector<16x384xbf16>
    %cst_133 = arith.constant dense<0.000000e+00> : vector<32x384xf32>
    %184 = tpu.matmul %182, %183, %cst_133 {dimension_numbers = #tpu.dot_dimension_numbers<[1], [0], [0], [1], [0, 0, 1, 1], [], []>} : vector<32x16xbf16>, vector<16x384xbf16>, vector<32x384xf32> -> vector<32x384xf32>
    %185 = arith.addf %180, %184 : vector<32x384xf32>
    %c9_134 = arith.constant 9 : index
    %c0_135 = arith.constant 0 : index
    %c0_136 = arith.constant 0 : index
    %186 = vector.load %arg4[%c9_134, %c0_135, %c0_136] : memref<49x32x16xbf16, #tpu.memory_space<vmem>>, vector<1x32x16xbf16>
    %187 = vector.shape_cast %186 : vector<1x32x16xbf16> to vector<32x16xbf16>
    %c0_137 = arith.constant 0 : index
    %c79 = arith.constant 79 : index
    %188 = vector.load %arg8[%c0_137, %c79] : memref<16x640xbf16, #tpu.memory_space<vmem>>, vector<16x384xbf16>
    %cst_138 = arith.constant dense<0.000000e+00> : vector<32x384xf32>
    %189 = tpu.matmul %187, %188, %cst_138 {dimension_numbers = #tpu.dot_dimension_numbers<[1], [0], [0], [1], [0, 0, 1, 1], [], []>} : vector<32x16xbf16>, vector<16x384xbf16>, vector<32x384xf32> -> vector<32x384xf32>
    %190 = arith.addf %185, %189 : vector<32x384xf32>
    %c10_139 = arith.constant 10 : index
    %c0_140 = arith.constant 0 : index
    %c0_141 = arith.constant 0 : index
    %191 = vector.load %arg4[%c10_139, %c0_140, %c0_141] : memref<49x32x16xbf16, #tpu.memory_space<vmem>>, vector<1x32x16xbf16>
    %192 = vector.shape_cast %191 : vector<1x32x16xbf16> to vector<32x16xbf16>
    %c0_142 = arith.constant 0 : index
    %c80 = arith.constant 80 : index
    %193 = vector.load %arg8[%c0_142, %c80] : memref<16x640xbf16, #tpu.memory_space<vmem>>, vector<16x384xbf16>
    %cst_143 = arith.constant dense<0.000000e+00> : vector<32x384xf32>
    %194 = tpu.matmul %192, %193, %cst_143 {dimension_numbers = #tpu.dot_dimension_numbers<[1], [0], [0], [1], [0, 0, 1, 1], [], []>} : vector<32x16xbf16>, vector<16x384xbf16>, vector<32x384xf32> -> vector<32x384xf32>
    %195 = arith.addf %190, %194 : vector<32x384xf32>
    %c11_144 = arith.constant 11 : index
    %c0_145 = arith.constant 0 : index
    %c0_146 = arith.constant 0 : index
    %196 = vector.load %arg4[%c11_144, %c0_145, %c0_146] : memref<49x32x16xbf16, #tpu.memory_space<vmem>>, vector<1x32x16xbf16>
    %197 = vector.shape_cast %196 : vector<1x32x16xbf16> to vector<32x16xbf16>
    %c0_147 = arith.constant 0 : index
    %c81 = arith.constant 81 : index
    %198 = vector.load %arg8[%c0_147, %c81] : memref<16x640xbf16, #tpu.memory_space<vmem>>, vector<16x384xbf16>
    %cst_148 = arith.constant dense<0.000000e+00> : vector<32x384xf32>
    %199 = tpu.matmul %197, %198, %cst_148 {dimension_numbers = #tpu.dot_dimension_numbers<[1], [0], [0], [1], [0, 0, 1, 1], [], []>} : vector<32x16xbf16>, vector<16x384xbf16>, vector<32x384xf32> -> vector<32x384xf32>
    %200 = arith.addf %195, %199 : vector<32x384xf32>
    %c12_149 = arith.constant 12 : index
    %c0_150 = arith.constant 0 : index
    %c0_151 = arith.constant 0 : index
    %201 = vector.load %arg4[%c12_149, %c0_150, %c0_151] : memref<49x32x16xbf16, #tpu.memory_space<vmem>>, vector<1x32x16xbf16>
    %202 = vector.shape_cast %201 : vector<1x32x16xbf16> to vector<32x16xbf16>
    %c0_152 = arith.constant 0 : index
    %c82 = arith.constant 82 : index
    %203 = vector.load %arg8[%c0_152, %c82] : memref<16x640xbf16, #tpu.memory_space<vmem>>, vector<16x384xbf16>
    %cst_153 = arith.constant dense<0.000000e+00> : vector<32x384xf32>
    %204 = tpu.matmul %202, %203, %cst_153 {dimension_numbers = #tpu.dot_dimension_numbers<[1], [0], [0], [1], [0, 0, 1, 1], [], []>} : vector<32x16xbf16>, vector<16x384xbf16>, vector<32x384xf32> -> vector<32x384xf32>
    %205 = arith.addf %200, %204 : vector<32x384xf32>
    %c13_154 = arith.constant 13 : index
    %c0_155 = arith.constant 0 : index
    %c0_156 = arith.constant 0 : index
    %206 = vector.load %arg4[%c13_154, %c0_155, %c0_156] : memref<49x32x16xbf16, #tpu.memory_space<vmem>>, vector<1x32x16xbf16>
    %207 = vector.shape_cast %206 : vector<1x32x16xbf16> to vector<32x16xbf16>
    %c0_157 = arith.constant 0 : index
    %c83 = arith.constant 83 : index
    %208 = vector.load %arg8[%c0_157, %c83] : memref<16x640xbf16, #tpu.memory_space<vmem>>, vector<16x384xbf16>
    %cst_158 = arith.constant dense<0.000000e+00> : vector<32x384xf32>
    %209 = tpu.matmul %207, %208, %cst_158 {dimension_numbers = #tpu.dot_dimension_numbers<[1], [0], [0], [1], [0, 0, 1, 1], [], []>} : vector<32x16xbf16>, vector<16x384xbf16>, vector<32x384xf32> -> vector<32x384xf32>
    %210 = arith.addf %205, %209 : vector<32x384xf32>
    %c14_159 = arith.constant 14 : index
    %c0_160 = arith.constant 0 : index
    %c0_161 = arith.constant 0 : index
    %211 = vector.load %arg4[%c14_159, %c0_160, %c0_161] : memref<49x32x16xbf16, #tpu.memory_space<vmem>>, vector<1x32x16xbf16>
    %212 = vector.shape_cast %211 : vector<1x32x16xbf16> to vector<32x16xbf16>
    %c0_162 = arith.constant 0 : index
    %c101 = arith.constant 101 : index
    %213 = vector.load %arg8[%c0_162, %c101] : memref<16x640xbf16, #tpu.memory_space<vmem>>, vector<16x384xbf16>
    %cst_163 = arith.constant dense<0.000000e+00> : vector<32x384xf32>
    %214 = tpu.matmul %212, %213, %cst_163 {dimension_numbers = #tpu.dot_dimension_numbers<[1], [0], [0], [1], [0, 0, 1, 1], [], []>} : vector<32x16xbf16>, vector<16x384xbf16>, vector<32x384xf32> -> vector<32x384xf32>
    %215 = arith.addf %210, %214 : vector<32x384xf32>
    %c15_164 = arith.constant 15 : index
    %c0_165 = arith.constant 0 : index
    %c0_166 = arith.constant 0 : index
    %216 = vector.load %arg4[%c15_164, %c0_165, %c0_166] : memref<49x32x16xbf16, #tpu.memory_space<vmem>>, vector<1x32x16xbf16>
    %217 = vector.shape_cast %216 : vector<1x32x16xbf16> to vector<32x16xbf16>
    %c0_167 = arith.constant 0 : index
    %c102 = arith.constant 102 : index
    %218 = vector.load %arg8[%c0_167, %c102] : memref<16x640xbf16, #tpu.memory_space<vmem>>, vector<16x384xbf16>
    %cst_168 = arith.constant dense<0.000000e+00> : vector<32x384xf32>
    %219 = tpu.matmul %217, %218, %cst_168 {dimension_numbers = #tpu.dot_dimension_numbers<[1], [0], [0], [1], [0, 0, 1, 1], [], []>} : vector<32x16xbf16>, vector<16x384xbf16>, vector<32x384xf32> -> vector<32x384xf32>
    %220 = arith.addf %215, %219 : vector<32x384xf32>
    %c16_169 = arith.constant 16 : index
    %c0_170 = arith.constant 0 : index
    %c0_171 = arith.constant 0 : index
    %221 = vector.load %arg4[%c16_169, %c0_170, %c0_171] : memref<49x32x16xbf16, #tpu.memory_space<vmem>>, vector<1x32x16xbf16>
    %222 = vector.shape_cast %221 : vector<1x32x16xbf16> to vector<32x16xbf16>
    %c0_172 = arith.constant 0 : index
    %c103 = arith.constant 103 : index
    %223 = vector.load %arg8[%c0_172, %c103] : memref<16x640xbf16, #tpu.memory_space<vmem>>, vector<16x384xbf16>
    %cst_173 = arith.constant dense<0.000000e+00> : vector<32x384xf32>
    %224 = tpu.matmul %222, %223, %cst_173 {dimension_numbers = #tpu.dot_dimension_numbers<[1], [0], [0], [1], [0, 0, 1, 1], [], []>} : vector<32x16xbf16>, vector<16x384xbf16>, vector<32x384xf32> -> vector<32x384xf32>
    %225 = arith.addf %220, %224 : vector<32x384xf32>
    %c17_174 = arith.constant 17 : index
    %c0_175 = arith.constant 0 : index
    %c0_176 = arith.constant 0 : index
    %226 = vector.load %arg4[%c17_174, %c0_175, %c0_176] : memref<49x32x16xbf16, #tpu.memory_space<vmem>>, vector<1x32x16xbf16>
    %227 = vector.shape_cast %226 : vector<1x32x16xbf16> to vector<32x16xbf16>
    %c0_177 = arith.constant 0 : index
    %c104 = arith.constant 104 : index
    %228 = vector.load %arg8[%c0_177, %c104] : memref<16x640xbf16, #tpu.memory_space<vmem>>, vector<16x384xbf16>
    %cst_178 = arith.constant dense<0.000000e+00> : vector<32x384xf32>
    %229 = tpu.matmul %227, %228, %cst_178 {dimension_numbers = #tpu.dot_dimension_numbers<[1], [0], [0], [1], [0, 0, 1, 1], [], []>} : vector<32x16xbf16>, vector<16x384xbf16>, vector<32x384xf32> -> vector<32x384xf32>
    %230 = arith.addf %225, %229 : vector<32x384xf32>
    %c18_179 = arith.constant 18 : index
    %c0_180 = arith.constant 0 : index
    %c0_181 = arith.constant 0 : index
    %231 = vector.load %arg4[%c18_179, %c0_180, %c0_181] : memref<49x32x16xbf16, #tpu.memory_space<vmem>>, vector<1x32x16xbf16>
    %232 = vector.shape_cast %231 : vector<1x32x16xbf16> to vector<32x16xbf16>
    %c0_182 = arith.constant 0 : index
    %c105 = arith.constant 105 : index
    %233 = vector.load %arg8[%c0_182, %c105] : memref<16x640xbf16, #tpu.memory_space<vmem>>, vector<16x384xbf16>
    %cst_183 = arith.constant dense<0.000000e+00> : vector<32x384xf32>
    %234 = tpu.matmul %232, %233, %cst_183 {dimension_numbers = #tpu.dot_dimension_numbers<[1], [0], [0], [1], [0, 0, 1, 1], [], []>} : vector<32x16xbf16>, vector<16x384xbf16>, vector<32x384xf32> -> vector<32x384xf32>
    %235 = arith.addf %230, %234 : vector<32x384xf32>
    %c19_184 = arith.constant 19 : index
    %c0_185 = arith.constant 0 : index
    %c0_186 = arith.constant 0 : index
    %236 = vector.load %arg4[%c19_184, %c0_185, %c0_186] : memref<49x32x16xbf16, #tpu.memory_space<vmem>>, vector<1x32x16xbf16>
    %237 = vector.shape_cast %236 : vector<1x32x16xbf16> to vector<32x16xbf16>
    %c0_187 = arith.constant 0 : index
    %c106 = arith.constant 106 : index
    %238 = vector.load %arg8[%c0_187, %c106] : memref<16x640xbf16, #tpu.memory_space<vmem>>, vector<16x384xbf16>
    %cst_188 = arith.constant dense<0.000000e+00> : vector<32x384xf32>
    %239 = tpu.matmul %237, %238, %cst_188 {dimension_numbers = #tpu.dot_dimension_numbers<[1], [0], [0], [1], [0, 0, 1, 1], [], []>} : vector<32x16xbf16>, vector<16x384xbf16>, vector<32x384xf32> -> vector<32x384xf32>
    %240 = arith.addf %235, %239 : vector<32x384xf32>
    %c20_189 = arith.constant 20 : index
    %c0_190 = arith.constant 0 : index
    %c0_191 = arith.constant 0 : index
    %241 = vector.load %arg4[%c20_189, %c0_190, %c0_191] : memref<49x32x16xbf16, #tpu.memory_space<vmem>>, vector<1x32x16xbf16>
    %242 = vector.shape_cast %241 : vector<1x32x16xbf16> to vector<32x16xbf16>
    %c0_192 = arith.constant 0 : index
    %c107 = arith.constant 107 : index
    %243 = vector.load %arg8[%c0_192, %c107] : memref<16x640xbf16, #tpu.memory_space<vmem>>, vector<16x384xbf16>
    %cst_193 = arith.constant dense<0.000000e+00> : vector<32x384xf32>
    %244 = tpu.matmul %242, %243, %cst_193 {dimension_numbers = #tpu.dot_dimension_numbers<[1], [0], [0], [1], [0, 0, 1, 1], [], []>} : vector<32x16xbf16>, vector<16x384xbf16>, vector<32x384xf32> -> vector<32x384xf32>
    %245 = arith.addf %240, %244 : vector<32x384xf32>
    %c21_194 = arith.constant 21 : index
    %c0_195 = arith.constant 0 : index
    %c0_196 = arith.constant 0 : index
    %246 = vector.load %arg4[%c21_194, %c0_195, %c0_196] : memref<49x32x16xbf16, #tpu.memory_space<vmem>>, vector<1x32x16xbf16>
    %247 = vector.shape_cast %246 : vector<1x32x16xbf16> to vector<32x16xbf16>
    %c0_197 = arith.constant 0 : index
    %c125 = arith.constant 125 : index
    %248 = vector.load %arg8[%c0_197, %c125] : memref<16x640xbf16, #tpu.memory_space<vmem>>, vector<16x384xbf16>
    %cst_198 = arith.constant dense<0.000000e+00> : vector<32x384xf32>
    %249 = tpu.matmul %247, %248, %cst_198 {dimension_numbers = #tpu.dot_dimension_numbers<[1], [0], [0], [1], [0, 0, 1, 1], [], []>} : vector<32x16xbf16>, vector<16x384xbf16>, vector<32x384xf32> -> vector<32x384xf32>
    %250 = arith.addf %245, %249 : vector<32x384xf32>
    %c22_199 = arith.constant 22 : index
    %c0_200 = arith.constant 0 : index
    %c0_201 = arith.constant 0 : index
    %251 = vector.load %arg4[%c22_199, %c0_200, %c0_201] : memref<49x32x16xbf16, #tpu.memory_space<vmem>>, vector<1x32x16xbf16>
    %252 = vector.shape_cast %251 : vector<1x32x16xbf16> to vector<32x16xbf16>
    %c0_202 = arith.constant 0 : index
    %c126 = arith.constant 126 : index
    %253 = vector.load %arg8[%c0_202, %c126] : memref<16x640xbf16, #tpu.memory_space<vmem>>, vector<16x384xbf16>
    %cst_203 = arith.constant dense<0.000000e+00> : vector<32x384xf32>
    %254 = tpu.matmul %252, %253, %cst_203 {dimension_numbers = #tpu.dot_dimension_numbers<[1], [0], [0], [1], [0, 0, 1, 1], [], []>} : vector<32x16xbf16>, vector<16x384xbf16>, vector<32x384xf32> -> vector<32x384xf32>
    %255 = arith.addf %250, %254 : vector<32x384xf32>
    %c23_204 = arith.constant 23 : index
    %c0_205 = arith.constant 0 : index
    %c0_206 = arith.constant 0 : index
    %256 = vector.load %arg4[%c23_204, %c0_205, %c0_206] : memref<49x32x16xbf16, #tpu.memory_space<vmem>>, vector<1x32x16xbf16>
    %257 = vector.shape_cast %256 : vector<1x32x16xbf16> to vector<32x16xbf16>
    %c0_207 = arith.constant 0 : index
    %c127 = arith.constant 127 : index
    %258 = vector.load %arg8[%c0_207, %c127] : memref<16x640xbf16, #tpu.memory_space<vmem>>, vector<16x384xbf16>
    %cst_208 = arith.constant dense<0.000000e+00> : vector<32x384xf32>
    %259 = tpu.matmul %257, %258, %cst_208 {dimension_numbers = #tpu.dot_dimension_numbers<[1], [0], [0], [1], [0, 0, 1, 1], [], []>} : vector<32x16xbf16>, vector<16x384xbf16>, vector<32x384xf32> -> vector<32x384xf32>
    %260 = arith.addf %255, %259 : vector<32x384xf32>
    %c24_209 = arith.constant 24 : index
    %c0_210 = arith.constant 0 : index
    %c0_211 = arith.constant 0 : index
    %261 = vector.load %arg4[%c24_209, %c0_210, %c0_211] : memref<49x32x16xbf16, #tpu.memory_space<vmem>>, vector<1x32x16xbf16>
    %262 = vector.shape_cast %261 : vector<1x32x16xbf16> to vector<32x16xbf16>
    %c0_212 = arith.constant 0 : index
    %c128_213 = arith.constant 128 : index
    %263 = vector.load %arg8[%c0_212, %c128_213] : memref<16x640xbf16, #tpu.memory_space<vmem>>, vector<16x384xbf16>
    %cst_214 = arith.constant dense<0.000000e+00> : vector<32x384xf32>
    %264 = tpu.matmul %262, %263, %cst_214 {dimension_numbers = #tpu.dot_dimension_numbers<[1], [0], [0], [1], [0, 0, 1, 1], [], []>} : vector<32x16xbf16>, vector<16x384xbf16>, vector<32x384xf32> -> vector<32x384xf32>
    %265 = arith.addf %260, %264 : vector<32x384xf32>
    %c25 = arith.constant 25 : index
    %c0_215 = arith.constant 0 : index
    %c0_216 = arith.constant 0 : index
    %266 = vector.load %arg4[%c25, %c0_215, %c0_216] : memref<49x32x16xbf16, #tpu.memory_space<vmem>>, vector<1x32x16xbf16>
    %267 = vector.shape_cast %266 : vector<1x32x16xbf16> to vector<32x16xbf16>
    %c0_217 = arith.constant 0 : index
    %c129 = arith.constant 129 : index
    %268 = vector.load %arg8[%c0_217, %c129] : memref<16x640xbf16, #tpu.memory_space<vmem>>, vector<16x384xbf16>
    %cst_218 = arith.constant dense<0.000000e+00> : vector<32x384xf32>
    %269 = tpu.matmul %267, %268, %cst_218 {dimension_numbers = #tpu.dot_dimension_numbers<[1], [0], [0], [1], [0, 0, 1, 1], [], []>} : vector<32x16xbf16>, vector<16x384xbf16>, vector<32x384xf32> -> vector<32x384xf32>
    %270 = arith.addf %265, %269 : vector<32x384xf32>
    %c26 = arith.constant 26 : index
    %c0_219 = arith.constant 0 : index
    %c0_220 = arith.constant 0 : index
    %271 = vector.load %arg4[%c26, %c0_219, %c0_220] : memref<49x32x16xbf16, #tpu.memory_space<vmem>>, vector<1x32x16xbf16>
    %272 = vector.shape_cast %271 : vector<1x32x16xbf16> to vector<32x16xbf16>
    %c0_221 = arith.constant 0 : index
    %c130 = arith.constant 130 : index
    %273 = vector.load %arg8[%c0_221, %c130] : memref<16x640xbf16, #tpu.memory_space<vmem>>, vector<16x384xbf16>
    %cst_222 = arith.constant dense<0.000000e+00> : vector<32x384xf32>
    %274 = tpu.matmul %272, %273, %cst_222 {dimension_numbers = #tpu.dot_dimension_numbers<[1], [0], [0], [1], [0, 0, 1, 1], [], []>} : vector<32x16xbf16>, vector<16x384xbf16>, vector<32x384xf32> -> vector<32x384xf32>
    %275 = arith.addf %270, %274 : vector<32x384xf32>
    %c27 = arith.constant 27 : index
    %c0_223 = arith.constant 0 : index
    %c0_224 = arith.constant 0 : index
    %276 = vector.load %arg4[%c27, %c0_223, %c0_224] : memref<49x32x16xbf16, #tpu.memory_space<vmem>>, vector<1x32x16xbf16>
    %277 = vector.shape_cast %276 : vector<1x32x16xbf16> to vector<32x16xbf16>
    %c0_225 = arith.constant 0 : index
    %c131 = arith.constant 131 : index
    %278 = vector.load %arg8[%c0_225, %c131] : memref<16x640xbf16, #tpu.memory_space<vmem>>, vector<16x384xbf16>
    %cst_226 = arith.constant dense<0.000000e+00> : vector<32x384xf32>
    %279 = tpu.matmul %277, %278, %cst_226 {dimension_numbers = #tpu.dot_dimension_numbers<[1], [0], [0], [1], [0, 0, 1, 1], [], []>} : vector<32x16xbf16>, vector<16x384xbf16>, vector<32x384xf32> -> vector<32x384xf32>
    %280 = arith.addf %275, %279 : vector<32x384xf32>
    %c28 = arith.constant 28 : index
    %c0_227 = arith.constant 0 : index
    %c0_228 = arith.constant 0 : index
    %281 = vector.load %arg4[%c28, %c0_227, %c0_228] : memref<49x32x16xbf16, #tpu.memory_space<vmem>>, vector<1x32x16xbf16>
    %282 = vector.shape_cast %281 : vector<1x32x16xbf16> to vector<32x16xbf16>
    %c0_229 = arith.constant 0 : index
    %c149 = arith.constant 149 : index
    %283 = vector.load %arg8[%c0_229, %c149] : memref<16x640xbf16, #tpu.memory_space<vmem>>, vector<16x384xbf16>
    %cst_230 = arith.constant dense<0.000000e+00> : vector<32x384xf32>
    %284 = tpu.matmul %282, %283, %cst_230 {dimension_numbers = #tpu.dot_dimension_numbers<[1], [0], [0], [1], [0, 0, 1, 1], [], []>} : vector<32x16xbf16>, vector<16x384xbf16>, vector<32x384xf32> -> vector<32x384xf32>
    %285 = arith.addf %280, %284 : vector<32x384xf32>
    %c29 = arith.constant 29 : index
    %c0_231 = arith.constant 0 : index
    %c0_232 = arith.constant 0 : index
    %286 = vector.load %arg4[%c29, %c0_231, %c0_232] : memref<49x32x16xbf16, #tpu.memory_space<vmem>>, vector<1x32x16xbf16>
    %287 = vector.shape_cast %286 : vector<1x32x16xbf16> to vector<32x16xbf16>
    %c0_233 = arith.constant 0 : index
    %c150 = arith.constant 150 : index
    %288 = vector.load %arg8[%c0_233, %c150] : memref<16x640xbf16, #tpu.memory_space<vmem>>, vector<16x384xbf16>
    %cst_234 = arith.constant dense<0.000000e+00> : vector<32x384xf32>
    %289 = tpu.matmul %287, %288, %cst_234 {dimension_numbers = #tpu.dot_dimension_numbers<[1], [0], [0], [1], [0, 0, 1, 1], [], []>} : vector<32x16xbf16>, vector<16x384xbf16>, vector<32x384xf32> -> vector<32x384xf32>
    %290 = arith.addf %285, %289 : vector<32x384xf32>
    %c30 = arith.constant 30 : index
    %c0_235 = arith.constant 0 : index
    %c0_236 = arith.constant 0 : index
    %291 = vector.load %arg4[%c30, %c0_235, %c0_236] : memref<49x32x16xbf16, #tpu.memory_space<vmem>>, vector<1x32x16xbf16>
    %292 = vector.shape_cast %291 : vector<1x32x16xbf16> to vector<32x16xbf16>
    %c0_237 = arith.constant 0 : index
    %c151 = arith.constant 151 : index
    %293 = vector.load %arg8[%c0_237, %c151] : memref<16x640xbf16, #tpu.memory_space<vmem>>, vector<16x384xbf16>
    %cst_238 = arith.constant dense<0.000000e+00> : vector<32x384xf32>
    %294 = tpu.matmul %292, %293, %cst_238 {dimension_numbers = #tpu.dot_dimension_numbers<[1], [0], [0], [1], [0, 0, 1, 1], [], []>} : vector<32x16xbf16>, vector<16x384xbf16>, vector<32x384xf32> -> vector<32x384xf32>
    %295 = arith.addf %290, %294 : vector<32x384xf32>
    %c31 = arith.constant 31 : index
    %c0_239 = arith.constant 0 : index
    %c0_240 = arith.constant 0 : index
    %296 = vector.load %arg4[%c31, %c0_239, %c0_240] : memref<49x32x16xbf16, #tpu.memory_space<vmem>>, vector<1x32x16xbf16>
    %297 = vector.shape_cast %296 : vector<1x32x16xbf16> to vector<32x16xbf16>
    %c0_241 = arith.constant 0 : index
    %c152 = arith.constant 152 : index
    %298 = vector.load %arg8[%c0_241, %c152] : memref<16x640xbf16, #tpu.memory_space<vmem>>, vector<16x384xbf16>
    %cst_242 = arith.constant dense<0.000000e+00> : vector<32x384xf32>
    %299 = tpu.matmul %297, %298, %cst_242 {dimension_numbers = #tpu.dot_dimension_numbers<[1], [0], [0], [1], [0, 0, 1, 1], [], []>} : vector<32x16xbf16>, vector<16x384xbf16>, vector<32x384xf32> -> vector<32x384xf32>
    %300 = arith.addf %295, %299 : vector<32x384xf32>
    %c32 = arith.constant 32 : index
    %c0_243 = arith.constant 0 : index
    %c0_244 = arith.constant 0 : index
    %301 = vector.load %arg4[%c32, %c0_243, %c0_244] : memref<49x32x16xbf16, #tpu.memory_space<vmem>>, vector<1x32x16xbf16>
    %302 = vector.shape_cast %301 : vector<1x32x16xbf16> to vector<32x16xbf16>
    %c0_245 = arith.constant 0 : index
    %c153 = arith.constant 153 : index
    %303 = vector.load %arg8[%c0_245, %c153] : memref<16x640xbf16, #tpu.memory_space<vmem>>, vector<16x384xbf16>
    %cst_246 = arith.constant dense<0.000000e+00> : vector<32x384xf32>
    %304 = tpu.matmul %302, %303, %cst_246 {dimension_numbers = #tpu.dot_dimension_numbers<[1], [0], [0], [1], [0, 0, 1, 1], [], []>} : vector<32x16xbf16>, vector<16x384xbf16>, vector<32x384xf32> -> vector<32x384xf32>
    %305 = arith.addf %300, %304 : vector<32x384xf32>
    %c33 = arith.constant 33 : index
    %c0_247 = arith.constant 0 : index
    %c0_248 = arith.constant 0 : index
    %306 = vector.load %arg4[%c33, %c0_247, %c0_248] : memref<49x32x16xbf16, #tpu.memory_space<vmem>>, vector<1x32x16xbf16>
    %307 = vector.shape_cast %306 : vector<1x32x16xbf16> to vector<32x16xbf16>
    %c0_249 = arith.constant 0 : index
    %c154 = arith.constant 154 : index
    %308 = vector.load %arg8[%c0_249, %c154] : memref<16x640xbf16, #tpu.memory_space<vmem>>, vector<16x384xbf16>
    %cst_250 = arith.constant dense<0.000000e+00> : vector<32x384xf32>
    %309 = tpu.matmul %307, %308, %cst_250 {dimension_numbers = #tpu.dot_dimension_numbers<[1], [0], [0], [1], [0, 0, 1, 1], [], []>} : vector<32x16xbf16>, vector<16x384xbf16>, vector<32x384xf32> -> vector<32x384xf32>
    %310 = arith.addf %305, %309 : vector<32x384xf32>
    %c34 = arith.constant 34 : index
    %c0_251 = arith.constant 0 : index
    %c0_252 = arith.constant 0 : index
    %311 = vector.load %arg4[%c34, %c0_251, %c0_252] : memref<49x32x16xbf16, #tpu.memory_space<vmem>>, vector<1x32x16xbf16>
    %312 = vector.shape_cast %311 : vector<1x32x16xbf16> to vector<32x16xbf16>
    %c0_253 = arith.constant 0 : index
    %c155 = arith.constant 155 : index
    %313 = vector.load %arg8[%c0_253, %c155] : memref<16x640xbf16, #tpu.memory_space<vmem>>, vector<16x384xbf16>
    %cst_254 = arith.constant dense<0.000000e+00> : vector<32x384xf32>
    %314 = tpu.matmul %312, %313, %cst_254 {dimension_numbers = #tpu.dot_dimension_numbers<[1], [0], [0], [1], [0, 0, 1, 1], [], []>} : vector<32x16xbf16>, vector<16x384xbf16>, vector<32x384xf32> -> vector<32x384xf32>
    %315 = arith.addf %310, %314 : vector<32x384xf32>
    %c35 = arith.constant 35 : index
    %c0_255 = arith.constant 0 : index
    %c0_256 = arith.constant 0 : index
    %316 = vector.load %arg4[%c35, %c0_255, %c0_256] : memref<49x32x16xbf16, #tpu.memory_space<vmem>>, vector<1x32x16xbf16>
    %317 = vector.shape_cast %316 : vector<1x32x16xbf16> to vector<32x16xbf16>
    %c0_257 = arith.constant 0 : index
    %c173 = arith.constant 173 : index
    %318 = vector.load %arg8[%c0_257, %c173] : memref<16x640xbf16, #tpu.memory_space<vmem>>, vector<16x384xbf16>
    %cst_258 = arith.constant dense<0.000000e+00> : vector<32x384xf32>
    %319 = tpu.matmul %317, %318, %cst_258 {dimension_numbers = #tpu.dot_dimension_numbers<[1], [0], [0], [1], [0, 0, 1, 1], [], []>} : vector<32x16xbf16>, vector<16x384xbf16>, vector<32x384xf32> -> vector<32x384xf32>
    %320 = arith.addf %315, %319 : vector<32x384xf32>
    %c36 = arith.constant 36 : index
    %c0_259 = arith.constant 0 : index
    %c0_260 = arith.constant 0 : index
    %321 = vector.load %arg4[%c36, %c0_259, %c0_260] : memref<49x32x16xbf16, #tpu.memory_space<vmem>>, vector<1x32x16xbf16>
    %322 = vector.shape_cast %321 : vector<1x32x16xbf16> to vector<32x16xbf16>
    %c0_261 = arith.constant 0 : index
    %c174 = arith.constant 174 : index
    %323 = vector.load %arg8[%c0_261, %c174] : memref<16x640xbf16, #tpu.memory_space<vmem>>, vector<16x384xbf16>
    %cst_262 = arith.constant dense<0.000000e+00> : vector<32x384xf32>
    %324 = tpu.matmul %322, %323, %cst_262 {dimension_numbers = #tpu.dot_dimension_numbers<[1], [0], [0], [1], [0, 0, 1, 1], [], []>} : vector<32x16xbf16>, vector<16x384xbf16>, vector<32x384xf32> -> vector<32x384xf32>
    %325 = arith.addf %320, %324 : vector<32x384xf32>
    %c37 = arith.constant 37 : index
    %c0_263 = arith.constant 0 : index
    %c0_264 = arith.constant 0 : index
    %326 = vector.load %arg4[%c37, %c0_263, %c0_264] : memref<49x32x16xbf16, #tpu.memory_space<vmem>>, vector<1x32x16xbf16>
    %327 = vector.shape_cast %326 : vector<1x32x16xbf16> to vector<32x16xbf16>
    %c0_265 = arith.constant 0 : index
    %c175 = arith.constant 175 : index
    %328 = vector.load %arg8[%c0_265, %c175] : memref<16x640xbf16, #tpu.memory_space<vmem>>, vector<16x384xbf16>
    %cst_266 = arith.constant dense<0.000000e+00> : vector<32x384xf32>
    %329 = tpu.matmul %327, %328, %cst_266 {dimension_numbers = #tpu.dot_dimension_numbers<[1], [0], [0], [1], [0, 0, 1, 1], [], []>} : vector<32x16xbf16>, vector<16x384xbf16>, vector<32x384xf32> -> vector<32x384xf32>
    %330 = arith.addf %325, %329 : vector<32x384xf32>
    %c38 = arith.constant 38 : index
    %c0_267 = arith.constant 0 : index
    %c0_268 = arith.constant 0 : index
    %331 = vector.load %arg4[%c38, %c0_267, %c0_268] : memref<49x32x16xbf16, #tpu.memory_space<vmem>>, vector<1x32x16xbf16>
    %332 = vector.shape_cast %331 : vector<1x32x16xbf16> to vector<32x16xbf16>
    %c0_269 = arith.constant 0 : index
    %c176 = arith.constant 176 : index
    %333 = vector.load %arg8[%c0_269, %c176] : memref<16x640xbf16, #tpu.memory_space<vmem>>, vector<16x384xbf16>
    %cst_270 = arith.constant dense<0.000000e+00> : vector<32x384xf32>
    %334 = tpu.matmul %332, %333, %cst_270 {dimension_numbers = #tpu.dot_dimension_numbers<[1], [0], [0], [1], [0, 0, 1, 1], [], []>} : vector<32x16xbf16>, vector<16x384xbf16>, vector<32x384xf32> -> vector<32x384xf32>
    %335 = arith.addf %330, %334 : vector<32x384xf32>
    %c39 = arith.constant 39 : index
    %c0_271 = arith.constant 0 : index
    %c0_272 = arith.constant 0 : index
    %336 = vector.load %arg4[%c39, %c0_271, %c0_272] : memref<49x32x16xbf16, #tpu.memory_space<vmem>>, vector<1x32x16xbf16>
    %337 = vector.shape_cast %336 : vector<1x32x16xbf16> to vector<32x16xbf16>
    %c0_273 = arith.constant 0 : index
    %c177 = arith.constant 177 : index
    %338 = vector.load %arg8[%c0_273, %c177] : memref<16x640xbf16, #tpu.memory_space<vmem>>, vector<16x384xbf16>
    %cst_274 = arith.constant dense<0.000000e+00> : vector<32x384xf32>
    %339 = tpu.matmul %337, %338, %cst_274 {dimension_numbers = #tpu.dot_dimension_numbers<[1], [0], [0], [1], [0, 0, 1, 1], [], []>} : vector<32x16xbf16>, vector<16x384xbf16>, vector<32x384xf32> -> vector<32x384xf32>
    %340 = arith.addf %335, %339 : vector<32x384xf32>
    %c40 = arith.constant 40 : index
    %c0_275 = arith.constant 0 : index
    %c0_276 = arith.constant 0 : index
    %341 = vector.load %arg4[%c40, %c0_275, %c0_276] : memref<49x32x16xbf16, #tpu.memory_space<vmem>>, vector<1x32x16xbf16>
    %342 = vector.shape_cast %341 : vector<1x32x16xbf16> to vector<32x16xbf16>
    %c0_277 = arith.constant 0 : index
    %c178 = arith.constant 178 : index
    %343 = vector.load %arg8[%c0_277, %c178] : memref<16x640xbf16, #tpu.memory_space<vmem>>, vector<16x384xbf16>
    %cst_278 = arith.constant dense<0.000000e+00> : vector<32x384xf32>
    %344 = tpu.matmul %342, %343, %cst_278 {dimension_numbers = #tpu.dot_dimension_numbers<[1], [0], [0], [1], [0, 0, 1, 1], [], []>} : vector<32x16xbf16>, vector<16x384xbf16>, vector<32x384xf32> -> vector<32x384xf32>
    %345 = arith.addf %340, %344 : vector<32x384xf32>
    %c41 = arith.constant 41 : index
    %c0_279 = arith.constant 0 : index
    %c0_280 = arith.constant 0 : index
    %346 = vector.load %arg4[%c41, %c0_279, %c0_280] : memref<49x32x16xbf16, #tpu.memory_space<vmem>>, vector<1x32x16xbf16>
    %347 = vector.shape_cast %346 : vector<1x32x16xbf16> to vector<32x16xbf16>
    %c0_281 = arith.constant 0 : index
    %c179 = arith.constant 179 : index
    %348 = vector.load %arg8[%c0_281, %c179] : memref<16x640xbf16, #tpu.memory_space<vmem>>, vector<16x384xbf16>
    %cst_282 = arith.constant dense<0.000000e+00> : vector<32x384xf32>
    %349 = tpu.matmul %347, %348, %cst_282 {dimension_numbers = #tpu.dot_dimension_numbers<[1], [0], [0], [1], [0, 0, 1, 1], [], []>} : vector<32x16xbf16>, vector<16x384xbf16>, vector<32x384xf32> -> vector<32x384xf32>
    %350 = arith.addf %345, %349 : vector<32x384xf32>
    %c42 = arith.constant 42 : index
    %c0_283 = arith.constant 0 : index
    %c0_284 = arith.constant 0 : index
    %351 = vector.load %arg4[%c42, %c0_283, %c0_284] : memref<49x32x16xbf16, #tpu.memory_space<vmem>>, vector<1x32x16xbf16>
    %352 = vector.shape_cast %351 : vector<1x32x16xbf16> to vector<32x16xbf16>
    %c0_285 = arith.constant 0 : index
    %c197 = arith.constant 197 : index
    %353 = vector.load %arg8[%c0_285, %c197] : memref<16x640xbf16, #tpu.memory_space<vmem>>, vector<16x384xbf16>
    %cst_286 = arith.constant dense<0.000000e+00> : vector<32x384xf32>
    %354 = tpu.matmul %352, %353, %cst_286 {dimension_numbers = #tpu.dot_dimension_numbers<[1], [0], [0], [1], [0, 0, 1, 1], [], []>} : vector<32x16xbf16>, vector<16x384xbf16>, vector<32x384xf32> -> vector<32x384xf32>
    %355 = arith.addf %350, %354 : vector<32x384xf32>
    %c43 = arith.constant 43 : index
    %c0_287 = arith.constant 0 : index
    %c0_288 = arith.constant 0 : index
    %356 = vector.load %arg4[%c43, %c0_287, %c0_288] : memref<49x32x16xbf16, #tpu.memory_space<vmem>>, vector<1x32x16xbf16>
    %357 = vector.shape_cast %356 : vector<1x32x16xbf16> to vector<32x16xbf16>
    %c0_289 = arith.constant 0 : index
    %c198 = arith.constant 198 : index
    %358 = vector.load %arg8[%c0_289, %c198] : memref<16x640xbf16, #tpu.memory_space<vmem>>, vector<16x384xbf16>
    %cst_290 = arith.constant dense<0.000000e+00> : vector<32x384xf32>
    %359 = tpu.matmul %357, %358, %cst_290 {dimension_numbers = #tpu.dot_dimension_numbers<[1], [0], [0], [1], [0, 0, 1, 1], [], []>} : vector<32x16xbf16>, vector<16x384xbf16>, vector<32x384xf32> -> vector<32x384xf32>
    %360 = arith.addf %355, %359 : vector<32x384xf32>
    %c44 = arith.constant 44 : index
    %c0_291 = arith.constant 0 : index
    %c0_292 = arith.constant 0 : index
    %361 = vector.load %arg4[%c44, %c0_291, %c0_292] : memref<49x32x16xbf16, #tpu.memory_space<vmem>>, vector<1x32x16xbf16>
    %362 = vector.shape_cast %361 : vector<1x32x16xbf16> to vector<32x16xbf16>
    %c0_293 = arith.constant 0 : index
    %c199 = arith.constant 199 : index
    %363 = vector.load %arg8[%c0_293, %c199] : memref<16x640xbf16, #tpu.memory_space<vmem>>, vector<16x384xbf16>
    %cst_294 = arith.constant dense<0.000000e+00> : vector<32x384xf32>
    %364 = tpu.matmul %362, %363, %cst_294 {dimension_numbers = #tpu.dot_dimension_numbers<[1], [0], [0], [1], [0, 0, 1, 1], [], []>} : vector<32x16xbf16>, vector<16x384xbf16>, vector<32x384xf32> -> vector<32x384xf32>
    %365 = arith.addf %360, %364 : vector<32x384xf32>
    %c45 = arith.constant 45 : index
    %c0_295 = arith.constant 0 : index
    %c0_296 = arith.constant 0 : index
    %366 = vector.load %arg4[%c45, %c0_295, %c0_296] : memref<49x32x16xbf16, #tpu.memory_space<vmem>>, vector<1x32x16xbf16>
    %367 = vector.shape_cast %366 : vector<1x32x16xbf16> to vector<32x16xbf16>
    %c0_297 = arith.constant 0 : index
    %c200 = arith.constant 200 : index
    %368 = vector.load %arg8[%c0_297, %c200] : memref<16x640xbf16, #tpu.memory_space<vmem>>, vector<16x384xbf16>
    %cst_298 = arith.constant dense<0.000000e+00> : vector<32x384xf32>
    %369 = tpu.matmul %367, %368, %cst_298 {dimension_numbers = #tpu.dot_dimension_numbers<[1], [0], [0], [1], [0, 0, 1, 1], [], []>} : vector<32x16xbf16>, vector<16x384xbf16>, vector<32x384xf32> -> vector<32x384xf32>
    %370 = arith.addf %365, %369 : vector<32x384xf32>
    %c46 = arith.constant 46 : index
    %c0_299 = arith.constant 0 : index
    %c0_300 = arith.constant 0 : index
    %371 = vector.load %arg4[%c46, %c0_299, %c0_300] : memref<49x32x16xbf16, #tpu.memory_space<vmem>>, vector<1x32x16xbf16>
    %372 = vector.shape_cast %371 : vector<1x32x16xbf16> to vector<32x16xbf16>
    %c0_301 = arith.constant 0 : index
    %c201 = arith.constant 201 : index
    %373 = vector.load %arg8[%c0_301, %c201] : memref<16x640xbf16, #tpu.memory_space<vmem>>, vector<16x384xbf16>
    %cst_302 = arith.constant dense<0.000000e+00> : vector<32x384xf32>
    %374 = tpu.matmul %372, %373, %cst_302 {dimension_numbers = #tpu.dot_dimension_numbers<[1], [0], [0], [1], [0, 0, 1, 1], [], []>} : vector<32x16xbf16>, vector<16x384xbf16>, vector<32x384xf32> -> vector<32x384xf32>
    %375 = arith.addf %370, %374 : vector<32x384xf32>
    %c47 = arith.constant 47 : index
    %c0_303 = arith.constant 0 : index
    %c0_304 = arith.constant 0 : index
    %376 = vector.load %arg4[%c47, %c0_303, %c0_304] : memref<49x32x16xbf16, #tpu.memory_space<vmem>>, vector<1x32x16xbf16>
    %377 = vector.shape_cast %376 : vector<1x32x16xbf16> to vector<32x16xbf16>
    %c0_305 = arith.constant 0 : index
    %c202 = arith.constant 202 : index
    %378 = vector.load %arg8[%c0_305, %c202] : memref<16x640xbf16, #tpu.memory_space<vmem>>, vector<16x384xbf16>
    %cst_306 = arith.constant dense<0.000000e+00> : vector<32x384xf32>
    %379 = tpu.matmul %377, %378, %cst_306 {dimension_numbers = #tpu.dot_dimension_numbers<[1], [0], [0], [1], [0, 0, 1, 1], [], []>} : vector<32x16xbf16>, vector<16x384xbf16>, vector<32x384xf32> -> vector<32x384xf32>
    %380 = arith.addf %375, %379 : vector<32x384xf32>
    %c48 = arith.constant 48 : index
    %c0_307 = arith.constant 0 : index
    %c0_308 = arith.constant 0 : index
    %381 = vector.load %arg4[%c48, %c0_307, %c0_308] : memref<49x32x16xbf16, #tpu.memory_space<vmem>>, vector<1x32x16xbf16>
    %382 = vector.shape_cast %381 : vector<1x32x16xbf16> to vector<32x16xbf16>
    %c0_309 = arith.constant 0 : index
    %c203 = arith.constant 203 : index
    %383 = vector.load %arg8[%c0_309, %c203] : memref<16x640xbf16, #tpu.memory_space<vmem>>, vector<16x384xbf16>
    %cst_310 = arith.constant dense<0.000000e+00> : vector<32x384xf32>
    %384 = tpu.matmul %382, %383, %cst_310 {dimension_numbers = #tpu.dot_dimension_numbers<[1], [0], [0], [1], [0, 0, 1, 1], [], []>} : vector<32x16xbf16>, vector<16x384xbf16>, vector<32x384xf32> -> vector<32x384xf32>
    %385 = arith.addf %380, %384 : vector<32x384xf32>
    %c0_311 = arith.constant 0 : index
    %c0_312 = arith.constant 0 : index
    %386 = vector.load %arg5[%c0_311, %c0_312] : memref<32x1xf32, #tpu.memory_space<vmem>>, vector<32x1xf32>
    %387 = vector.broadcast %386 : vector<32x1xf32> to vector<32x384xf32>
    %388 = arith.addf %385, %387 : vector<32x384xf32>
    %c0_313 = arith.constant 0 : index
    %c0_314 = arith.constant 0 : index
    %c0_315 = arith.constant 0 : index
    %389 = vector.load %arg7[%c0_313, %c0_314, %c0_315] : memref<1x32x384xf32, #tpu.memory_space<vmem>>, vector<1x32x384xf32>
    %390 = vector.shape_cast %389 : vector<1x32x384xf32> to vector<32x384xf32>
    %391 = vector.shape_cast %388 : vector<32x384xf32> to vector<1x32x384xf32>
    tpu.vector_store %arg7[%c0_313, %c0_314, %c0_315], %391 {strides = array<i32>} : memref<1x32x384xf32, #tpu.memory_space<vmem>>, vector<1x32x384xf32>,
    return
  }
  func.func @transform_0(%arg0: i32) -> (i32, i32, i32) {
    %c0_i32 = arith.constant 0 : i32
    %c0_i32_0 = arith.constant 0 : i32
    %c0_i32_1 = arith.constant 0 : i32
    return %arg0, %c0_i32, %c0_i32_0 : i32, i32, i32
  }
  func.func @transform_1(%arg0: i32) -> (i32, i32, i32) {
    %c0_i32 = arith.constant 0 : i32
    %c0_i32_0 = arith.constant 0 : i32
    %c0_i32_1 = arith.constant 0 : i32
    %c0_i32_2 = arith.constant 0 : i32
    return %c0_i32, %c0_i32_0, %c0_i32_1 : i32, i32, i32
  }
  func.func @transform_2(%arg0: i32) -> (i32, i32) {
    %c0_i32 = arith.constant 0 : i32
    %c0_i32_0 = arith.constant 0 : i32
    %c0_i32_1 = arith.constant 0 : i32
    return %c0_i32, %c0_i32_0 : i32, i32
  }
  func.func @transform_3(%arg0: i32) -> (i32, i32, i32) {
    %c0_i32 = arith.constant 0 : i32
    %c0_i32_0 = arith.constant 0 : i32
    %c0_i32_1 = arith.constant 0 : i32
    %c0_i32_2 = arith.constant 0 : i32
    return %c0_i32, %c0_i32_0, %c0_i32_1 : i32, i32, i32
  }
  func.func @transform_4(%arg0: i32) -> (i32, i32) {
    %c0_i32 = arith.constant 0 : i32
    %c0_i32_0 = arith.constant 0 : i32
    %c0_i32_1 = arith.constant 0 : i32
    return %c0_i32, %c0_i32_0 : i32, i32
  }
  func.func @transform_5(%arg0: i32) -> (i32, i32) {
    %c0_i32 = arith.constant 0 : i32
    %c0_i32_0 = arith.constant 0 : i32
    %c0_i32_1 = arith.constant 0 : i32
    return %c0_i32, %c0_i32_0 : i32, i32
  }
  func.func @transform_6(%arg0: i32) -> (i32, i32, i32) {
    %c0_i32 = arith.constant 0 : i32
    %c0_i32_0 = arith.constant 0 : i32
    %c0_i32_1 = arith.constant 0 : i32
    return %arg0, %c0_i32, %c0_i32_0 : i32, i32, i32
  }
}

</mosaic_0001>

<bundles_post_ra>
// kernel: encoder_forward_pallas.1
= control target key start
LH: loop header
LB: loop body
LE: loop exit
PB: predicated region body
PF: predicated region fallthrough
CT: control target
= control target key end

     0   :  { %s13028_s21 = smov 0   ;;  %s15866_s0 = inlined_call_operand.vmem [shape: bf16[2,4,512], index: 0, kind: input, shape index: {}]   ;;  %s15867_s1 = inlined_call_operand.vmem [shape: bf16[25,16,4], index: 1, kind: input, shape index: {}]   ;;  %s15868_s2 = inlined_call_operand.vmem [shape: f32[16,1], index: 2, kind: input, shape index: {}]   ;;  %s15869_s3 = inlined_call_operand.vmem [shape: bf16[49,32,16], index: 3, kind: input, shape index: {}]   ;;  %s15870_s4 = inlined_call_operand.vmem [shape: f32[32,1], index: 4, kind: input, shape index: {}]   ;;  %s15871_s5 = inlined_call_operand.vmem [shape: f32[1,384], index: 5, kind: input, shape index: {}]   ;;  %s15872_s6 = inlined_call_operand.vmem [shape: f32[2,32,384], index: 6, kind: output, shape index: {}]  }
   0x1 LB: > { %s10763_s22 = sadd.s32 4294967295, %s12930_s21   ;;  %p10767_p0 = scmp.ge.s32.totalorder %s12930_s21, 1  ;;  %s12930_s21 = sphi %s13028_s21, %s16_s21  }
   0x2   : > { %p212_p1 = scmp.lt.s32.totalorder %s12930_s21, 3 }
   0x4   : > { %p213_p2 = pnand %p10767_p0, %p212_p1 }
   0x6   : > { %216 = sbr.rel (%p213_p2) target bundleno = 1719 (0x6b7), region = 44 }
   0xd   : > { %p242_p3 = scmp.lt.s32.totalorder %s10763_s22, 1  ;;  %v269_v0 = vlaneseq  ;;  %v12932_v1 = vmov 1983009808   ;;  %v15901_v5 = vmov 0   ;;  %s12934_s27 = smov 127   ;;  %v12941_v12 = vmov 0.0  }
   0xe   : > { %v267_v2 = vunpack.c.l.s4 %v12932_v1  ;;  %340 = vmatprep.mubr.bf16.mxu0 %v15901_v5  ;;  %12791 = vset.pattern.permute.xlu0 %v15901_v5  ;;  %s12935_s28 = smov 126   ;;  %s12936_s29 = smov 125   ;;  %vm12943_vm0 = vmmov 0   ;;  %vm290_vm1 = vcmask 1039360   ;;  %vm298_vm2 = vcmask 1041408   ;;  %v13193_v21 = vld [vmem:[%s15867_s1 + $0x8] sm:$0xff]  }
   0xf   : > { %s16066_s22 = smov (!%p242_p3, %s10763_s22), 1  ;;  %v13038_v3 = vshrl.u32 %v269_v0, 7  ;;  %12792 = vset.pattern.permute.xlu1 %v15901_v5  ;;  %s12937_s30 = smov 124   ;;  %11605 = vmatprep.subr.bf16.mxu1 %v12941_v12  ;;  %vm294_vm3 = vcmask 31744   ;;  %vm509_vm4 = vcmask 1031168   ;;  %vm631_vm5 = vcmask 1022976  }
  0x10   : > { %v268_v4 = vunpack.c.0.s8 %v267_v2  ;;  %s11407_s23 = sshll.u32 %s16066_s22, 3  ;;  %s12938_s7 = smov 104   ;;  %11607 = vmatprep.mubr.msk.bf16.mxu1 %vm12943_vm0, %v12941_v12  ;;  %v13225_v31 = vld [vmem:[%s15867_s1] sm:$0xff]   ;;  %vm753_vm6 = vcmask 1014784   ;;  %v13256_v41 = vld [vmem:[%s15867_s1 + $0x10] sm:$0xff]   ;;  %vm875_vm7 = vcmask 850944  }
  0x11   : > { %s246_s26 = scalar_lea.vmem %s15866_s0, %s11407_s23  ;;  %s12939_s8 = smov 103   ;;  %v13293_v51 = vld [vmem:[%s15867_s1 + $0x18] sm:$0xff]   ;;  %vm997_vm8 = vcmask 842752   ;;  %v13328_v61 = vld [vmem:[%s15867_s1 + $0x20] sm:$0xff]   ;;  %vm1119_vm9 = vcmask 834560   ;;  %vm1241_vm10 = vcmask 826368  }
  0x12   : > { %v271_v6 = vsub.s32 %v268_v4, %v13038_v3  ;;  %v253_v7 = vld [vmem:[%s246_s26] sm:$0xff]  ;;  %s12940_s9 = smov 102   ;;  %s12942_s10 = smov 101   ;;  %vm1363_vm11 = vcmask 818176   ;;  %vm15898_vm12 = vcmask 654336   ;;  %vm15879_vm13 = vcmask 646144  }
  0x13   : > { %v265_v9 = vcombine.high %v253_v7, %v253_v7  ;;  %s12944_s11 = smov 100   ;;  %s12945_s12 = smov 80   ;;  %vm15877_vm14 = vcmask 637952   ;;  %vm15874_vm15 = vcmask 629760  }
  0x14   : > { %v13048_v8 = vrot.slane %v253_v7, %v271_v6  ;;  %s15892_s13 = smov 79   ;;  %s15890_s14 = smov 78  }
  0x15   : > { %v13052_v10 = vrot.slane %v265_v9, %v271_v6  ;;  %s15888_s15 = smov 77   ;;  %s12949_s16 = smov 76  }
  0x16   : > { %282 = vrot.lane.b32.xlu0 %v13048_v8, %s12934_s27  ;;  %v13056_v11 = vcombine.high %v13048_v8, %v13048_v8  ;;  %s15886_s17 = smov 56   ;;  %s15884_s18 = smov 55   ;;  %v401_v23 = vsel %vm298_vm2, %v13048_v8, 0 }
  0x17   : > { %286 = vrot.lane.b32.xlu1 %v13052_v10, %s12934_s27  ;;  %v13113_v13 = vcombine.high %v13052_v10, %v13052_v10  ;;  %s15882_s19 = smov 54   ;;  %s15880_s24 = smov 53   ;;  %v407_v6 = vsel %vm298_vm2, %v13052_v10, 0 }
  0x18   : > { %s12955_s20 = smov 32   ;;  %s12956_s23 = smov 31  }
  0x19   : > { %s12960_s25 = smov 74   ;;  %s12963_s26 = smov 72  }
  0x1a   : > { %284 = vrot.lane.b32.xlu0 %v13056_v11, %s12934_s27 }
  0x1b   : > { %501 = vrot.lane.b32.xlu1 %v13048_v8, %s12935_s28 }
  0x1e   : > { %503 = vrot.lane.b32.xlu0 %v13056_v11, %s12935_s28 }
  0x1f   : > { %505 = vrot.lane.b32.xlu1 %v13052_v10, %s12935_s28 }
  0x22   : > { %623 = vrot.lane.b32.xlu0 %v13048_v8, %s12936_s29 }
  0x23   : > { %625 = vrot.lane.b32.xlu1 %v13056_v11, %s12936_s29 }
  0x26   : > { %627 = vrot.lane.b32.xlu0 %v13052_v10, %s12936_s29 }
  0x27   : > { %745 = vrot.lane.b32.xlu1 %v13048_v8, %s12937_s30 }
  0x2a   : > { %747 = vrot.lane.b32.xlu0 %v13056_v11, %s12937_s30 }
  0x2b   : > { %749 = vrot.lane.b32.xlu1 %v13052_v10, %s12937_s30 }
  0x2e   : > { %867 = vrot.lane.b32.xlu0 %v13048_v8, %s12938_s7 }
  0x2f   : > { %869 = vrot.lane.b32.xlu1 %v13056_v11, %s12938_s7 }
  0x32   : > { %871 = vrot.lane.b32.xlu0 %v13052_v10, %s12938_s7 }
  0x33   : > { %989 = vrot.lane.b32.xlu1 %v13048_v8, %s12939_s8 }
  0x36   : > { %991 = vrot.lane.b32.xlu0 %v13056_v11, %s12939_s8 }
  0x37   : > { %993 = vrot.lane.b32.xlu1 %v13052_v10, %s12939_s8 }
  0x3a   : > { %1111 = vrot.lane.b32.xlu0 %v13048_v8, %s12940_s9 }
  0x3b   : > { %1113 = vrot.lane.b32.xlu1 %v13056_v11, %s12940_s9 }
  0x3e   : > { %1115 = vrot.lane.b32.xlu0 %v13052_v10, %s12940_s9 }
  0x3f   : > { %1233 = vrot.lane.b32.xlu1 %v13048_v8, %s12942_s10 }
  0x42   : > { %1235 = vrot.lane.b32.xlu0 %v13056_v11, %s12942_s10 }
  0x43   : > { %1237 = vrot.lane.b32.xlu1 %v13052_v10, %s12942_s10 }
  0x46   : > { %1355 = vrot.lane.b32.xlu0 %v13048_v8, %s12944_s11 }
  0x47   : > { %1357 = vrot.lane.b32.xlu1 %v13056_v11, %s12944_s11 }
  0x4a   : > { %1359 = vrot.lane.b32.xlu0 %v13052_v10, %s12944_s11 }
  0x4b   : > { %288 = vrot.lane.b32.xlu1 %v13113_v13, %s12934_s27 }
  0x4e   : > { %1477 = vrot.lane.b32.xlu0 %v13048_v8, %s12945_s12 }
  0x4f   : > { %1479 = vrot.lane.b32.xlu1 %v13056_v11, %s12945_s12 }
  0x52   : > { %1481 = vrot.lane.b32.xlu0 %v13052_v10, %s12945_s12 }
  0x53   : > { %507 = vrot.lane.b32.xlu1 %v13113_v13, %s12935_s28 }
  0x56   : > { %1599 = vrot.lane.b32.xlu0 %v13048_v8, %s15892_s13 }
  0x57   : > { %1601 = vrot.lane.b32.xlu1 %v13056_v11, %s15892_s13 }
  0x5a   : > { %1603 = vrot.lane.b32.xlu0 %v13052_v10, %s15892_s13 }
  0x5b   : > { %629 = vrot.lane.b32.xlu1 %v13113_v13, %s12936_s29 }
  0x5e   : > { %751 = vrot.lane.b32.xlu0 %v13113_v13, %s12937_s30  ;;  %s12954_s30 = smov 52  }
  0x5f   : > { %1721 = vrot.lane.b32.xlu1 %v13048_v8, %s15890_s14 }
  0x62   : > { %1723 = vrot.lane.b32.xlu0 %v13056_v11, %s15890_s14 }
  0x63   : > { %1725 = vrot.lane.b32.xlu1 %v13052_v10, %s15890_s14 }
  0x66   : > { %873 = vrot.lane.b32.xlu0 %v13113_v13, %s12938_s7 }
  0x67   : > { %1843 = vrot.lane.b32.xlu1 %v13048_v8, %s15888_s15 }
  0x6a   : > { %1845 = vrot.lane.b32.xlu0 %v13056_v11, %s15888_s15 }
  0x6b   : > { %1847 = vrot.lane.b32.xlu1 %v13052_v10, %s15888_s15 }
  0x6e   : > { %995 = vrot.lane.b32.xlu0 %v13113_v13, %s12939_s8 }
  0x6f   : > { %1117 = vrot.lane.b32.xlu1 %v13113_v13, %s12940_s9 }
  0x72   : > { %1965 = vrot.lane.b32.xlu0 %v13048_v8, %s12949_s16 }
  0x73   : > { %1967 = vrot.lane.b32.xlu1 %v13056_v11, %s12949_s16 }
  0x76   : > { %1969 = vrot.lane.b32.xlu0 %v13052_v10, %s12949_s16 }
  0x77   : > { %1239 = vrot.lane.b32.xlu1 %v13113_v13, %s12942_s10 }
  0x7a   : > { %2087 = vrot.lane.b32.xlu0 %v13048_v8, %s15886_s17 }
  0x7b   : > { %2089 = vrot.lane.b32.xlu1 %v13056_v11, %s15886_s17 }
  0x7e   : > { %2091 = vrot.lane.b32.xlu0 %v13052_v10, %s15886_s17 }
  0x7f   : > { %1361 = vrot.lane.b32.xlu1 %v13113_v13, %s12944_s11  ;;  %s12957_s11 = smov 30  }
  0x82   : > { %1483 = vrot.lane.b32.xlu0 %v13113_v13, %s12945_s12 }
  0x83   : > { %2209 = vrot.lane.b32.xlu1 %v13048_v8, %s15884_s18 }
  0x86   : > { %2211 = vrot.lane.b32.xlu0 %v13056_v11, %s15884_s18 }
  0x87   : > { %2213 = vrot.lane.b32.xlu1 %v13052_v10, %s15884_s18 }
  0x88   : > { %v283_v14 = vpop.permute.xlu0 %282 }
  0x89   : > { %v13179_v15 = vpop.permute.xlu1 %286 }
  0x8a   : > { %1605 = vrot.lane.b32.xlu0 %v13113_v13, %s15892_s13 }
  0x8b   : > { %2331 = vrot.lane.b32.xlu1 %v13048_v8, %s15882_s19 }
  0x8c   : > { %v285_v16 = vpop.permute.xlu0 %284 }
  0x8d   : > { %v292_v17 = vsel %vm290_vm1, %v285_v16, %v13179_v15  ;;  %v291_v18 = vsel %vm290_vm1, %v283_v14, %v285_v16  ;;  %v502_v19 = vpop.permute.xlu1 %501 }
  0x8e   : > { %10774 = vmatprep.subr.msk.bf16.mxu0 %vm298_vm2, %v292_v17  ;;  %v300_v20 = vsel %vm298_vm2, %v291_v18, 0  ;;  %2333 = vrot.lane.b32.xlu0 %v13056_v11, %s15882_s19  ;;  %v13375_v18 = vld [vmem:[%s15867_s1 + $0x28] sm:$0xff]  }
  0x8f   : > { %309 = vmatpush1.bf16.msra.mxu0 %v300_v20  ;;  %2335 = vrot.lane.b32.xlu1 %v13052_v10, %s15882_s19 }
  0x90   : > { %v504_v22 = vpop.permute.xlu0 %503  ;;  %10778 = vmatprep.subr.msk.bf16.mxu0 %vm298_vm2, %v13056_v11 }
  0x91   : > { %v13205_v24 = vpop.permute.xlu1 %505  ;;  %v510_v29 = vsel %vm509_vm4, %v502_v19, %v504_v22 }
  0x92   : > { %10775 = vmatmul.mubr.msk.bf16.vlgmr.msra.gmra.mrb[0].mxu0 %vm294_vm3, %v13193_v21  ;;  %1727 = vrot.lane.b32.xlu0 %v13113_v13, %s15890_s14  ;;  %v511_v25 = vsel %vm509_vm4, %v504_v22, %v13205_v24  ;;  %v517_v33 = vsel %vm298_vm2, %v510_v29, 0  ;;  %s12983_s14 = smov 1  }
  0x93   : > { %410 = vmatpush1.bf16.msra.mxu0 %v401_v23  ;;  %441 = vmatprep.mubr.bf16.mxu0 %v15901_v5 }
  0x94   : > { %v624_v26 = vpop.permute.xlu0 %623  ;;  %10784 = vmatprep.subr.msk.bf16.mxu0 %vm298_vm2, %v511_v25  ;;  %1849 = vrot.lane.b32.xlu1 %v13113_v13, %s15888_s15  ;;  %s12981_s15 = smov 3  }
  0x95   : > { %v626_v27 = vpop.permute.xlu1 %625 }
  0x96   : > { %2453 = vrot.lane.b32.xlu0 %v13048_v8, %s15880_s24  ;;  %v632_v39 = vsel %vm631_vm5, %v624_v26, %v626_v27 }
  0x97   : > { %v639_v43 = vsel %vm298_vm2, %v632_v39, 0 }
  0x98   : > { %v13217_v28 = vpop.permute.xlu0 %627  ;;  %2455 = vrot.lane.b32.xlu1 %v13056_v11, %s15880_s24 }
  0x99   : > { %v746_v30 = vpop.permute.xlu1 %745  ;;  %v633_v34 = vsel %vm631_vm5, %v626_v27, %v13217_v28 }
  0x9a   : > { %2457 = vrot.lane.b32.xlu0 %v13052_v10, %s15880_s24 }
  0x9c   : > { %v748_v32 = vpop.permute.xlu0 %747  ;;  %1971 = vrot.lane.b32.xlu1 %v13113_v13, %s12949_s16  ;;  %s12966_s16 = smov 46  }
  0x9d   : > { %v13236_v35 = vpop.permute.xlu1 %749  ;;  %v754_v49 = vsel %vm753_vm6, %v746_v30, %v748_v32 }
  0x9e   : > { %10779 = vmatmul.mubr.msk.bf16.vlgmr.msra.gmra.mrb[0].mxu0 %vm294_vm3, %v13225_v31  ;;  %2575 = vrot.lane.b32.xlu0 %v13048_v8, %s12954_s30  ;;  %v755_v44 = vsel %vm753_vm6, %v748_v32, %v13236_v35  ;;  %v761_v53 = vsel %vm298_vm2, %v754_v49, 0 }
  0x9f   : > { %526 = vmatpush1.bf16.msra.mxu0 %v517_v33  ;;  %557 = vmatprep.mubr.bf16.mxu0 %v15901_v5 }
  0xa0   : > { %v868_v36 = vpop.permute.xlu0 %867  ;;  %10790 = vmatprep.subr.msk.bf16.mxu0 %vm298_vm2, %v633_v34  ;;  %2577 = vrot.lane.b32.xlu1 %v13056_v11, %s12954_s30 }
  0xa1   : > { %v870_v37 = vpop.permute.xlu1 %869 }
  0xa2   : > { %2579 = vrot.lane.b32.xlu0 %v13052_v10, %s12954_s30  ;;  %v876_v59 = vsel %vm875_vm7, %v868_v36, %v870_v37 }
  0xa3   : > { %v883_v1 = vsel %vm298_vm2, %v876_v59, 0 }
  0xa4   : > { %v13246_v38 = vpop.permute.xlu0 %871  ;;  %2093 = vrot.lane.b32.xlu1 %v13113_v13, %s15886_s17  ;;  %s12978_s17 = smov 22  }
  0xa5   : > { %v13251_v40 = vpop.permute.xlu1 %989  ;;  %v877_v54 = vsel %vm875_vm7, %v870_v37, %v13246_v38 }
  0xa6   : > { %2215 = vrot.lane.b32.xlu0 %v13113_v13, %s15884_s18  ;;  %s12979_s18 = smov 47  }
  0xa8   : > { %v13260_v42 = vpop.permute.xlu0 %991  ;;  %2697 = vrot.lane.b32.xlu1 %v13048_v8, %s12955_s20 }
  0xa9   : > { %v13269_v45 = vpop.permute.xlu1 %993 }
  0xaa   : > { %10785 = vmatmul.mubr.msk.bf16.vlgmr.msra.gmra.mrb[0].mxu0 %vm294_vm3, %v13256_v41  ;;  %2699 = vrot.lane.b32.xlu0 %v13056_v11, %s12955_s20  ;;  %v999_v2 = vsel %vm997_vm8, %v13260_v42, %v13269_v45 }
  0xab   : > { %648 = vmatpush1.bf16.msra.mxu0 %v639_v43  ;;  %679 = vmatprep.mubr.bf16.mxu0 %v15901_v5 }
  0xac   : > { %v13274_v46 = vpop.permute.xlu0 %1111  ;;  %10796 = vmatprep.subr.msk.bf16.mxu0 %vm298_vm2, %v755_v44  ;;  %2701 = vrot.lane.b32.xlu1 %v13052_v10, %s12955_s20 }
  0xad   : > { %v13279_v47 = vpop.permute.xlu1 %1113 }
  0xae   : > { %2337 = vrot.lane.b32.xlu0 %v13113_v13, %s15882_s19  ;;  %v1120_v30 = vsel %vm1119_vm9, %v13274_v46, %v13279_v47  ;;  %s12980_s19 = smov 21  }
  0xb0   : > { %v13283_v48 = vpop.permute.xlu0 %1115  ;;  %2819 = vrot.lane.b32.xlu1 %v13048_v8, %s12956_s23 }
  0xb1   : > { %v13288_v50 = vpop.permute.xlu1 %1233  ;;  %v1121_v22 = vsel %vm1119_vm9, %v13279_v47, %v13283_v48 }
  0xb2   : > { %2821 = vrot.lane.b32.xlu0 %v13056_v11, %s12956_s23 }
  0xb4   : > { %v13297_v52 = vpop.permute.xlu0 %1235  ;;  %2823 = vrot.lane.b32.xlu1 %v13052_v10, %s12956_s23 }
  0xb5   : > { %v13306_v55 = vpop.permute.xlu1 %1237  ;;  %v1242_v37 = vsel %vm1241_vm10, %v13288_v50, %v13297_v52 }
  0xb6   : > { %10791 = vmatmul.mubr.msk.bf16.vlgmr.msra.gmra.mrb[0].mxu0 %vm294_vm3, %v13293_v51  ;;  %2459 = vrot.lane.b32.xlu0 %v13113_v13, %s15880_s24  ;;  %v1243_v33 = vsel %vm1241_vm10, %v13297_v52, %v13306_v55  ;;  %v1249_v43 = vsel %vm298_vm2, %v1242_v37, 0  ;;  %s12975_s24 = smov 24  }
  0xb7   : > { %770 = vmatpush1.bf16.msra.mxu0 %v761_v53  ;;  %801 = vmatprep.mubr.bf16.mxu0 %v15901_v5 }
  0xb8   : > { %v13311_v56 = vpop.permute.xlu0 %1355  ;;  %10802 = vmatprep.subr.msk.bf16.mxu0 %vm298_vm2, %v877_v54  ;;  %2581 = vrot.lane.b32.xlu1 %v13113_v13, %s12954_s30  ;;  %s12958_s30 = smov 29  }
  0xb9   : > { %v13316_v57 = vpop.permute.xlu1 %1357 }
  0xba   : > { %2941 = vrot.lane.b32.xlu0 %v13048_v8, %s12957_s11  ;;  %v1364_v52 = vsel %vm1363_vm11, %v13311_v56, %v13316_v57 }
  0xbb   : > { %v1371_v54 = vsel %vm298_vm2, %v1364_v52, 0 }
  0xbc   : > { %v13320_v58 = vpop.permute.xlu0 %1359  ;;  %2943 = vrot.lane.b32.xlu1 %v13056_v11, %s12957_s11 }
  0xbd   : > { %v289_v60 = vpop.permute.xlu1 %288 }
  0xbe   : > { %2945 = vrot.lane.b32.xlu0 %v13052_v10, %s12957_s11  ;;  %v293_v62 = vsel %vm290_vm1, %v13179_v15, %v289_v60  ;;  %v998_v15 = vsel %vm997_vm8, %v13251_v40, %v13260_v42 }
  0xbf   : > { %v306_v0 = vsel %vm298_vm2, %v293_v62, 0 }
  0xc0   : > { %v13334_v63 = vpop.permute.xlu0 %1477  ;;  %2703 = vrot.lane.b32.xlu1 %v13113_v13, %s12955_s20  ;;  %11606 = vmatpush3.bf16.msra.mxu1 %v306_v0  ;;  %s12962_s20 = smov 73  }
  0xc1   : > { %v13345_v4 = vpop.permute.xlu1 %1479  ;;  %11611 = vmatprep.subr.bf16.mxu1 %v12941_v12 }
  0xc2   : > { %10797 = vmatmul.mubr.msk.bf16.vlgmr.msra.gmra.mrb[0].mxu0 %vm294_vm3, %v13328_v61  ;;  %3063 = vrot.lane.b32.xlu0 %v13048_v8, %s12958_s30  ;;  %v1486_v0 = vsel %vm15898_vm12, %v13334_v63, %v13345_v4 }
  0xc3   : > { %892 = vmatpush1.bf16.msra.mxu0 %v883_v1  ;;  %923 = vmatprep.mubr.bf16.mxu0 %v15901_v5 }
  0xc4   : > { %v13351_v7 = vpop.permute.xlu0 %1481  ;;  %11608 = vmatmul.mubr.msk.bf16.vlgmr.msra.gmra.mrb[0].mxu1 %vm294_vm3, %v13193_v21  ;;  %10808 = vmatprep.subr.msk.bf16.mxu0 %vm298_vm2, %v999_v2  ;;  %v1005_v21 = vsel %vm298_vm2, %v998_v15, 0  ;;  %v12803_v2 = vld [vmem:[%s15867_s1 + $0x48] sm:$0xff]  }
  0xc5   : > { %11612 = vmatpush3.bf16.msra.mxu1 %v407_v6  ;;  %11613 = vmatprep.mubr.msk.bf16.mxu1 %vm12943_vm0, %v12941_v12  ;;  %v508_v9 = vpop.permute.xlu1 %507 }
  0xc6   : > { %11617 = vmatprep.subr.bf16.mxu1 %v12941_v12  ;;  %3065 = vrot.lane.b32.xlu1 %v13056_v11, %s12958_s30  ;;  %v512_v16 = vsel %vm509_vm4, %v13205_v24, %v508_v9  ;;  %v1493_v9 = vsel %vm298_vm2, %v1486_v0, 0 }
  0xc7   : > { %3067 = vrot.lane.b32.xlu0 %v13052_v10, %s12958_s30  ;;  %v523_v19 = vsel %vm298_vm2, %v512_v16, 0 }
  0xc8   : > { %v13363_v14 = vpop.permute.xlu0 %1599 }
  0xc9   : > { %v13370_v17 = vpop.permute.xlu1 %1601 }
  0xca   : > { %2825 = vrot.lane.b32.xlu1 %v13113_v13, %s12956_s23  ;;  %s12959_s23 = smov 28  }
  0xcb   : > { %2947 = vrot.lane.b32.xlu0 %v13113_v13, %s12957_s11  ;;  %s12965_s11 = smov 70  }
  0xcc   : > { %v13382_v20 = vpop.permute.xlu0 %1603  ;;  %11614 = vmatmul.mubr.msk.bf16.vlgmr.msra.gmra.mrb[4].mxu1 %vm294_vm3, %v13225_v31  ;;  %v1127_v31 = vsel %vm298_vm2, %v1120_v30, 0 }
  0xcd   : > { %11618 = vmatpush3.bf16.msra.mxu1 %v523_v19  ;;  %11619 = vmatprep.mubr.msk.bf16.mxu1 %vm12943_vm0, %v12941_v12  ;;  %v630_v23 = vpop.permute.xlu1 %629 }
  0xce   : > { %10803 = vmatmul.mubr.msk.bf16.vlgmr.msra.gmra.mrb[0].mxu0 %vm294_vm3, %v13375_v18  ;;  %11623 = vmatprep.subr.bf16.mxu1 %v12941_v12  ;;  %v634_v25 = vsel %vm631_vm5, %v13217_v28, %v630_v23  ;;  %v12800_v28 = vld [vmem:[%s15867_s1 + $0x30] sm:$0xff]  }
  0xcf   : > { %1014 = vmatpush1.bf16.msra.mxu0 %v1005_v21  ;;  %1045 = vmatprep.mubr.bf16.mxu0 %v15901_v5  ;;  %v645_v27 = vsel %vm298_vm2, %v634_v25, 0  ;;  %v1608_v21 = vsel %vm15879_vm13, %v13363_v14, %v13370_v17 }
  0xd0   : > { %v752_v24 = vpop.permute.xlu0 %751  ;;  %10814 = vmatprep.subr.msk.bf16.mxu0 %vm298_vm2, %v1121_v22  ;;  %3185 = vrot.lane.b32.xlu1 %v13048_v8, %s12959_s23  ;;  %v12804_v22 = vld [vmem:[%s15867_s1 + $0x50] sm:$0xff]   ;;  %v1615_v23 = vsel %vm298_vm2, %v1608_v21, 0 }
  0xd1   : > { %v13402_v26 = vpop.permute.xlu1 %1721  ;;  %3187 = vrot.lane.b32.xlu0 %v13056_v11, %s12959_s23  ;;  %v756_v32 = vsel %vm753_vm6, %v13236_v35, %v752_v24  ;;  %vm1973_vm6 = vcmask 621568  }
  0xd4   : > { %v13405_v29 = vpop.permute.xlu0 %1723  ;;  %11620 = vmatmul.mubr.msk.bf16.vlgmr.msra.gmra.mrb[8].mxu1 %vm294_vm3, %v13256_v41  ;;  %3189 = vrot.lane.b32.xlu1 %v13052_v10, %s12959_s23  ;;  %v767_v10 = vsel %vm298_vm2, %v756_v32, 0  ;;  %v12801_v41 = vld [vmem:[%s15867_s1 + $0x38] sm:$0xff]  }
  0xd5   : > { %11624 = vmatpush3.bf16.msra.mxu1 %v645_v27  ;;  %11625 = vmatprep.mubr.msk.bf16.mxu1 %vm12943_vm0, %v12941_v12  ;;  %v13415_v8 = vpop.permute.xlu1 %1725  ;;  %v12805_v32 = vld [vmem:[%s15867_s1 + $0x58] sm:$0xff]  }
  0xd6   : > { %11629 = vmatprep.subr.bf16.mxu1 %v12941_v12  ;;  %3069 = vrot.lane.b32.xlu0 %v13113_v13, %s12958_s30  ;;  %v1731_v14 = vsel %vm15877_vm14, %v13405_v29, %v13415_v8  ;;  %s12961_s30 = smov 75  }
  0xd8   : > { %v874_v11 = vpop.permute.xlu0 %873  ;;  %3191 = vrot.lane.b32.xlu1 %v13113_v13, %s12959_s23  ;;  %s12964_s23 = smov 71  }
  0xd9   : > { %v13431_v34 = vpop.permute.xlu1 %1843  ;;  %v878_v39 = vsel %vm875_vm7, %v13246_v38, %v874_v11  ;;  %v1365_v38 = vsel %vm1363_vm11, %v13316_v57, %v13320_v58  ;;  %v1487_v57 = vsel %vm15898_vm12, %v13345_v4, %v13351_v7  ;;  %v1730_v11 = vsel %vm15877_vm14, %v13402_v26, %v13405_v29 }
  0xda   : > { %10809 = vmatmul.mubr.msk.bf16.vlgmr.msra.gmra.mrb[0].mxu0 %vm294_vm3, %v12800_v28  ;;  %v889_v42 = vsel %vm298_vm2, %v878_v39, 0 }
  0xdb   : > { %1136 = vmatpush1.bf16.msra.mxu0 %v1127_v31  ;;  %1167 = vmatprep.mubr.bf16.mxu0 %v15901_v5 }
  0xdc   : > { %v13436_v36 = vpop.permute.xlu0 %1845  ;;  %11626 = vmatmul.mubr.msk.bf16.vlgmr.msra.gmra.mrb[12].mxu1 %vm294_vm3, %v13293_v51  ;;  %10820 = vmatprep.subr.msk.bf16.mxu0 %vm298_vm2, %v1243_v33  ;;  %v1737_v33 = vsel %vm298_vm2, %v1730_v11, 0 }
  0xdd   : > { %11630 = vmatpush3.bf16.msra.mxu1 %v767_v10  ;;  %11631 = vmatprep.mubr.msk.bf16.mxu1 %vm12943_vm0, %v12941_v12  ;;  %v13443_v35 = vpop.permute.xlu1 %1847 }
  0xde   : > { %11635 = vmatprep.subr.bf16.mxu1 %v12941_v12 }
  0xe0   : > { %v996_v13 = vpop.permute.xlu0 %995 }
  0xe1   : > { %v1118_v40 = vpop.permute.xlu1 %1117  ;;  %v1000_v47 = vsel %vm997_vm8, %v13269_v45, %v996_v13  ;;  %v12802_v45 = vld [vmem:[%s15867_s1 + $0x40] sm:$0xff]  }
  0xe2   : > { %v1011_v51 = vsel %vm298_vm2, %v1000_v47, 0  ;;  %v1122_v56 = vsel %vm1119_vm9, %v13283_v48, %v1118_v40  ;;  %v1852_v40 = vsel %vm15874_vm15, %v13431_v34, %v13436_v36 }
  0xe3   : > { %v1133_v60 = vsel %vm298_vm2, %v1122_v56, 0 }
  0xe4   : > { %11632 = vmatmul.mubr.msk.bf16.vlgmr.msra.gmra.mrb[16].mxu1 %vm294_vm3, %v13328_v61  ;;  %v13458_v44 = vpop.permute.xlu0 %1965 }
  0xe5   : > { %11636 = vmatpush3.bf16.msra.mxu1 %v889_v42  ;;  %11637 = vmatprep.mubr.msk.bf16.mxu1 %vm12943_vm0, %v12941_v12  ;;  %v13466_v46 = vpop.permute.xlu1 %1967  ;;  %v1859_v42 = vsel %vm298_vm2, %v1852_v40, 0  ;;  %v3300_v40 = vld [vmem:[%s15868_s2 + $0x8] sm:$0xff] }
  0xe6   : > { %10815 = vmatmul.mubr.msk.bf16.vlgmr.msra.gmra.mrb[0].mxu0 %vm294_vm3, %v12801_v41  ;;  %11641 = vmatprep.subr.bf16.mxu1 %v12941_v12  ;;  %v1974_v52 = vsel %vm1973_vm6, %v13458_v44, %v13466_v46 }
  0xe7   : > { %1258 = vmatpush1.bf16.msra.mxu0 %v1249_v43  ;;  %1289 = vmatprep.mubr.bf16.mxu0 %v15901_v5 }
  0xe8   : > { %10826 = vmatprep.subr.msk.bf16.mxu0 %vm298_vm2, %v1365_v38  ;;  %v13473_v50 = vpop.permute.xlu0 %1969  ;;  %3308 = vperm.xlu1 %12792, %v3300_v40  }
  0xe9   : > { %v1240_v49 = vpop.permute.xlu1 %1239  ;;  %v1975_v34 = vsel %vm1973_vm6, %v13466_v46, %v13473_v50  ;;  %v12808_v46 = vld [vmem:[%s15867_s1 + $0x70] sm:$0xff]  }
  0xea   : > { %v1244_v1 = vsel %vm1241_vm10, %v13306_v55, %v1240_v49  ;;  %v1609_v55 = vsel %vm15879_vm13, %v13370_v17, %v13382_v20  ;;  %v12807_v49 = vld [vmem:[%s15867_s1 + $0x68] sm:$0xff]  }
  0xeb   : > { %v1255_v6 = vsel %vm298_vm2, %v1244_v1, 0 }
  0xec   : > { %11638 = vmatmul.mubr.msk.bf16.vlgmr.msra.gmra.mrb[20].mxu1 %vm294_vm3, %v13375_v18  ;;  %v13490_v59 = vpop.permute.xlu0 %2087 }
  0xed   : > { %11642 = vmatpush3.bf16.msra.mxu1 %v1011_v51  ;;  %11643 = vmatprep.mubr.msk.bf16.mxu1 %vm12943_vm0, %v12941_v12  ;;  %v13483_v53 = vpop.permute.xlu1 %2089 }
  0xee   : > { %11647 = vmatprep.subr.bf16.mxu1 %v12941_v12 }
  0xf0   : > { %v13505_v48 = vpop.permute.xlu0 %2091 }
  0xf1   : > { %v1362_v61 = vpop.permute.xlu1 %1361 }
  0xf2   : > { %10821 = vmatmul.mubr.msk.bf16.vlgmr.msra.gmra.mrb[0].mxu0 %vm294_vm3, %v12802_v45  ;;  %v1366_v16 = vsel %vm1363_vm11, %v13320_v58, %v1362_v61  ;;  %vm15873_vm11 = vcmask 457728  }
  0xf3   : > { %1380 = vmatpush1.bf16.msra.mxu0 %v1371_v54  ;;  %1411 = vmatprep.mubr.bf16.mxu0 %v15901_v5  ;;  %v1377_v18 = vsel %vm298_vm2, %v1366_v16, 0  ;;  %v1981_v54 = vsel %vm298_vm2, %v1974_v52, 0 }
  0xf4   : > { %11644 = vmatmul.mubr.msk.bf16.vlgmr.msra.gmra.mrb[24].mxu1 %vm294_vm3, %v12800_v28  ;;  %10832 = vmatprep.subr.msk.bf16.mxu0 %vm298_vm2, %v1487_v57  ;;  %v1484_v15 = vpop.permute.xlu0 %1483 }
  0xf5   : > { %11648 = vmatpush3.bf16.msra.mxu1 %v1133_v60  ;;  %11649 = vmatprep.mubr.msk.bf16.mxu1 %vm12943_vm0, %v12941_v12  ;;  %v13507_v62 = vpop.permute.xlu1 %2209  ;;  %v1488_v24 = vsel %vm15898_vm12, %v13351_v7, %v1484_v15  ;;  %vm6655_vm12 = vcmask 15360  }
  0xf6   : > { %11653 = vmatprep.subr.bf16.mxu1 %v12941_v12  ;;  %v1499_v27 = vsel %vm298_vm2, %v1488_v24, 0 }
  0xf8   : > { %v13530_v4 = vpop.permute.xlu0 %2211 }
  0xf9   : > { %v13527_v63 = vpop.permute.xlu1 %2213 }
  0xfc   : > { %11650 = vmatmul.mubr.msk.bf16.vlgmr.msra.gmra.mrb[28].mxu1 %vm294_vm3, %v12801_v41  ;;  %v1606_v58 = vpop.permute.xlu0 %1605 }
  0xfd   : > { %11654 = vmatpush3.bf16.msra.mxu1 %v1255_v6  ;;  %11655 = vmatprep.mubr.msk.bf16.mxu1 %vm12943_vm0, %v12941_v12  ;;  %v13537_v19 = vpop.permute.xlu1 %2331  ;;  %v1610_v7 = vsel %vm15879_vm13, %v13382_v20, %v1606_v58  ;;  %v1853_v20 = vsel %vm15874_vm15, %v13436_v36, %v13443_v35  ;;  %v12809_v6 = vld [vmem:[%s15867_s1 + $0x78] sm:$0xff]   ;;  %vm3193_vm13 = vcmask 228352  }
  0xfe   : > { %10827 = vmatmul.mubr.msk.bf16.vlgmr.msra.gmra.mrb[0].mxu0 %vm294_vm3, %v12803_v2  ;;  %11659 = vmatprep.subr.bf16.mxu1 %v12941_v12  ;;  %v1621_v31 = vsel %vm298_vm2, %v1610_v7, 0 }
  0xff   : > { %1502 = vmatpush1.bf16.msra.mxu0 %v1493_v9  ;;  %1533 = vmatprep.mubr.bf16.mxu0 %v15901_v5 }
 0x100   : > { %10838 = vmatprep.subr.msk.bf16.mxu0 %vm298_vm2, %v1609_v55  ;;  %v13555_v17 = vpop.permute.xlu0 %2333 }
 0x101   : > { %v13557_v25 = vpop.permute.xlu1 %2335 }
 0x104   : > { %11656 = vmatmul.mubr.msk.bf16.vlgmr.msra.gmra.mrb[32].mxu1 %vm294_vm3, %v12802_v45  ;;  %v1728_v30 = vpop.permute.xlu0 %1727 }
 0x105   : > { %11660 = vmatpush3.bf16.msra.mxu1 %v1377_v18  ;;  %11661 = vmatprep.mubr.msk.bf16.mxu1 %vm12943_vm0, %v12941_v12  ;;  %v1732_v29 = vsel %vm15877_vm14, %v13415_v8, %v1728_v30  ;;  %v12806_v8 = vld [vmem:[%s15867_s1 + $0x60] sm:$0xff]   ;;  %vm2827_vm14 = vcmask 252928  }
 0x106   : > { %11665 = vmatprep.subr.bf16.mxu1 %v12941_v12  ;;  %v1850_v28 = vpop.permute.xlu1 %1849  ;;  %v1743_v13 = vsel %vm298_vm2, %v1732_v29, 0  ;;  %v12810_v18 = vld [vmem:[%s15867_s1 + $0x80] sm:$0xff]  }
 0x107   : > { %v1854_v41 = vsel %vm15874_vm15, %v13443_v35, %v1850_v28  ;;  %vm15878_vm15 = vcmask 433152  }
 0x108   : > { %v13577_v10 = vpop.permute.xlu0 %2453  ;;  %v1865_v36 = vsel %vm298_vm2, %v1854_v41, 0 }
 0x10a   : > { %10833 = vmatmul.mubr.msk.bf16.vlgmr.msra.gmra.mrb[0].mxu0 %vm294_vm3, %v12804_v22  ;;  %v13586_v26 = vpop.permute.xlu1 %2455 }
 0x10b   : > { %1624 = vmatpush1.bf16.msra.mxu0 %v1615_v23  ;;  %1655 = vmatprep.mubr.bf16.mxu0 %v15901_v5 }
 0x10c   : > { %11662 = vmatmul.mubr.msk.bf16.vlgmr.msra.gmra.mrb[36].mxu1 %vm294_vm3, %v12803_v2  ;;  %10844 = vmatprep.subr.msk.bf16.mxu0 %vm298_vm2, %v1731_v14  ;;  %v13593_v37 = vpop.permute.xlu0 %2457 }
 0x10d   : > { %11666 = vmatpush3.bf16.msra.mxu1 %v1499_v27  ;;  %11667 = vmatprep.mubr.msk.bf16.mxu1 %vm12943_vm0, %v12941_v12 }
 0x10e   : > { %11671 = vmatprep.subr.bf16.mxu1 %v12941_v12  ;;  %v1972_v39 = vpop.permute.xlu1 %1971 }
 0x10f   : > { %v1976_v47 = vsel %vm1973_vm6, %v13473_v50, %v1972_v39  ;;  %v2097_v50 = vsel %vm15873_vm11, %v13483_v53, %v13505_v48  ;;  %vm15875_vm6 = vcmask 449536   ;;  %v12813_v39 = vld [vmem:[%s15867_s1 + $0x98] sm:$0xff]  }
 0x110   : > { %v13608_v43 = vpop.permute.xlu0 %2575  ;;  %v1987_v45 = vsel %vm298_vm2, %v1976_v47, 0  ;;  %v2218_v21 = vsel %vm15875_vm6, %v13507_v62, %v13530_v4 }
 0x111   : > { %v2225_v58 = vsel %vm298_vm2, %v2218_v21, 0 }
 0x112   : > { %v13615_v38 = vpop.permute.xlu1 %2577 }
 0x114   : > { %11668 = vmatmul.mubr.msk.bf16.vlgmr.msra.gmra.mrb[40].mxu1 %vm294_vm3, %v12804_v22  ;;  %v13623_v35 = vpop.permute.xlu0 %2579 }
 0x115   : > { %11672 = vmatpush3.bf16.msra.mxu1 %v1621_v31  ;;  %11673 = vmatprep.mubr.msk.bf16.mxu1 %vm12943_vm0, %v12941_v12 }
 0x116   : > { %10839 = vmatmul.mubr.msk.bf16.vlgmr.msra.gmra.mrb[0].mxu0 %vm294_vm3, %v12805_v32  ;;  %11677 = vmatprep.subr.bf16.mxu1 %v12941_v12  ;;  %v2094_v51 = vpop.permute.xlu1 %2093 }
 0x117   : > { %1746 = vmatpush1.bf16.msra.mxu0 %v1737_v33  ;;  %1777 = vmatprep.mubr.bf16.mxu0 %v15901_v5  ;;  %v2098_v44 = vsel %vm15873_vm11, %v13505_v48, %v2094_v51  ;;  %v2096_v48 = vsel %vm15873_vm11, %v13490_v59, %v13483_v53  ;;  %v2219_v53 = vsel %vm15875_vm6, %v13530_v4, %v13527_v63  ;;  %vm15876_vm11 = vcmask 441344   ;;  %v12811_v4 = vld [vmem:[%s15867_s1 + $0x88] sm:$0xff]  }
 0x118   : > { %10850 = vmatprep.subr.msk.bf16.mxu0 %vm298_vm2, %v1853_v20  ;;  %v2216_v56 = vpop.permute.xlu0 %2215  ;;  %v2109_v60 = vsel %vm298_vm2, %v2098_v44, 0  ;;  %v2103_v2 = vsel %vm298_vm2, %v2096_v48, 0  ;;  %v2341_v14 = vsel %vm15876_vm11, %v13555_v17, %v13557_v25  ;;  %v2340_v30 = vsel %vm15876_vm11, %v13537_v19, %v13555_v17  ;;  %v3299_v20 = vld [vmem:[%s15868_s2] sm:$0xff] }
 0x119   : > { %v2220_v1 = vsel %vm15875_vm6, %v13527_v63, %v2216_v56  ;;  %vm2583_vm6 = vcmask 424960   ;;  %v2347_v31 = vsel %vm298_vm2, %v2340_v30, 0  ;;  %v2463_v19 = vsel %vm15878_vm15, %v13586_v26, %v13593_v37  ;;  %3303 = vperm.xlu0 %12791, %v3299_v20   ;;  %v12815_v56 = vld [vmem:[%s15867_s1 + $0xa8] sm:$0xff]  }
 0x11a   : > { %v13636_v57 = vpop.permute.xlu1 %2697  ;;  %v2231_v59 = vsel %vm298_vm2, %v2220_v1, 0  ;;  %v2585_v47 = vsel %vm2583_vm6, %v13615_v38, %v13623_v35 }
 0x11c   : > { %11674 = vmatmul.mubr.msk.bf16.vlgmr.msra.gmra.mrb[44].mxu1 %vm294_vm3, %v12805_v32  ;;  %v13653_v61 = vpop.permute.xlu0 %2699  ;;  %v12812_v32 = vld [vmem:[%s15867_s1 + $0x90] sm:$0xff]  }
 0x11d   : > { %11678 = vmatpush3.bf16.msra.mxu1 %v1743_v13  ;;  %11679 = vmatprep.mubr.msk.bf16.mxu1 %vm12943_vm0, %v12941_v12 }
 0x11e   : > { %11683 = vmatprep.subr.bf16.mxu1 %v12941_v12  ;;  %v13655_v0 = vpop.permute.xlu1 %2701 }
 0x120   : > { %v2338_v9 = vpop.permute.xlu0 %2337 }
 0x121   : > { %v2342_v16 = vsel %vm15876_vm11, %v13557_v25, %v2338_v9  ;;  %vm2705_vm11 = vcmask 261120  }
 0x122   : > { %10845 = vmatmul.mubr.msk.bf16.vlgmr.msra.gmra.mrb[0].mxu0 %vm294_vm3, %v12806_v8  ;;  %v13670_v15 = vpop.permute.xlu1 %2819  ;;  %v2353_v22 = vsel %vm298_vm2, %v2342_v16, 0  ;;  %v2706_v48 = vsel %vm2705_vm11, %v13636_v57, %v13653_v61  ;;  %v12818_v16 = vld [vmem:[%s15867_s1 + $0xc0] sm:$0xff]  }
 0x123   : > { %1868 = vmatpush1.bf16.msra.mxu0 %v1859_v42  ;;  %1899 = vmatprep.mubr.bf16.mxu0 %v15901_v5 }
 0x124   : > { %11680 = vmatmul.mubr.msk.bf16.vlgmr.msra.gmra.mrb[48].mxu1 %vm294_vm3, %v12806_v8  ;;  %10856 = vmatprep.subr.msk.bf16.mxu0 %vm298_vm2, %v1975_v34  ;;  %v13683_v55 = vpop.permute.xlu0 %2821  ;;  %v2462_v8 = vsel %vm15878_vm15, %v13577_v10, %v13586_v26  ;;  %v12814_v26 = vld [vmem:[%s15867_s1 + $0xa0] sm:$0xff]  }
 0x125   : > { %11684 = vmatpush3.bf16.msra.mxu1 %v1865_v36  ;;  %11685 = vmatprep.mubr.msk.bf16.mxu1 %vm12943_vm0, %v12941_v12  ;;  %v2469_v34 = vsel %vm298_vm2, %v2462_v8, 0 }
 0x126   : > { %11689 = vmatprep.subr.bf16.mxu1 %v12941_v12  ;;  %v13685_v63 = vpop.permute.xlu1 %2823 }
 0x127   : > { %v2829_v9 = vsel %vm2827_vm14, %v13683_v55, %v13685_v63 }
 0x128   : > { %v2460_v23 = vpop.permute.xlu0 %2459 }
 0x129   : > { %v2464_v62 = vsel %vm15878_vm15, %v13593_v37, %v2460_v23  ;;  %vm2949_vm15 = vcmask 244736  }
 0x12a   : > { %v2582_v24 = vpop.permute.xlu1 %2581  ;;  %v2475_v25 = vsel %vm298_vm2, %v2464_v62, 0 }
 0x12b   : > { %v2586_v11 = vsel %vm2583_vm6, %v13623_v35, %v2582_v24  ;;  %v2584_v35 = vsel %vm2583_vm6, %v13608_v43, %v13615_v38  ;;  %v2707_v43 = vsel %vm2705_vm11, %v13653_v61, %v13655_v0  ;;  %vm3071_vm6 = vcmask 236544   ;;  %v12817_v61 = vld [vmem:[%s15867_s1 + $0xb8] sm:$0xff]  }
 0x12c   : > { %11686 = vmatmul.mubr.msk.bf16.vlgmr.msra.gmra.mrb[52].mxu1 %vm294_vm3, %v12807_v49  ;;  %v13712_v27 = vpop.permute.xlu0 %2941  ;;  %v2597_v17 = vsel %vm298_vm2, %v2586_v11, 0 }
 0x12d   : > { %11690 = vmatpush3.bf16.msra.mxu1 %v1987_v45  ;;  %11691 = vmatprep.mubr.msk.bf16.mxu1 %vm12943_vm0, %v12941_v12 }
 0x12e   : > { %10851 = vmatmul.mubr.msk.bf16.vlgmr.msra.gmra.mrb[0].mxu0 %vm294_vm3, %v12807_v49  ;;  %11695 = vmatprep.subr.bf16.mxu1 %v12941_v12  ;;  %v13715_v7 = vpop.permute.xlu1 %2943 }
 0x12f   : > { %1990 = vmatpush1.bf16.msra.mxu0 %v1981_v54  ;;  %2021 = vmatprep.mubr.bf16.mxu0 %v15901_v5  ;;  %v2591_v54 = vsel %vm298_vm2, %v2584_v35, 0 }
 0x130   : > { %10862 = vmatprep.subr.msk.bf16.mxu0 %vm298_vm2, %v2097_v50  ;;  %v13724_v28 = vpop.permute.xlu0 %2945 }
 0x132   : > { %v2704_v33 = vpop.permute.xlu1 %2703 }
 0x133   : > { %v2708_v37 = vsel %vm2705_vm11, %v13655_v0, %v2704_v33  ;;  %v12816_v0 = vld [vmem:[%s15867_s1 + $0xb0] sm:$0xff]   ;;  %vm5305_vm11 = vcmask 367616  }
 0x134   : > { %11692 = vmatmul.mubr.msk.bf16.vlgmr.msra.gmra.mrb[56].mxu1 %vm294_vm3, %v12808_v46  ;;  %v13743_v29 = vpop.permute.xlu0 %3063  ;;  %v2719_v41 = vsel %vm298_vm2, %v2708_v37, 0 }
 0x135   : > { %11696 = vmatpush3.bf16.msra.mxu1 %v2109_v60  ;;  %11697 = vmatprep.mubr.msk.bf16.mxu1 %vm12943_vm0, %v12941_v12 }
 0x136   : > { %11701 = vmatprep.subr.bf16.mxu1 %v12941_v12 }
 0x138   : > { %v13748_v13 = vpop.permute.xlu1 %3065 }
 0x139   : > { %v13762_v42 = vpop.permute.xlu0 %3067  ;;  %v3072_v21 = vsel %vm3071_vm6, %v13743_v29, %v13748_v13 }
 0x13a   : > { %10857 = vmatmul.mubr.msk.bf16.vlgmr.msra.gmra.mrb[0].mxu0 %vm294_vm3, %v12808_v46 }
 0x13b   : > { %2112 = vmatpush1.bf16.msra.mxu0 %v2103_v2  ;;  %2143 = vmatprep.mubr.bf16.mxu0 %v15901_v5  ;;  %v2713_v2 = vsel %vm298_vm2, %v2706_v48, 0 }
 0x13c   : > { %11698 = vmatmul.mubr.msk.bf16.vlgmr.msra.gmra.mrb[60].mxu1 %vm294_vm3, %v12809_v6  ;;  %10868 = vmatprep.subr.msk.bf16.mxu0 %vm298_vm2, %v2219_v53  ;;  %v2826_v36 = vpop.permute.xlu1 %2825 }
 0x13d   : > { %11702 = vmatpush3.bf16.msra.mxu1 %v2231_v59  ;;  %11703 = vmatprep.mubr.msk.bf16.mxu1 %vm12943_vm0, %v12941_v12  ;;  %v2830_v10 = vsel %vm2827_vm14, %v13685_v63, %v2826_v36  ;;  %v2948_v49 = vpop.permute.xlu0 %2947  ;;  %v2828_v59 = vsel %vm2827_vm14, %v13670_v15, %v13683_v55  ;;  %v3073_v55 = vsel %vm3071_vm6, %v13748_v13, %v13762_v42  ;;  %vm5155_vm14 = vcmask 375808  }
 0x13e   : > { %11707 = vmatprep.subr.bf16.mxu1 %v12941_v12  ;;  %v2841_v51 = vsel %vm298_vm2, %v2830_v10, 0  ;;  %v2952_v45 = vsel %vm2949_vm15, %v13724_v28, %v2948_v49  ;;  %v2835_v63 = vsel %vm298_vm2, %v2828_v59, 0 }
 0x13f   : > { %v2963_v38 = vsel %vm298_vm2, %v2952_v45, 0 }
 0x142   : > { %v13796_v50 = vpop.permute.xlu1 %3185 }
 0x143   : > { %v13788_v52 = vpop.permute.xlu0 %3187 }
 0x144   : > { %11704 = vmatmul.mubr.msk.bf16.vlgmr.msra.gmra.mrb[64].mxu1 %vm294_vm3, %v12810_v18 }
 0x145   : > { %11708 = vmatpush3.bf16.msra.mxu1 %v2353_v22  ;;  %11709 = vmatprep.mubr.msk.bf16.mxu1 %vm12943_vm0, %v12941_v12 }
 0x146   : > { %10863 = vmatmul.mubr.msk.bf16.vlgmr.msra.gmra.mrb[0].mxu0 %vm294_vm3, %v12809_v6  ;;  %11713 = vmatprep.subr.bf16.mxu1 %v12941_v12  ;;  %v3190_v46 = vpop.permute.xlu1 %3189 }
 0x147   : > { %2234 = vmatpush1.bf16.msra.mxu0 %v2225_v58  ;;  %2265 = vmatprep.mubr.bf16.mxu0 %v15901_v5  ;;  %v3079_v58 = vsel %vm298_vm2, %v3072_v21, 0  ;;  %v3195_v24 = vsel %vm3193_vm13, %v13788_v52, %v3190_v46 }
 0x148   : > { %10874 = vmatprep.subr.msk.bf16.mxu0 %vm298_vm2, %v2341_v14  ;;  %v3070_v44 = vpop.permute.xlu0 %3069 }
 0x149   : > { %v3074_v60 = vsel %vm3071_vm6, %v13762_v42, %v3070_v44  ;;  %vm5455_vm6 = vcmask 220160  }
 0x14a   : > { %v3085_v1 = vsel %vm298_vm2, %v3074_v60, 0  ;;  %v3192_v6 = vpop.permute.xlu1 %3191 }
 0x14b   : > { %v3196_v57 = vsel %vm3193_vm13, %v3190_v46, %v3192_v6 }
 0x14c   : > { %11710 = vmatmul.mubr.msk.bf16.vlgmr.msra.gmra.mrb[68].mxu1 %vm294_vm3, %v12811_v4  ;;  %v3207_v53 = vsel %vm298_vm2, %v3196_v57, 0 }
 0x14d   : > { %11714 = vmatpush3.bf16.msra.mxu1 %v2475_v25  ;;  %11715 = vmatprep.mubr.msk.bf16.mxu1 %vm12943_vm0, %v12941_v12 }
 0x14e   : > { %11719 = vmatprep.subr.bf16.mxu1 %v12941_v12 }
 0x152   : > { %10869 = vmatmul.mubr.msk.bf16.vlgmr.msra.gmra.mrb[0].mxu0 %vm294_vm3, %v12810_v18  ;;  %v2951_v18 = vsel %vm2949_vm15, %v13715_v7, %v13724_v28 }
 0x153   : > { %2356 = vmatpush1.bf16.msra.mxu0 %v2347_v31  ;;  %2387 = vmatprep.mubr.bf16.mxu0 %v15901_v5 }
 0x154   : > { %11716 = vmatmul.mubr.msk.bf16.vlgmr.msra.gmra.mrb[72].mxu1 %vm294_vm3, %v12812_v32  ;;  %10880 = vmatprep.subr.msk.bf16.mxu0 %vm298_vm2, %v2463_v19 }
 0x155   : > { %11720 = vmatpush3.bf16.msra.mxu1 %v2597_v17  ;;  %11721 = vmatprep.mubr.msk.bf16.mxu1 %vm12943_vm0, %v12941_v12 }
 0x156   : > { %11725 = vmatprep.subr.bf16.mxu1 %v12941_v12 }
 0x15c   : > { %11722 = vmatmul.mubr.msk.bf16.vlgmr.msra.gmra.mrb[76].mxu1 %vm294_vm3, %v12813_v39 }
 0x15d   : > { %11726 = vmatpush3.bf16.msra.mxu1 %v2719_v41  ;;  %11727 = vmatprep.mubr.msk.bf16.mxu1 %vm12943_vm0, %v12941_v12 }
 0x15e   : > { %10875 = vmatmul.mubr.msk.bf16.vlgmr.msra.gmra.mrb[0].mxu0 %vm294_vm3, %v12811_v4  ;;  %11731 = vmatprep.subr.bf16.mxu1 %v12941_v12 }
 0x15f   : > { %2478 = vmatpush1.bf16.msra.mxu0 %v2469_v34  ;;  %2509 = vmatprep.mubr.bf16.mxu0 %v15901_v5 }
 0x160   : > { %10886 = vmatprep.subr.msk.bf16.mxu0 %vm298_vm2, %v2585_v47 }
 0x164   : > { %11728 = vmatmul.mubr.msk.bf16.vlgmr.msra.gmra.mrb[80].mxu1 %vm294_vm3, %v12814_v26 }
 0x165   : > { %11732 = vmatpush3.bf16.msra.mxu1 %v2841_v51  ;;  %11733 = vmatprep.mubr.msk.bf16.mxu1 %vm12943_vm0, %v12941_v12 }
 0x166   : > { %11737 = vmatprep.subr.bf16.mxu1 %v12941_v12 }
 0x16a   : > { %10881 = vmatmul.mubr.msk.bf16.vlgmr.msra.gmra.mrb[0].mxu0 %vm294_vm3, %v12812_v32 }
 0x16b   : > { %2600 = vmatpush1.bf16.msra.mxu0 %v2591_v54  ;;  %2631 = vmatprep.mubr.bf16.mxu0 %v15901_v5 }
 0x16c   : > { %11734 = vmatmul.mubr.msk.bf16.vlgmr.msra.gmra.mrb[84].mxu1 %vm294_vm3, %v12815_v56  ;;  %10892 = vmatprep.subr.msk.bf16.mxu0 %vm298_vm2, %v2707_v43 }
 0x16d   : > { %11738 = vmatpush3.bf16.msra.mxu1 %v2963_v38  ;;  %11739 = vmatprep.mubr.msk.bf16.mxu1 %vm12943_vm0, %v12941_v12 }
 0x16e   : > { %11743 = vmatprep.subr.bf16.mxu1 %v12941_v12 }
 0x174   : > { %11740 = vmatmul.mubr.msk.bf16.vlgmr.msra.gmra.mrb[88].mxu1 %vm294_vm3, %v12816_v0 }
 0x175   : > { %11744 = vmatpush3.bf16.msra.mxu1 %v3085_v1  ;;  %11745 = vmatprep.mubr.msk.bf16.mxu1 %vm12943_vm0, %v12941_v12 }
 0x176   : > { %10887 = vmatmul.mubr.msk.bf16.vlgmr.msra.gmra.mrb[0].mxu0 %vm294_vm3, %v12813_v39  ;;  %11749 = vmatprep.subr.bf16.mxu1 %v12941_v12 }
 0x177   : > { %2722 = vmatpush1.bf16.msra.mxu0 %v2713_v2  ;;  %2753 = vmatprep.mubr.bf16.mxu0 %v15901_v5 }
 0x178   : > { %10898 = vmatprep.subr.msk.bf16.mxu0 %vm298_vm2, %v2829_v9 }
 0x17c   : > { %11746 = vmatmul.mubr.msk.bf16.vlgmr.msra.gmra.mrb[92].mxu1 %vm294_vm3, %v12817_v61 }
 0x17d   : > { %11750 = vmatpush3.bf16.msra.mxu1 %v3207_v53  ;;  %11751 = vmatprep.mubr.msk.bf16.mxu1 %vm12943_vm0, %v12941_v12  ;;  %v2950_v12 = vsel %vm2949_vm15, %v13712_v27, %v13715_v7  ;;  %v3194_v7 = vsel %vm3193_vm13, %v13796_v50, %v13788_v52  ;;  %vm3383_vm0 = vcmask 605184   ;;  %vm3655_vm13 = vcmask 596992  }
 0x17e   : > { %v2957_v15 = vsel %vm298_vm2, %v2950_v12, 0  ;;  %v3201_v31 = vsel %vm298_vm2, %v3194_v7, 0  ;;  %vm3805_vm15 = vcmask 588800  }
 0x182   : > { %10893 = vmatmul.mubr.msk.bf16.vlgmr.msra.gmra.mrb[0].mxu0 %vm294_vm3, %v12814_v26 }
 0x183   : > { %2844 = vmatpush1.bf16.msra.mxu0 %v2835_v63  ;;  %2875 = vmatprep.mubr.bf16.mxu0 %v15901_v5 }
 0x184   : > { %11752 = vmatmul.mubr.msk.bf16.vlgmr.msra.gmra.mrb[96].mxu1 %vm294_vm3, %v12818_v16  ;;  %10904 = vmatprep.subr.msk.bf16.mxu0 %vm298_vm2, %v2951_v18 }
 0x185   : > { %3429 = vmatprep.mubr.bf16.mxu1 %v15901_v5 }
 0x18e   : > { %10899 = vmatmul.mubr.msk.bf16.vlgmr.msra.gmra.mrb[0].mxu0 %vm294_vm3, %v12815_v56 }
 0x18f   : > { %2966 = vmatpush1.bf16.msra.mxu0 %v2957_v15  ;;  %2997 = vmatprep.mubr.bf16.mxu0 %v15901_v5 }
 0x190   : > { %10910 = vmatprep.subr.msk.bf16.mxu0 %vm298_vm2, %v3073_v55 }
 0x197   : > { %v385_v22 = vpop.f32.mrb[0].mxu1 }
 0x198   : > { %v11609_v23 = vpop.f32.mrb[1].mxu1 }
 0x199   : > { %v388_v14 = vpop.f32.mrb[2].mxu1 }
 0x19a   : > { %10905 = vmatmul.mubr.msk.bf16.vlgmr.msra.gmra.mrb[0].mxu0 %vm294_vm3, %v12816_v0  ;;  %v11610_v62 = vpop.f32.mrb[3].mxu1 }
 0x19b   : > { %3088 = vmatpush1.bf16.msra.mxu0 %v3079_v58  ;;  %3119 = vmatprep.mubr.bf16.mxu0 %v15901_v5 }
 0x19c   : > { %10916 = vmatprep.subr.msk.bf16.mxu0 %vm298_vm2, %v3195_v24  ;;  %vm3390_vm2 = vcmask 130048  }
 0x19f   : > { %v486_v4 = vpop.f32.mrb[4].mxu1 }
 0x1a0   : > { %v487_v27 = vadd.f32 %v486_v4, %v385_v22  ;;  %v11615_v25 = vpop.f32.mrb[5].mxu1 }
 0x1a1   : > { %v489_v30 = vpop.f32.mrb[6].mxu1 }
 0x1a2   : > { %v490_v28 = vadd.f32 %v489_v30, %v388_v14  ;;  %v11616_v11 = vpop.f32.mrb[7].mxu1 }
 0x1a6   : > { %10911 = vmatmul.mubr.msk.bf16.vlgmr.msra.gmra.mrb[0].mxu0 %vm294_vm3, %v12817_v61 }
 0x1a7   : > { %3210 = vmatpush1.bf16.msra.mxu0 %v3201_v31  ;;  %3241 = vmatprep.mubr.bf16.mxu0 %v15901_v5  ;;  %v602_v32 = vpop.f32.mrb[8].mxu1 }
 0x1a8   : > { %v611_v33 = vadd.f32 %v602_v32, %v487_v27  ;;  %v11621_v19 = vpop.f32.mrb[9].mxu1 }
 0x1a9   : > { %v605_v17 = vpop.f32.mrb[10].mxu1 }
 0x1aa   : > { %v614_v20 = vadd.f32 %v605_v17, %v490_v28  ;;  %v11622_v29 = vpop.f32.mrb[11].mxu1 }
 0x1af   : > { %v724_v13 = vpop.f32.mrb[12].mxu1 }
 0x1b0   : > { %v733_v37 = vadd.f32 %v724_v13, %v611_v33  ;;  %v11627_v39 = vpop.f32.mrb[13].mxu1 }
 0x1b1   : > { %v727_v40 = vpop.f32.mrb[14].mxu1 }
 0x1b2   : > { %10917 = vmatmul.mubr.msk.bf16.vlgmr.msra.gmra.mrb[0].mxu0 %vm294_vm3, %v12818_v16  ;;  %v736_v8 = vadd.f32 %v727_v40, %v614_v20  ;;  %v11628_v41 = vpop.f32.mrb[15].mxu1  ;;  %vm3517_vm3 = vcmask 613376  }
 0x1b3   : > { %5200 = vmatprep.mubr.bf16.mxu0 %v15901_v5 }
 0x1b7   : > { %v846_v42 = vpop.f32.mrb[16].mxu1 }
 0x1b8   : > { %v855_v34 = vadd.f32 %v846_v42, %v733_v37  ;;  %v11633_v36 = vpop.f32.mrb[17].mxu1 }
 0x1b9   : > { %v849_v47 = vpop.f32.mrb[18].mxu1 }
 0x1ba   : > { %v858_v10 = vadd.f32 %v849_v47, %v736_v8  ;;  %v11634_v26 = vpop.f32.mrb[19].mxu1 }
 0x1bf   : > { %v968_v49 = vpop.f32.mrb[20].mxu1 }
 0x1c0   : > { %v977_v51 = vadd.f32 %v968_v49, %v855_v34  ;;  %v11639_v35 = vpop.f32.mrb[21].mxu1 }
 0x1c1   : > { %v971_v52 = vpop.f32.mrb[22].mxu1 }
 0x1c2   : > { %v980_v45 = vadd.f32 %v971_v52, %v858_v10  ;;  %v11640_v54 = vpop.f32.mrb[23].mxu1 }
 0x1c7   : > { %v1090_v56 = vpop.f32.mrb[24].mxu1 }
 0x1c8   : > { %v1099_v50 = vadd.f32 %v1090_v56, %v977_v51  ;;  %v11645_v43 = vpop.f32.mrb[25].mxu1 }
 0x1c9   : > { %v1093_v38 = vpop.f32.mrb[26].mxu1 }
 0x1ca   : > { %v1102_v44 = vadd.f32 %v1093_v38, %v980_v45  ;;  %v11646_v46 = vpop.f32.mrb[27].mxu1 }
 0x1cf   : > { %v1212_v60 = vpop.f32.mrb[28].mxu1 }
 0x1d0   : > { %v1221_v0 = vadd.f32 %v1212_v60, %v1099_v50  ;;  %v11651_v48 = vpop.f32.mrb[29].mxu1 }
 0x1d1   : > { %v1215_v1 = vpop.f32.mrb[30].mxu1 }
 0x1d2   : > { %v1224_v2 = vadd.f32 %v1215_v1, %v1102_v44  ;;  %v11652_v6 = vpop.f32.mrb[31].mxu1 }
 0x1d7   : > { %v1334_v9 = vpop.f32.mrb[32].mxu1 }
 0x1d8   : > { %v1343_v57 = vadd.f32 %v1334_v9, %v1221_v0  ;;  %v11657_v61 = vpop.f32.mrb[33].mxu1 }
 0x1d9   : > { %v1337_v53 = vpop.f32.mrb[34].mxu1 }
 0x1da   : > { %v1346_v59 = vadd.f32 %v1337_v53, %v1224_v2  ;;  %v11658_v63 = vpop.f32.mrb[35].mxu1 }
 0x1df   : > { %v1456_v16 = vpop.f32.mrb[36].mxu1 }
 0x1e0   : > { %v1465_v18 = vadd.f32 %v1456_v16, %v1343_v57  ;;  %v11663_v12 = vpop.f32.mrb[37].mxu1 }
 0x1e1   : > { %v1459_v15 = vpop.f32.mrb[38].mxu1 }
 0x1e2   : > { %v1468_v55 = vadd.f32 %v1459_v15, %v1346_v59  ;;  %v11664_v21 = vpop.f32.mrb[39].mxu1 }
 0x1e7   : > { %v1578_v22 = vpop.f32.mrb[40].mxu1 }
 0x1e8   : > { %v1587_v58 = vadd.f32 %v1578_v22, %v1465_v18  ;;  %v11669_v23 = vpop.f32.mrb[41].mxu1 }
 0x1e9   : > { %v1581_v24 = vpop.f32.mrb[42].mxu1 }
 0x1ea   : > { %v1590_v14 = vadd.f32 %v1581_v24, %v1468_v55  ;;  %v11670_v62 = vpop.f32.mrb[43].mxu1 }
 0x1ef   : > { %v1700_v4 = vpop.f32.mrb[44].mxu1 }
 0x1f0   : > { %v1709_v27 = vadd.f32 %v1700_v4, %v1587_v58  ;;  %v11675_v25 = vpop.f32.mrb[45].mxu1 }
 0x1f1   : > { %v1703_v7 = vpop.f32.mrb[46].mxu1 }
 0x1f2   : > { %v1712_v30 = vadd.f32 %v1703_v7, %v1590_v14  ;;  %v11676_v28 = vpop.f32.mrb[47].mxu1 }
 0x1f7   : > { %v1822_v11 = vpop.f32.mrb[48].mxu1 }
 0x1f8   : > { %v1831_v31 = vadd.f32 %v1822_v11, %v1709_v27  ;;  %v11681_v32 = vpop.f32.mrb[49].mxu1 }
 0x1f9   : > { %v1825_v33 = vpop.f32.mrb[50].mxu1 }
 0x1fa   : > { %v1834_v19 = vadd.f32 %v1825_v33, %v1712_v30  ;;  %v11682_v17 = vpop.f32.mrb[51].mxu1 }
 0x1ff   : > { %v1944_v20 = vpop.f32.mrb[52].mxu1 }
 0x200   : > { %v1953_v29 = vadd.f32 %v1944_v20, %v1831_v31  ;;  %v11687_v13 = vpop.f32.mrb[53].mxu1 }
 0x201   : > { %v1947_v37 = vpop.f32.mrb[54].mxu1 }
 0x202   : > { %v1956_v39 = vadd.f32 %v1947_v37, %v1834_v19  ;;  %v11688_v40 = vpop.f32.mrb[55].mxu1 }
 0x207   : > { %v2066_v8 = vpop.f32.mrb[56].mxu1 }
 0x208   : > { %v2075_v41 = vadd.f32 %v2066_v8, %v1953_v29  ;;  %v11693_v42 = vpop.f32.mrb[57].mxu1  ;;  %v3304_v8 = vpop.permute.xlu0 %3303 }
 0x209   : > { %v2069_v34 = vpop.f32.mrb[58].mxu1 }
 0x20a   : > { %v2078_v36 = vadd.f32 %v2069_v34, %v1956_v39  ;;  %v11694_v47 = vpop.f32.mrb[59].mxu1  ;;  %v3329_v39 = vsub.s32 2, %v13038_v3 }
 0x20b   : > { %v3309_v47 = vpop.permute.xlu1 %3308 }
 0x20f   : > { %v2188_v10 = vpop.f32.mrb[60].mxu1 }
 0x210   : > { %v2197_v26 = vadd.f32 %v2188_v10, %v2075_v41  ;;  %v11699_v49 = vpop.f32.mrb[61].mxu1  ;;  %v3317_v41 = vld [vmem:[%s15871_s5] sm:$0x7] }
 0x211   : > { %v2191_v51 = vpop.f32.mrb[62].mxu1  ;;  %v3330_v49 = vrot.slane %v3317_v41, %v3329_v39 }
 0x212   : > { %v2200_v35 = vadd.f32 %v2191_v51, %v2078_v36  ;;  %v11700_v52 = vpop.f32.mrb[63].mxu1 }
 0x217   : > { %v2310_v45 = vpop.f32.mrb[64].mxu1 }
 0x218   : > { %v2319_v54 = vadd.f32 %v2310_v45, %v2197_v26  ;;  %v11705_v56 = vpop.f32.mrb[65].mxu1 }
 0x219   : > { %v2313_v50 = vpop.f32.mrb[66].mxu1  ;;  %v3321_v56 = vsub.s32 0, %v13038_v3 }
 0x21a   : > { %v2322_v43 = vadd.f32 %v2313_v50, %v2200_v35  ;;  %v11706_v38 = vpop.f32.mrb[67].mxu1  ;;  %v3325_v50 = vsub.s32 1, %v13038_v3 }
 0x21f   : > { %v2432_v44 = vpop.f32.mrb[68].mxu1 }
 0x220   : > { %v2441_v46 = vadd.f32 %v2432_v44, %v2319_v54  ;;  %v11711_v60 = vpop.f32.mrb[69].mxu1  ;;  %v3322_v44 = vrot.slane %v3317_v41, %v3321_v56  ;;  %v12824_v56 = vld [vmem:[%s15869_s3 + $0xc0] sm:$0xff]  }
 0x221   : > { %v2435_v0 = vpop.f32.mrb[70].mxu1 }
 0x222   : > { %v2444_v48 = vadd.f32 %v2435_v0, %v2322_v43  ;;  %v11712_v1 = vpop.f32.mrb[71].mxu1  ;;  %v3326_v0 = vrot.slane %v3317_v41, %v3325_v50 }
 0x227   : > { %v2554_v2 = vpop.f32.mrb[72].mxu1 }
 0x228   : > { %v2563_v6 = vadd.f32 %v2554_v2, %v2441_v46  ;;  %v11717_v9 = vpop.f32.mrb[73].mxu1 }
 0x229   : > { %v2557_v57 = vpop.f32.mrb[74].mxu1 }
 0x22a   : > { %v2566_v61 = vadd.f32 %v2557_v57, %v2444_v48  ;;  %v11718_v53 = vpop.f32.mrb[75].mxu1 }
 0x22f   : > { %v2676_v59 = vpop.f32.mrb[76].mxu1 }
 0x230   : > { %v2685_v63 = vadd.f32 %v2676_v59, %v2563_v6  ;;  %v11723_v16 = vpop.f32.mrb[77].mxu1 }
 0x231   : > { %v2679_v18 = vpop.f32.mrb[78].mxu1 }
 0x232   : > { %v2688_v12 = vadd.f32 %v2679_v18, %v2566_v61  ;;  %v11724_v15 = vpop.f32.mrb[79].mxu1 }
 0x237   : > { %v2798_v55 = vpop.f32.mrb[80].mxu1 }
 0x238   : > { %v2807_v21 = vadd.f32 %v2798_v55, %v2685_v63  ;;  %v11729_v22 = vpop.f32.mrb[81].mxu1 }
 0x239   : > { %v2801_v58 = vpop.f32.mrb[82].mxu1 }
 0x23a   : > { %v2810_v23 = vadd.f32 %v2801_v58, %v2688_v12  ;;  %v11730_v24 = vpop.f32.mrb[83].mxu1 }
 0x23f   : > { %v2920_v14 = vpop.f32.mrb[84].mxu1 }
 0x240   : > { %v2929_v62 = vadd.f32 %v2920_v14, %v2807_v21  ;;  %v11735_v4 = vpop.f32.mrb[85].mxu1  ;;  %v12819_v21 = vld [vmem:[%s15869_s3 + $0x10] sm:$0xff]  }
 0x241   : > { %v2923_v27 = vpop.f32.mrb[86].mxu1  ;;  %v12820_v4 = vld [vmem:[%s15869_s3 + $0x18] sm:$0xff]  }
 0x242   : > { %v2932_v25 = vadd.f32 %v2923_v27, %v2810_v23  ;;  %v11736_v7 = vpop.f32.mrb[87].mxu1 }
 0x247   : > { %v3042_v30 = vpop.f32.mrb[88].mxu1 }
 0x248   : > { %v3051_v28 = vadd.f32 %v3042_v30, %v2929_v62  ;;  %v11741_v11 = vpop.f32.mrb[89].mxu1 }
 0x249   : > { %v3045_v31 = vpop.f32.mrb[90].mxu1 }
 0x24a   : > { %v3054_v32 = vadd.f32 %v3045_v31, %v2932_v25  ;;  %v11742_v33 = vpop.f32.mrb[91].mxu1 }
 0x24f   : > { %v3164_v19 = vpop.f32.mrb[92].mxu1 }
 0x250   : > { %v3173_v17 = vadd.f32 %v3164_v19, %v3051_v28  ;;  %v11747_v20 = vpop.f32.mrb[93].mxu1 }
 0x251   : > { %v3167_v29 = vpop.f32.mrb[94].mxu1 }
 0x252   : > { %v3176_v13 = vadd.f32 %v3167_v29, %v3054_v32  ;;  %v11748_v37 = vpop.f32.mrb[95].mxu1 }
 0x257   : > { %v3286_v40 = vpop.f32.mrb[96].mxu1 }
 0x258   : > { %v3295_v42 = vadd.f32 %v3286_v40, %v3173_v17  ;;  %v11753_v34 = vpop.f32.mrb[97].mxu1  ;;  %v12821_v17 = vld [vmem:[%s15869_s3] sm:$0xff]   ;;  %v12822_v40 = vld [vmem:[%s15869_s3 + $0x8] sm:$0xff]  }
 0x259   : > { %v3289_v36 = vpop.f32.mrb[98].mxu1 }
 0x25a   : > { %v3313_v10 = vadd.f32 %v3304_v8, %v3295_v42  ;;  %v3298_v26 = vadd.f32 %v3289_v36, %v3176_v13  ;;  %v11754_v51 = vpop.f32.mrb[99].mxu1 }
 0x25c   : > { %v3316_v35 = vadd.f32 %v3309_v47, %v3298_v26  ;;  %v3336_v52 = vmul.f32 %v3330_v49, %v3313_v10 }
 0x25e   : > { %v3339_v45 = vmul.f32 %v3330_v49, %v3316_v35 }
 0x260   : > { %v13883_v54 = vpack.c.bf16 %v3339_v45, %v3336_v52  ;;  %v12823_v45 = vld [vmem:[%s15869_s3 + $0x20] sm:$0xff]  }
 0x285   : > { %v3243_v43 = vpop.f32.mrb[0].mxu0 }
 0x286   : > { %v3311_v38 = vadd.f32 %v3304_v8, %v3243_v43  ;;  %v3245_v46 = vpop.f32.mrb[1].mxu0 }
 0x287   : > { %v3312_v60 = vadd.f32 %v3304_v8, %v3245_v46  ;;  %v3247_v48 = vpop.f32.mrb[2].mxu0 }
 0x288   : > { %v3314_v1 = vadd.f32 %v3309_v47, %v3247_v48  ;;  %v3249_v2 = vpop.f32.mrb[3].mxu0  ;;  %v3334_v9 = vmul.f32 %v3322_v44, %v3311_v38 }
 0x289   : > { %v3315_v6 = vadd.f32 %v3309_v47, %v3249_v2  ;;  %v3335_v61 = vmul.f32 %v3326_v0, %v3312_v60  ;;  %v12825_v60 = vld [vmem:[%s15869_s3 + $0x28] sm:$0xff]  }
 0x28a   : > { %v3337_v57 = vmul.f32 %v3322_v44, %v3314_v1 }
 0x28b   : > { %v3338_v53 = vmul.f32 %v3326_v0, %v3315_v6  ;;  %v12826_v0 = vld [vmem:[%s15869_s3 + $0xc8] sm:$0xff]  }
 0x28c   : > { %v13887_v59 = vpack.c.bf16 %v3337_v57, %v3334_v9 }
 0x28d   : > { %v13889_v63 = vpack.c.bf16 %v3338_v53, %v3335_v61  ;;  %v12827_v61 = vld [vmem:[%s15869_s3 + $0xd0] sm:$0xff]  }
 0x28e   : > { %3377 = vrot.lane.b32.xlu1 %v13887_v59, %s12960_s25 }
 0x28f   : > { %3379 = vrot.lane.b32.xlu0 %v13889_v63, %s12960_s25 }
 0x292   : > { %3375 = vrot.lane.b32.xlu1 %v15901_v5, %s12960_s25 }
 0x293   : > { %3381 = vrot.lane.b32.xlu0 %v13883_v54, %s12960_s25  ;;  %s12967_s25 = smov 69  }
 0x296   : > { %3511 = vrot.lane.b32.xlu1 %v13887_v59, %s12961_s30 }
 0x297   : > { %3513 = vrot.lane.b32.xlu0 %v13889_v63, %s12961_s30 }
 0x29a   : > { %3509 = vrot.lane.b32.xlu1 %v15901_v5, %s12961_s30 }
 0x29b   : > { %3515 = vrot.lane.b32.xlu0 %v13883_v54, %s12961_s30  ;;  %s12968_s30 = smov 45  }
 0x29e   : > { %3649 = vrot.lane.b32.xlu1 %v13887_v59, %s12962_s20 }
 0x29f   : > { %3651 = vrot.lane.b32.xlu0 %v13889_v63, %s12962_s20 }
 0x2a2   : > { %3647 = vrot.lane.b32.xlu1 %v15901_v5, %s12962_s20 }
 0x2a3   : > { %3653 = vrot.lane.b32.xlu0 %v13883_v54, %s12962_s20  ;;  %s12969_s20 = smov 51  }
 0x2a6   : > { %3799 = vrot.lane.b32.xlu1 %v13887_v59, %s12963_s26 }
 0x2a7   : > { %3801 = vrot.lane.b32.xlu0 %v13889_v63, %s12963_s26 }
 0x2aa   : > { %3797 = vrot.lane.b32.xlu1 %v15901_v5, %s12963_s26 }
 0x2ab   : > { %3803 = vrot.lane.b32.xlu0 %v13883_v54, %s12963_s26  ;;  %s12970_s26 = smov 27  }
 0x2ae   : > { %3949 = vrot.lane.b32.xlu1 %v13887_v59, %s12964_s23 }
 0x2af   : > { %3951 = vrot.lane.b32.xlu0 %v13889_v63, %s12964_s23 }
 0x2b2   : > { %3947 = vrot.lane.b32.xlu1 %v15901_v5, %s12964_s23 }
 0x2b3   : > { %3953 = vrot.lane.b32.xlu0 %v13883_v54, %s12964_s23  ;;  %s12971_s23 = smov 26  }
 0x2b6   : > { %4099 = vrot.lane.b32.xlu1 %v13887_v59, %s12965_s11 }
 0x2b7   : > { %4101 = vrot.lane.b32.xlu0 %v13889_v63, %s12965_s11 }
 0x2ba   : > { %4097 = vrot.lane.b32.xlu1 %v15901_v5, %s12965_s11 }
 0x2bb   : > { %4103 = vrot.lane.b32.xlu0 %v13883_v54, %s12965_s11  ;;  %s12972_s11 = smov 50  }
 0x2be   : > { %5149 = vrot.lane.b32.xlu1 %v13887_v59, %s12966_s16 }
 0x2bf   : > { %5151 = vrot.lane.b32.xlu0 %v13889_v63, %s12966_s16 }
 0x2c2   : > { %5147 = vrot.lane.b32.xlu1 %v15901_v5, %s12966_s16 }
 0x2c3   : > { %4249 = vrot.lane.b32.xlu0 %v13887_v59, %s12967_s25 }
 0x2c6   : > { %4251 = vrot.lane.b32.xlu1 %v13889_v63, %s12967_s25 }
 0x2c7   : > { %4247 = vrot.lane.b32.xlu0 %v15901_v5, %s12967_s25 }
 0x2ca   : > { %5299 = vrot.lane.b32.xlu1 %v13887_v59, %s12968_s30 }
 0x2cb   : > { %5301 = vrot.lane.b32.xlu0 %v13889_v63, %s12968_s30 }
 0x2ce   : > { %5297 = vrot.lane.b32.xlu1 %v15901_v5, %s12968_s30 }
 0x2cf   : > { %4253 = vrot.lane.b32.xlu0 %v13883_v54, %s12967_s25  ;;  %s12973_s25 = smov 25  }
 0x2d2   : > { %4399 = vrot.lane.b32.xlu1 %v13887_v59, %s12969_s20 }
 0x2d3   : > { %5449 = vrot.lane.b32.xlu0 %v13887_v59, %s12970_s26 }
 0x2d6   : > { %4397 = vrot.lane.b32.xlu1 %v15901_v5, %s12969_s20 }
 0x2d7   : > { %4401 = vrot.lane.b32.xlu0 %v13889_v63, %s12969_s20 }
 0x2da   : > { %5451 = vrot.lane.b32.xlu1 %v13889_v63, %s12970_s26 }
 0x2db   : > { %5447 = vrot.lane.b32.xlu0 %v15901_v5, %s12970_s26 }
 0x2de   : > { %4403 = vrot.lane.b32.xlu1 %v13883_v54, %s12969_s20  ;;  %s12974_s20 = smov 49  }
 0x2df   : > { %5599 = vrot.lane.b32.xlu0 %v13887_v59, %s12971_s23 }
 0x2e2   : > { %5601 = vrot.lane.b32.xlu1 %v13889_v63, %s12971_s23 }
 0x2e3   : > { %5597 = vrot.lane.b32.xlu0 %v15901_v5, %s12971_s23 }
 0x2e6   : > { %4549 = vrot.lane.b32.xlu1 %v13887_v59, %s12972_s11 }
 0x2e7   : > { %4551 = vrot.lane.b32.xlu0 %v13889_v63, %s12972_s11 }
 0x2ea   : > { %4547 = vrot.lane.b32.xlu1 %v15901_v5, %s12972_s11 }
 0x2eb   : > { %5749 = vrot.lane.b32.xlu0 %v13887_v59, %s12973_s25 }
 0x2ee   : > { %5751 = vrot.lane.b32.xlu1 %v13889_v63, %s12973_s25 }
 0x2ef   : > { %5747 = vrot.lane.b32.xlu0 %v15901_v5, %s12973_s25 }
 0x2f2   : > { %4553 = vrot.lane.b32.xlu1 %v13883_v54, %s12972_s11  ;;  %s12976_s11 = smov 23  }
 0x2f3   : > { %4699 = vrot.lane.b32.xlu0 %v13887_v59, %s12974_s20 }
 0x2f6   : > { %5899 = vrot.lane.b32.xlu1 %v13887_v59, %s12975_s24 }
 0x2f7   : > { %4697 = vrot.lane.b32.xlu0 %v15901_v5, %s12974_s20 }
 0x2fa   : > { %4701 = vrot.lane.b32.xlu1 %v13889_v63, %s12974_s20 }
 0x2fb   : > { %5901 = vrot.lane.b32.xlu0 %v13889_v63, %s12975_s24 }
 0x2fe   : > { %5897 = vrot.lane.b32.xlu1 %v15901_v5, %s12975_s24 }
 0x2ff   : > { %4703 = vrot.lane.b32.xlu0 %v13883_v54, %s12974_s20  ;;  %s12977_s20 = smov 48  }
 0x300   : > { %v3378_v3 = vpop.permute.xlu1 %3377 }
 0x301   : > { %v3380_v16 = vpop.permute.xlu0 %3379 }
 0x302   : > { %6049 = vrot.lane.b32.xlu1 %v13887_v59, %s12976_s11  ;;  %v3385_v18 = vsel %vm3383_vm0, %v3378_v3, %v3380_v16 }
 0x303   : > { %6051 = vrot.lane.b32.xlu0 %v13889_v63, %s12976_s11  ;;  %3397 = vmatprep.subr.bf16.mxu1 %v3385_v18 }
 0x304   : > { %v3376_v12 = vpop.permute.xlu1 %3375 }
 0x305   : > { %v3384_v15 = vsel %vm3383_vm0, %v3376_v12, %v3378_v3  ;;  %v3382_v55 = vpop.permute.xlu0 %3381 }
 0x306   : > { %6047 = vrot.lane.b32.xlu1 %v15901_v5, %s12976_s11  ;;  %3398 = vmatpush1.bf16.msra.mxu1 %v3384_v15  ;;  %v3386_v22 = vsel %vm3383_vm0, %v3380_v16, %v3382_v55  ;;  %vm3955_vm0 = vcmask 580608  }
 0x307   : > { %4849 = vrot.lane.b32.xlu0 %v13887_v59, %s12977_s20  ;;  %11755 = vmatprep.subr.bf16.mxu1 %v3386_v22 }
 0x308   : > { %v3512_v58 = vpop.permute.xlu1 %3511 }
 0x309   : > { %v3514_v23 = vpop.permute.xlu0 %3513  ;;  %10925 = vmatmul.mubr.msk.bf16.vlgmr.msra.gmra.mrb[100].mxu1 %vm3390_vm2, %v12819_v21 }
 0x30a   : > { %4851 = vrot.lane.b32.xlu1 %v13889_v63, %s12977_s20  ;;  %11756 = vmatpush3.bf16.msra.mxu1 %v3386_v22  ;;  %v3519_v24 = vsel %vm3517_vm3, %v3512_v58, %v3514_v23  ;;  %v12829_v22 = vld [vmem:[%s15869_s3 + $0xd8] sm:$0xff]  }
 0x30b   : > { %4847 = vrot.lane.b32.xlu0 %v15901_v5, %s12977_s20  ;;  %3530 = vmatprep.subr.bf16.mxu1 %v3519_v24 }
 0x30c   : > { %v3510_v14 = vpop.permute.xlu1 %3509  ;;  %3439 = vmatprep.mubr.bf16.mxu1 %v15901_v5 }
 0x30d   : > { %v3516_v62 = vpop.permute.xlu0 %3515  ;;  %v3518_v11 = vsel %vm3517_vm3, %v3510_v14, %v3512_v58 }
 0x30e   : > { %6199 = vrot.lane.b32.xlu1 %v13887_v59, %s12978_s17  ;;  %v3520_v32 = vsel %vm3517_vm3, %v3514_v23, %v3516_v62  ;;  %vm15899_vm3 = vcmask 211968  }
 0x30f   : > { %6201 = vrot.lane.b32.xlu0 %v13889_v63, %s12978_s17 }
 0x310   : > { %v3650_v27 = vpop.permute.xlu1 %3649 }
 0x311   : > { %v3652_v25 = vpop.permute.xlu0 %3651  ;;  %10926 = vmatmul.mubr.msk.bf16.gmra.mrb[104].mxu1 %vm3390_vm2, %v12820_v4 }
 0x312   : > { %6197 = vrot.lane.b32.xlu1 %v15901_v5, %s12978_s17  ;;  %11757 = vmatprep.mubr.msk.bf16.mxu1 %vm3390_vm2, %v12819_v21  ;;  %v3657_v13 = vsel %vm3655_vm13, %v3650_v27, %v3652_v25  ;;  %v12828_v21 = vld [vmem:[%s15869_s3 + $0x30] sm:$0xff]  }
 0x313   : > { %4853 = vrot.lane.b32.xlu0 %v13883_v54, %s12977_s20 }
 0x314   : > { %v3648_v7 = vpop.permute.xlu1 %3647 }
 0x315   : > { %v3654_v30 = vpop.permute.xlu0 %3653  ;;  %v3656_v47 = vsel %vm3655_vm13, %v3648_v7, %v3650_v27  ;;  %v12831_v7 = vld [vmem:[%s15869_s3 + $0xe0] sm:$0xff]  }
 0x316   : > { %4999 = vrot.lane.b32.xlu1 %v13887_v59, %s12979_s18  ;;  %v3658_v26 = vsel %vm3655_vm13, %v3652_v25, %v3654_v30  ;;  %v12830_v25 = vld [vmem:[%s15869_s3 + $0x38] sm:$0xff]   ;;  %vm15894_vm13 = vcmask 203776  }
 0x317   : > { %6349 = vrot.lane.b32.xlu0 %v13887_v59, %s12980_s19 }
 0x318   : > { %v13997_v28 = vpop.permute.xlu1 %3799 }
 0x319   : > { %v14000_v31 = vpop.permute.xlu0 %3801  ;;  %11758 = vmatmul.mubr.msk.bf16.vlgmr.msra.gmra.mrb[108].mxu1 %vm3390_vm2, %v12820_v4 }
 0x31a   : > { %3531 = vmatpush1.bf16.msra.mxu1 %v3518_v11  ;;  %4997 = vrot.lane.b32.xlu1 %v15901_v5, %s12979_s18  ;;  %v3807_v38 = vsel %vm3805_vm15, %v13997_v28, %v14000_v31 }
 0x31b   : > { %11761 = vmatprep.subr.bf16.mxu1 %v3520_v32  ;;  %5001 = vrot.lane.b32.xlu0 %v13889_v63, %s12979_s18 }
 0x31c   : > { %v14006_v33 = vpop.permute.xlu1 %3797  ;;  %3562 = vmatprep.mubr.bf16.mxu1 %v15901_v5 }
 0x31d   : > { %v14009_v19 = vpop.permute.xlu0 %3803  ;;  %v3806_v3 = vsel %vm3805_vm15, %v14006_v33, %v13997_v28  ;;  %v12832_v33 = vld [vmem:[%s15869_s3 + $0xe8] sm:$0xff]  }
 0x31e   : > { %6351 = vrot.lane.b32.xlu1 %v13889_v63, %s12980_s19  ;;  %v3808_v18 = vsel %vm3805_vm15, %v14000_v31, %v14009_v19  ;;  %vm4105_vm15 = vcmask 572416  }
 0x31f   : > { %6347 = vrot.lane.b32.xlu0 %v15901_v5, %s12980_s19 }
 0x320   : > { %v14018_v20 = vpop.permute.xlu1 %3949 }
 0x321   : > { %v14020_v29 = vpop.permute.xlu0 %3951  ;;  %10931 = vmatmul.mubr.msk.bf16.vlgmr.msra.gmra.mrb[100].mxu1 %vm3390_vm2, %v12821_v17 }
 0x322   : > { %11762 = vmatpush3.bf16.msra.mxu1 %v3520_v32  ;;  %5003 = vrot.lane.b32.xlu1 %v13883_v54, %s12979_s18  ;;  %s12982_s18 = smov 2   ;;  %v3957_v14 = vsel %vm3955_vm0, %v14018_v20, %v14020_v29 }
 0x323   : > { %3668 = vmatprep.subr.bf16.mxu1 %v3657_v13  ;;  %6499 = vrot.lane.b32.xlu0 %v13887_v59, %s12981_s15 }
 0x324   : > { %v14027_v37 = vpop.permute.xlu1 %3947  ;;  %3572 = vmatprep.mubr.bf16.mxu1 %v15901_v5 }
 0x325   : > { %v14030_v39 = vpop.permute.xlu0 %3953 }
 0x326   : > { %6501 = vrot.lane.b32.xlu1 %v13889_v63, %s12981_s15 }
 0x327   : > { %6497 = vrot.lane.b32.xlu0 %v15901_v5, %s12981_s15 }
 0x328   : > { %v14039_v8 = vpop.permute.xlu1 %4099 }
 0x329   : > { %v14041_v41 = vpop.permute.xlu0 %4101  ;;  %10932 = vmatmul.mubr.msk.bf16.gmra.mrb[104].mxu1 %vm3390_vm2, %v12822_v40 }
 0x32a   : > { %5153 = vrot.lane.b32.xlu1 %v13883_v54, %s12966_s16  ;;  %11763 = vmatprep.mubr.msk.bf16.mxu1 %vm3390_vm2, %v12821_v17  ;;  %v3956_v17 = vsel %vm3955_vm0, %v14027_v37, %v14018_v20  ;;  %s12991_s16 = smov 58  }
 0x32b   : > { %6649 = vrot.lane.b32.xlu0 %v13887_v59, %s12982_s18 }
 0x32c   : > { %v14049_v42 = vpop.permute.xlu1 %4097 }
 0x32d   : > { %v14051_v34 = vpop.permute.xlu0 %4103 }
 0x32e   : > { %6651 = vrot.lane.b32.xlu1 %v13889_v63, %s12982_s18 }
 0x32f   : > { %6647 = vrot.lane.b32.xlu0 %v15901_v5, %s12982_s18 }
 0x330   : > { %v5150_v36 = vpop.permute.xlu1 %5149 }
 0x331   : > { %v14058_v10 = vpop.permute.xlu0 %5151  ;;  %11764 = vmatmul.mubr.msk.bf16.vlgmr.msra.gmra.mrb[108].mxu1 %vm3390_vm2, %v12822_v40 }
 0x332   : > { %3669 = vmatpush1.bf16.msra.mxu1 %v3656_v47  ;;  %5303 = vrot.lane.b32.xlu1 %v13883_v54, %s12968_s30  ;;  %v5157_v49 = vsel %vm5155_vm14, %v5150_v36, %v14058_v10  ;;  %v12833_v47 = vld [vmem:[%s15869_s3 + $0x40] sm:$0xff]   ;;  %s15947_s30 = smov 78  }
 0x333   : > { %11767 = vmatprep.subr.bf16.mxu1 %v3658_v26  ;;  %6799 = vrot.lane.b32.xlu0 %v13887_v59, %s12983_s14 }
 0x334   : > { %5168 = vmatprep.subr.bf16.mxu0 %v5157_v49  ;;  %v5148_v51 = vpop.permute.xlu1 %5147  ;;  %3700 = vmatprep.mubr.bf16.mxu1 %v15901_v5 }
 0x335   : > { %v5156_v35 = vsel %vm5155_vm14, %v5148_v51, %v5150_v36  ;;  %v14070_v52 = vpop.permute.xlu0 %4249  ;;  %v3958_v36 = vsel %vm3955_vm0, %v14020_v29, %v14030_v39  ;;  %v12834_v29 = vld [vmem:[%s15869_s3 + $0xf0] sm:$0xff]   ;;  %v4107_v51 = vsel %vm4105_vm15, %v14039_v8, %v14041_v41  ;;  %vm15895_vm0 = vcmask 195584  }
 0x336   : > { %6801 = vrot.lane.b32.xlu1 %v13889_v63, %s12983_s14  ;;  %5169 = vmatpush1.bf16.msra.mxu0 %v5156_v35 }
 0x337   : > { %6797 = vrot.lane.b32.xlu0 %v15901_v5, %s12983_s14 }
 0x338   : > { %v14082_v50 = vpop.permute.xlu1 %4251 }
 0x339   : > { %v14084_v43 = vpop.permute.xlu0 %4247  ;;  %10941 = vmatmul.mubr.msk.bf16.vlgmr.msra.gmra.mrb[100].mxu1 %vm3390_vm2, %v12823_v45  ;;  %11041 = vmatmul.mubr.msk.bf16.vlgmr.msra.gmra.mrb[4].mxu0 %vm3390_vm2, %v12824_v56  ;;  %v12835_v56 = vld [vmem:[%s15869_s3 + $0x48] sm:$0xff]  }
 0x33a   : > { %11768 = vmatpush3.bf16.msra.mxu1 %v3658_v26  ;;  %5453 = vrot.lane.b32.xlu1 %v13883_v54, %s12970_s26  ;;  %s12992_s26 = smov 57  }
 0x33b   : > { %3818 = vmatprep.subr.bf16.mxu1 %v3807_v38  ;;  %5603 = vrot.lane.b32.xlu0 %v13883_v54, %s12971_s23  ;;  %s12984_s23 = smov 107   ;;  %v14269_v38 = vld [vmem:[%s15869_s3 + $0xf8] sm:$0xff]  }
 0x33c   : > { %v5300_v44 = vpop.permute.xlu1 %5299  ;;  %3710 = vmatprep.mubr.bf16.mxu1 %v15901_v5  ;;  %5210 = vmatprep.mubr.bf16.mxu0 %v15901_v5 }
 0x33d   : > { %v14097_v46 = vpop.permute.xlu0 %5301 }
 0x33e   : > { %5753 = vrot.lane.b32.xlu1 %v13883_v54, %s12973_s25  ;;  %v5307_v48 = vsel %vm5305_vm11, %v5300_v44, %v14097_v46  ;;  %s15949_s25 = smov 77  }
 0x33f   : > { %7092 = vrot.lane.b32.xlu0 %v13889_v63, %s12934_s27  ;;  %5318 = vmatprep.subr.bf16.mxu0 %v5307_v48 }
 0x340   : > { %v5298_v1 = vpop.permute.xlu1 %5297 }
 0x341   : > { %v5306_v2 = vsel %vm5305_vm11, %v5298_v1, %v5300_v44  ;;  %v14112_v6 = vpop.permute.xlu0 %4253  ;;  %10942 = vmatmul.mubr.msk.bf16.gmra.mrb[104].mxu1 %vm3390_vm2, %v12825_v60  ;;  %11042 = vmatmul.mubr.msk.bf16.gmra.mrb[8].mxu0 %vm3390_vm2, %v12826_v0 }
 0x342   : > { %7094 = vrot.lane.b32.xlu1 %v13883_v54, %s12934_s27  ;;  %5319 = vmatpush1.bf16.msra.mxu0 %v5306_v2  ;;  %v14293_v2 = vld [vmem:[%s15869_s3 + $0x100] sm:$0xff]  }
 0x343   : > { %7090 = vrot.lane.b32.xlu0 %v13887_v59, %s12934_s27  ;;  %11769 = vmatprep.mubr.msk.bf16.mxu1 %vm3390_vm2, %v12823_v45 }
 0x344   : > { %v14121_v9 = vpop.permute.xlu1 %4399  ;;  %5350 = vmatprep.mubr.bf16.mxu0 %v15901_v5 }
 0x345   : > { %v5450_v57 = vpop.permute.xlu0 %5449 }
 0x346   : > { %5903 = vrot.lane.b32.xlu1 %v13883_v54, %s12975_s24  ;;  %s12985_s24 = smov 106  }
 0x347   : > { %7241 = vrot.lane.b32.xlu0 %v13889_v63, %s12935_s28 }
 0x348   : > { %v14131_v53 = vpop.permute.xlu1 %4397 }
 0x349   : > { %v14136_v16 = vpop.permute.xlu0 %4401  ;;  %11770 = vmatmul.mubr.msk.bf16.vlgmr.msra.gmra.mrb[108].mxu1 %vm3390_vm2, %v12825_v60  ;;  %11051 = vmatmul.mubr.msk.bf16.vlgmr.msra.gmra.mrb[4].mxu0 %vm3390_vm2, %v12827_v61  ;;  %v4106_v61 = vsel %vm4105_vm15, %v14049_v42, %v14039_v8 }
 0x34a   : > { %3819 = vmatpush1.bf16.msra.mxu1 %v3806_v3  ;;  %7243 = vrot.lane.b32.xlu1 %v13883_v54, %s12935_s28 }
 0x34b   : > { %11773 = vmatprep.subr.bf16.mxu1 %v3808_v18  ;;  %7239 = vrot.lane.b32.xlu0 %v13887_v59, %s12935_s28 }
 0x34c   : > { %v14147_v12 = vpop.permute.xlu1 %5451  ;;  %3850 = vmatprep.mubr.bf16.mxu1 %v15901_v5  ;;  %5360 = vmatprep.mubr.bf16.mxu0 %v15901_v5 }
 0x34d   : > { %v5448_v15 = vpop.permute.xlu0 %5447  ;;  %v5457_v55 = vsel %vm5455_vm6, %v5450_v57, %v14147_v12 }
 0x34e   : > { %v5456_v58 = vsel %vm5455_vm6, %v5448_v15, %v5450_v57  ;;  %6053 = vrot.lane.b32.xlu1 %v13883_v54, %s12976_s11  ;;  %5468 = vmatprep.subr.bf16.mxu0 %v5457_v55  ;;  %v4108_v15 = vsel %vm4105_vm15, %v14041_v41, %v14051_v34  ;;  %v12838_v41 = vld [vmem:[%s15869_s3 + $0x50] sm:$0xff]   ;;  %v14329_v34 = vld [vmem:[%s15869_s3 + $0x108] sm:$0xff]   ;;  %vm4255_vm15 = vcmask 564224  }
 0x34f   : > { %6203 = vrot.lane.b32.xlu0 %v13883_v54, %s12978_s17  ;;  %5469 = vmatpush1.bf16.msra.mxu0 %v5456_v58  ;;  %v4257_v58 = vsel %vm4255_vm15, %v14070_v52, %v14082_v50 }
 0x350   : > { %v14164_v23 = vpop.permute.xlu1 %4403 }
 0x351   : > { %v5600_v24 = vpop.permute.xlu0 %5599  ;;  %10951 = vmatmul.mubr.msk.bf16.vlgmr.msra.gmra.mrb[100].mxu1 %vm3390_vm2, %v12828_v21  ;;  %11052 = vmatmul.mubr.msk.bf16.gmra.mrb[8].mxu0 %vm3390_vm2, %v12829_v22 }
 0x352   : > { %11774 = vmatpush3.bf16.msra.mxu1 %v3808_v18  ;;  %7390 = vrot.lane.b32.xlu1 %v13889_v63, %s12936_s29 }
 0x353   : > { %3968 = vmatprep.subr.bf16.mxu1 %v3957_v14  ;;  %7392 = vrot.lane.b32.xlu0 %v13883_v54, %s12936_s29 }
 0x354   : > { %v14175_v62 = vpop.permute.xlu1 %5601  ;;  %3860 = vmatprep.mubr.bf16.mxu1 %v15901_v5  ;;  %5500 = vmatprep.mubr.bf16.mxu0 %v15901_v5 }
 0x355   : > { %v5598_v4 = vpop.permute.xlu0 %5597  ;;  %v5607_v27 = vsel %vm15899_vm3, %v5600_v24, %v14175_v62 }
 0x356   : > { %7388 = vrot.lane.b32.xlu1 %v13887_v59, %s12936_s29  ;;  %5618 = vmatprep.subr.bf16.mxu0 %v5607_v27  ;;  %v5606_v28 = vsel %vm15899_vm3, %v5598_v4, %v5600_v24  ;;  %v12840_v4 = vld [vmem:[%s15869_s3 + $0x58] sm:$0xff]   ;;  %v14357_v27 = vld [vmem:[%s15869_s3 + $0x110] sm:$0xff]   ;;  %vm4705_vm3 = vcmask 400384  }
 0x357   : > { %6353 = vrot.lane.b32.xlu0 %v13883_v54, %s12980_s19  ;;  %s15960_s19 = smov 56  }
 0x358   : > { %v14191_v30 = vpop.permute.xlu1 %4549 }
 0x359   : > { %v14194_v11 = vpop.permute.xlu0 %4551  ;;  %10952 = vmatmul.mubr.msk.bf16.gmra.mrb[104].mxu1 %vm3390_vm2, %v12830_v25  ;;  %11061 = vmatmul.mubr.msk.bf16.vlgmr.msra.gmra.mrb[4].mxu0 %vm3390_vm2, %v12831_v7 }
 0x35a   : > { %5619 = vmatpush1.bf16.msra.mxu0 %v5606_v28  ;;  %7539 = vrot.lane.b32.xlu1 %v13889_v63, %s12984_s23 }
 0x35b   : > { %7541 = vrot.lane.b32.xlu0 %v13883_v54, %s12984_s23  ;;  %11775 = vmatprep.mubr.msk.bf16.mxu1 %vm3390_vm2, %v12828_v21 }
 0x35c   : > { %v14203_v31 = vpop.permute.xlu1 %4547  ;;  %5510 = vmatprep.mubr.bf16.mxu0 %v15901_v5 }
 0x35d   : > { %v5750_v32 = vpop.permute.xlu0 %5749 }
 0x35e   : > { %7537 = vrot.lane.b32.xlu1 %v13887_v59, %s12984_s23 }
 0x35f   : > { %6503 = vrot.lane.b32.xlu0 %v13883_v54, %s12981_s15  ;;  %s12988_s15 = smov 82  }
 0x360   : > { %v14213_v19 = vpop.permute.xlu1 %5751 }
 0x361   : > { %v5748_v13 = vpop.permute.xlu0 %5747  ;;  %11776 = vmatmul.mubr.msk.bf16.vlgmr.msra.gmra.mrb[108].mxu1 %vm3390_vm2, %v12830_v25  ;;  %11062 = vmatmul.mubr.msk.bf16.gmra.mrb[8].mxu0 %vm3390_vm2, %v12832_v33  ;;  %v5757_v40 = vsel %vm15894_vm13, %v5750_v32, %v14213_v19 }
 0x362   : > { %3969 = vmatpush1.bf16.msra.mxu1 %v3956_v17  ;;  %7689 = vrot.lane.b32.xlu1 %v13889_v63, %s12985_s24  ;;  %v5756_v26 = vsel %vm15894_vm13, %v5748_v13, %v5750_v32  ;;  %vm15896_vm13 = vcmask 187392   ;;  %v14386_v13 = vld [vmem:[%s15869_s3 + $0x118] sm:$0xff]  }
 0x363   : > { %11779 = vmatprep.subr.bf16.mxu1 %v3958_v36  ;;  %5768 = vmatprep.subr.bf16.mxu0 %v5757_v40 }
 0x364   : > { %7691 = vrot.lane.b32.xlu0 %v13883_v54, %s12985_s24  ;;  %v14229_v20 = vpop.permute.xlu1 %4553  ;;  %4000 = vmatprep.mubr.bf16.mxu1 %v15901_v5 }
 0x365   : > { %v14232_v37 = vpop.permute.xlu0 %4699  ;;  %5650 = vmatprep.mubr.bf16.mxu0 %v15901_v5 }
 0x366   : > { %7687 = vrot.lane.b32.xlu1 %v13887_v59, %s12985_s24 }
 0x368   : > { %6653 = vrot.lane.b32.xlu0 %v13883_v54, %s12982_s18  ;;  %v5900_v39 = vpop.permute.xlu1 %5899  ;;  %s12986_s18 = smov 105  }
 0x369   : > { %v14246_v49 = vpop.permute.xlu0 %4697  ;;  %10961 = vmatmul.mubr.msk.bf16.vlgmr.msra.gmra.mrb[100].mxu1 %vm3390_vm2, %v12833_v47  ;;  %11071 = vmatmul.mubr.msk.bf16.vlgmr.msra.gmra.mrb[4].mxu0 %vm3390_vm2, %v12834_v29  ;;  %v4258_v29 = vsel %vm4255_vm15, %v14082_v50, %v14112_v6  ;;  %v12843_v50 = vld [vmem:[%s15869_s3 + $0x60] sm:$0xff]  }
 0x36a   : > { %11780 = vmatpush3.bf16.msra.mxu1 %v3958_v36  ;;  %5769 = vmatpush1.bf16.msra.mxu0 %v5756_v26  ;;  %v4256_v36 = vsel %vm4255_vm15, %v14084_v43, %v14070_v52  ;;  %v14419_v6 = vld [vmem:[%s15869_s3 + $0x120] sm:$0xff]   ;;  %vm4405_vm15 = vcmask 416768  }
 0x36b   : > { %6803 = vrot.lane.b32.xlu1 %v13883_v54, %s12983_s14  ;;  %4118 = vmatprep.subr.bf16.mxu1 %v4107_v51 }
 0x36c   : > { %7839 = vrot.lane.b32.xlu0 %v13889_v63, %s12986_s18  ;;  %v14257_v35 = vpop.permute.xlu1 %4701  ;;  %4010 = vmatprep.mubr.bf16.mxu1 %v15901_v5 }
 0x36d   : > { %v14260_v45 = vpop.permute.xlu0 %5901  ;;  %5660 = vmatprep.mubr.bf16.mxu0 %v15901_v5 }
 0x36e   : > { %v5907_v44 = vsel %vm15895_vm0, %v5900_v39, %v14260_v45 }
 0x36f   : > { %7841 = vrot.lane.b32.xlu1 %v13883_v54, %s12986_s18  ;;  %5918 = vmatprep.subr.bf16.mxu0 %v5907_v44 }
 0x370   : > { %7837 = vrot.lane.b32.xlu0 %v13887_v59, %s12986_s18  ;;  %v5898_v60 = vpop.permute.xlu1 %5897 }
 0x371   : > { %v14277_v0 = vpop.permute.xlu0 %4703  ;;  %10962 = vmatmul.mubr.msk.bf16.gmra.mrb[104].mxu1 %vm3390_vm2, %v12835_v56  ;;  %11072 = vmatmul.mubr.msk.bf16.gmra.mrb[8].mxu0 %vm3390_vm2, %v14269_v38  ;;  %v5906_v3 = vsel %vm15895_vm0, %v5898_v60, %v5900_v39  ;;  %vm15897_vm0 = vcmask 179200  }
 0x372   : > { %11781 = vmatprep.mubr.msk.bf16.mxu1 %vm3390_vm2, %v12833_v47  ;;  %5800 = vmatprep.mubr.bf16.mxu0 %v15901_v5 }
 0x373   : > { %7989 = vrot.lane.b32.xlu1 %v13889_v63, %s12938_s7 }
 0x374   : > { %7991 = vrot.lane.b32.xlu0 %v13883_v54, %s12938_s7  ;;  %v6050_v48 = vpop.permute.xlu1 %6049 }
 0x375   : > { %v14288_v1 = vpop.permute.xlu0 %6051 }
 0x376   : > { %v6057_v8 = vsel %vm15896_vm13, %v6050_v48, %v14288_v1 }
 0x377   : > { %7987 = vrot.lane.b32.xlu1 %v13887_v59, %s12938_s7 }
 0x378   : > { %7096 = vrot.lane.b32.xlu0 %v15901_v5, %s12934_s27  ;;  %v6048_v57 = vpop.permute.xlu1 %6047 }
 0x379   : > { %v14303_v18 = vpop.permute.xlu0 %4849  ;;  %11782 = vmatmul.mubr.msk.bf16.vlgmr.msra.gmra.mrb[108].mxu1 %vm3390_vm2, %v12835_v56  ;;  %11081 = vmatmul.mubr.msk.bf16.vlgmr.msra.gmra.mrb[4].mxu0 %vm3390_vm2, %v14293_v2  ;;  %v6056_v7 = vsel %vm15896_vm13, %v6048_v57, %v6050_v48  ;;  %vm6355_vm13 = vcmask 171008   ;;  %v4407_v56 = vsel %vm4405_vm15, %v14121_v9, %v14136_v16  ;;  %v12845_v57 = vld [vmem:[%s15869_s3 + $0x68] sm:$0xff]  }
 0x37a   : > { %4119 = vmatpush1.bf16.msra.mxu1 %v4106_v61  ;;  %5919 = vmatpush1.bf16.msra.mxu0 %v5906_v3  ;;  %v14455_v61 = vld [vmem:[%s15869_s3 + $0x128] sm:$0xff]  }
 0x37b   : > { %8138 = vrot.lane.b32.xlu1 %v13889_v63, %s12939_s8  ;;  %11785 = vmatprep.subr.bf16.mxu1 %v4108_v15 }
 0x37c   : > { %6068 = vmatprep.subr.bf16.mxu0 %v6057_v8  ;;  %8140 = vrot.lane.b32.xlu0 %v13883_v54, %s12939_s8  ;;  %v14317_v42 = vpop.permute.xlu1 %4851 }
 0x37d   : > { %v14319_v55 = vpop.permute.xlu0 %4847  ;;  %4150 = vmatprep.mubr.bf16.mxu1 %v15901_v5  ;;  %5810 = vmatprep.mubr.bf16.mxu0 %v15901_v5 }
 0x37f   : > { %8136 = vrot.lane.b32.xlu1 %v13887_v59, %s12939_s8 }
 0x380   : > { %7245 = vrot.lane.b32.xlu0 %v15901_v5, %s12935_s28  ;;  %v6200_v21 = vpop.permute.xlu1 %6199  ;;  %s12989_s28 = smov 81  }
 0x381   : > { %v14335_v22 = vpop.permute.xlu0 %6201  ;;  %10971 = vmatmul.mubr.msk.bf16.vlgmr.msra.gmra.mrb[100].mxu1 %vm3390_vm2, %v12838_v41  ;;  %11082 = vmatmul.mubr.msk.bf16.gmra.mrb[8].mxu0 %vm3390_vm2, %v14329_v34 }
 0x382   : > { %11786 = vmatpush3.bf16.msra.mxu1 %v4108_v15  ;;  %4160 = vmatprep.mubr.bf16.mxu1 %v15901_v5  ;;  %v6207_v32 = vsel %vm15897_vm0, %v6200_v21, %v14335_v22 }
 0x383   : > { %7394 = vrot.lane.b32.xlu1 %v15901_v5, %s12936_s29  ;;  %4268 = vmatprep.subr.bf16.mxu1 %v4257_v58  ;;  %s15971_s29 = smov 53  }
 0x384   : > { %8287 = vrot.lane.b32.xlu0 %v13889_v63, %s12940_s9  ;;  %v6198_v24 = vpop.permute.xlu1 %6197  ;;  %5950 = vmatprep.mubr.bf16.mxu0 %v15901_v5 }
 0x385   : > { %v14349_v14 = vpop.permute.xlu0 %4853  ;;  %v6206_v26 = vsel %vm15897_vm0, %v6198_v24, %v6200_v21  ;;  %v14481_v21 = vld [vmem:[%s15869_s3 + $0x130] sm:$0xff]   ;;  %vm6505_vm0 = vcmask 23552   ;;  %v4406_v24 = vsel %vm4405_vm15, %v14131_v53, %v14121_v9 }
 0x386   : > { %15940 = vst [vmem:[#allocation3_spill] sm:$0xff] %v14481_v21 }
 0x387   : > { %8289 = vrot.lane.b32.xlu1 %v13883_v54, %s12940_s9 }
 0x388   : > { %8285 = vrot.lane.b32.xlu0 %v13887_v59, %s12940_s9  ;;  %v14363_v25 = vpop.permute.xlu1 %4999 }
 0x389   : > { %v14366_v28 = vpop.permute.xlu0 %6349  ;;  %10972 = vmatmul.mubr.msk.bf16.gmra.mrb[104].mxu1 %vm3390_vm2, %v12840_v4  ;;  %11091 = vmatmul.mubr.msk.bf16.vlgmr.msra.gmra.mrb[4].mxu0 %vm3390_vm2, %v14357_v27 }
 0x38a   : > { %6069 = vmatpush1.bf16.msra.mxu0 %v6056_v7  ;;  %11787 = vmatprep.mubr.msk.bf16.mxu1 %vm3390_vm2, %v12838_v41 }
 0x38b   : > { %7543 = vrot.lane.b32.xlu1 %v15901_v5, %s12984_s23  ;;  %6218 = vmatprep.subr.bf16.mxu0 %v6207_v32  ;;  %s12987_s23 = smov 83   ;;  %v4408_v32 = vsel %vm4405_vm15, %v14136_v16, %v14164_v23  ;;  %v12848_v16 = vld [vmem:[%s15869_s3 + $0x70] sm:$0xff]   ;;  %v14521_v23 = vld [vmem:[%s15869_s3 + $0x138] sm:$0xff]   ;;  %vm4555_vm15 = vcmask 408576  }
 0x38c   : > { %8436 = vrot.lane.b32.xlu0 %v13889_v63, %s12942_s10  ;;  %v14378_v33 = vpop.permute.xlu1 %4997  ;;  %5960 = vmatprep.mubr.bf16.mxu0 %v15901_v5  ;;  %15941 = vst [vmem:[#allocation4_spill] sm:$0xff] %v14521_v23 }
 0x38d   : > { %v14381_v17 = vpop.permute.xlu0 %5001 }
 0x38f   : > { %8438 = vrot.lane.b32.xlu1 %v13883_v54, %s12942_s10 }
 0x390   : > { %8434 = vrot.lane.b32.xlu0 %v13887_v59, %s12942_s10  ;;  %v14392_v40 = vpop.permute.xlu1 %6351 }
 0x391   : > { %v6348_v47 = vpop.permute.xlu0 %6347  ;;  %11788 = vmatmul.mubr.msk.bf16.vlgmr.msra.gmra.mrb[108].mxu1 %vm3390_vm2, %v12840_v4  ;;  %11092 = vmatmul.mubr.msk.bf16.gmra.mrb[8].mxu0 %vm3390_vm2, %v14386_v13  ;;  %v6357_v44 = vsel %vm6355_vm13, %v14366_v28, %v14392_v40 }
 0x392   : > { %4269 = vmatpush1.bf16.msra.mxu1 %v4256_v36  ;;  %4300 = vmatprep.mubr.bf16.mxu1 %v15901_v5  ;;  %v6356_v4 = vsel %vm6355_vm13, %v6348_v47, %v14366_v28 }
 0x393   : > { %11791 = vmatprep.subr.bf16.mxu1 %v4258_v29  ;;  %7693 = vrot.lane.b32.xlu1 %v15901_v5, %s12985_s24 }
 0x394   : > { %8585 = vrot.lane.b32.xlu0 %v13889_v63, %s12987_s23  ;;  %v14408_v52 = vpop.permute.xlu1 %5003  ;;  %6100 = vmatprep.mubr.bf16.mxu0 %v15901_v5 }
 0x395   : > { %v14411_v43 = vpop.permute.xlu0 %6499 }
 0x397   : > { %8587 = vrot.lane.b32.xlu1 %v13883_v54, %s12987_s23 }
 0x398   : > { %8583 = vrot.lane.b32.xlu0 %v13887_v59, %s12987_s23  ;;  %v14425_v39 = vpop.permute.xlu1 %6501 }
 0x399   : > { %v14428_v51 = vpop.permute.xlu0 %6497  ;;  %10981 = vmatmul.mubr.msk.bf16.vlgmr.msra.gmra.mrb[100].mxu1 %vm3390_vm2, %v12843_v50  ;;  %11101 = vmatmul.mubr.msk.bf16.vlgmr.msra.gmra.mrb[4].mxu0 %vm3390_vm2, %v14419_v6  ;;  %v6507_v9 = vsel %vm6505_vm0, %v14411_v43, %v14425_v39 }
 0x39a   : > { %11792 = vmatpush3.bf16.msra.mxu1 %v4258_v29  ;;  %6219 = vmatpush1.bf16.msra.mxu0 %v6206_v26  ;;  %v4557_v29 = vsel %vm4555_vm15, %v14191_v30, %v14194_v11 }
 0x39b   : > { %4418 = vmatprep.subr.bf16.mxu1 %v4407_v56  ;;  %7843 = vrot.lane.b32.xlu1 %v15901_v5, %s12986_s18  ;;  %v12850_v56 = vld [vmem:[%s15869_s3 + $0x78] sm:$0xff]   ;;  %s15963_s18 = smov 55  }
 0x39c   : > { %6368 = vmatprep.subr.bf16.mxu0 %v6357_v44  ;;  %7993 = vrot.lane.b32.xlu0 %v15901_v5, %s12938_s7  ;;  %v14443_v60 = vpop.permute.xlu1 %5153  ;;  %v14553_v44 = vld [vmem:[%s15869_s3 + $0x140] sm:$0xff]  }
 0x39d   : > { %v14445_v48 = vpop.permute.xlu0 %6649  ;;  %4310 = vmatprep.mubr.bf16.mxu1 %v15901_v5  ;;  %6110 = vmatprep.mubr.bf16.mxu0 %v15901_v5  ;;  %15943 = vst [vmem:[#allocation6_spill] sm:$0xff] %v14553_v44 }
 0x39f   : > { %8735 = vrot.lane.b32.xlu1 %v13889_v63, %s12988_s15 }
 0x3a0   : > { %8737 = vrot.lane.b32.xlu0 %v13883_v54, %s12988_s15  ;;  %v14461_v3 = vpop.permute.xlu1 %6651 }
 0x3a1   : > { %v14463_v15 = vpop.permute.xlu0 %6647  ;;  %10982 = vmatmul.mubr.msk.bf16.gmra.mrb[104].mxu1 %vm3390_vm2, %v12845_v57  ;;  %11102 = vmatmul.mubr.msk.bf16.gmra.mrb[8].mxu0 %vm3390_vm2, %v14455_v61 }
 0x3a2   : > { %11793 = vmatprep.mubr.msk.bf16.mxu1 %vm3390_vm2, %v12843_v50  ;;  %6250 = vmatprep.mubr.bf16.mxu0 %v15901_v5 }
 0x3a3   : > { %8733 = vrot.lane.b32.xlu1 %v13887_v59, %s12988_s15 }
 0x3a4   : > { %8142 = vrot.lane.b32.xlu0 %v15901_v5, %s12939_s8  ;;  %v14474_v8 = vpop.permute.xlu1 %5303 }
 0x3a5   : > { %v14476_v41 = vpop.permute.xlu0 %6799 }
 0x3a7   : > { %8885 = vrot.lane.b32.xlu1 %v13889_v63, %s12989_s28 }
 0x3a8   : > { %8887 = vrot.lane.b32.xlu0 %v13883_v54, %s12989_s28  ;;  %v14487_v58 = vpop.permute.xlu1 %6801 }
 0x3a9   : > { %v14494_v7 = vpop.permute.xlu0 %6797  ;;  %11794 = vmatmul.mubr.msk.bf16.vlgmr.msra.gmra.mrb[108].mxu1 %vm3390_vm2, %v12845_v57  ;;  %11111 = vmatmul.mubr.msk.bf16.vlgmr.msra.gmra.mrb[4].mxu0 %vm3390_vm2, %v14481_v21  ;;  %v4708_v21 = vsel %vm4705_vm3, %v14257_v35, %v14277_v0  ;;  %v14725_v0 = vld [vmem:[%s15869_s3 + $0x168] sm:$0xff]  }
 0x3aa   : > { %4419 = vmatpush1.bf16.msra.mxu1 %v4406_v24  ;;  %6369 = vmatpush1.bf16.msra.mxu0 %v6356_v4  ;;  %v6506_v24 = vsel %vm6505_vm0, %v14428_v51, %v14411_v43  ;;  %15956 = vst [vmem:[#allocation15_spill] sm:$0xff] %v14725_v0 }
 0x3ab   : > { %11797 = vmatprep.subr.bf16.mxu1 %v4408_v32  ;;  %8883 = vrot.lane.b32.xlu1 %v13887_v59, %s12989_s28 }
 0x3ac   : > { %6518 = vmatprep.subr.bf16.mxu0 %v6507_v9  ;;  %8291 = vrot.lane.b32.xlu0 %v15901_v5, %s12940_s9  ;;  %v14509_v53 = vpop.permute.xlu1 %5453  ;;  %v14585_v9 = vld [vmem:[%s15869_s3 + $0x148] sm:$0xff]  }
 0x3ad   : > { %v14511_v28 = vpop.permute.xlu0 %5603  ;;  %4450 = vmatprep.mubr.bf16.mxu1 %v15901_v5  ;;  %6260 = vmatprep.mubr.bf16.mxu0 %v15901_v5  ;;  %15946 = vst [vmem:[#allocation8_spill] sm:$0xff] %v14585_v9 }
 0x3af   : > { %9035 = vrot.lane.b32.xlu1 %v13889_v63, %s12945_s12 }
 0x3b0   : > { %9037 = vrot.lane.b32.xlu0 %v13883_v54, %s12945_s12  ;;  %v14527_v36 = vpop.permute.xlu1 %5753 }
 0x3b1   : > { %v14529_v47 = vpop.permute.xlu0 %7092  ;;  %10991 = vmatmul.mubr.msk.bf16.vlgmr.msra.gmra.mrb[100].mxu1 %vm3390_vm2, %v12848_v16  ;;  %11112 = vmatmul.mubr.msk.bf16.gmra.mrb[8].mxu0 %vm3390_vm2, %v14521_v23 }
 0x3b2   : > { %11798 = vmatpush3.bf16.msra.mxu1 %v4408_v32  ;;  %4460 = vmatprep.mubr.bf16.mxu1 %v15901_v5  ;;  %v6657_v32 = vsel %vm6655_vm12, %v14445_v48, %v14461_v3 }
 0x3b3   : > { %4568 = vmatprep.subr.bf16.mxu1 %v4557_v29  ;;  %9033 = vrot.lane.b32.xlu1 %v13887_v59, %s12945_s12  ;;  %v4556_v29 = vsel %vm4555_vm15, %v14203_v31, %v14191_v30 }
 0x3b4   : > { %8440 = vrot.lane.b32.xlu0 %v15901_v5, %s12942_s10  ;;  %v14542_v50 = vpop.permute.xlu1 %7094  ;;  %6400 = vmatprep.mubr.bf16.mxu0 %v15901_v5  ;;  %s15944_s10 = smov 79  }
 0x3b5   : > { %15942 = vst [vmem:[#allocation5_spill] sm:$0xff] %v14542_v50  ;;  %v14545_v26 = vpop.permute.xlu0 %7090 }
 0x3b7   : > { %8589 = vrot.lane.b32.xlu1 %v15901_v5, %s12987_s23 }
 0x3b8   : > { %9184 = vrot.lane.b32.xlu0 %v13889_v63, %s15944_s10  ;;  %v14559_v57 = vpop.permute.xlu1 %5903 }
 0x3b9   : > { %v14564_v4 = vpop.permute.xlu0 %7241  ;;  %10992 = vmatmul.mubr.msk.bf16.gmra.mrb[104].mxu1 %vm3390_vm2, %v12850_v56  ;;  %11121 = vmatmul.mubr.msk.bf16.vlgmr.msra.gmra.mrb[4].mxu0 %vm3390_vm2, %v14553_v44 }
 0x3ba   : > { %6519 = vmatpush1.bf16.msra.mxu0 %v6506_v24  ;;  %11799 = vmatprep.mubr.msk.bf16.mxu1 %vm3390_vm2, %v12848_v16 }
 0x3bb   : > { %9186 = vrot.lane.b32.xlu1 %v13883_v54, %s15944_s10  ;;  %6668 = vmatprep.subr.bf16.mxu0 %v6657_v32  ;;  %v4558_v32 = vsel %vm4555_vm15, %v14194_v11, %v14229_v20  ;;  %v14620_v11 = vld [vmem:[%s15869_s3 + $0x150] sm:$0xff]   ;;  %vm6805_vm15 = vcmask 7168  }
 0x3bc   : > { %9182 = vrot.lane.b32.xlu0 %v13887_v59, %s15944_s10  ;;  %v14577_v43 = vpop.permute.xlu1 %7243  ;;  %6410 = vmatprep.mubr.bf16.mxu0 %v15901_v5  ;;  %15948 = vst [vmem:[#allocation9_spill] sm:$0xff] %v14620_v11 }
 0x3bd   : > { %15945 = vst [vmem:[#allocation7_spill] sm:$0xff] %v14577_v43  ;;  %v14580_v51 = vpop.permute.xlu0 %7239 }
 0x3bf   : > { %8739 = vrot.lane.b32.xlu1 %v15901_v5, %s12988_s15 }
 0x3c0   : > { %9333 = vrot.lane.b32.xlu0 %v13889_v63, %s15947_s30  ;;  %v14591_v16 = vpop.permute.xlu1 %6053 }
 0x3c1   : > { %v14596_v24 = vpop.permute.xlu0 %6203  ;;  %11800 = vmatmul.mubr.msk.bf16.vlgmr.msra.gmra.mrb[108].mxu1 %vm3390_vm2, %v12850_v56  ;;  %11122 = vmatmul.mubr.msk.bf16.gmra.mrb[8].mxu0 %vm3390_vm2, %v14585_v9  ;;  %v12853_v56 = vld [vmem:[%s15869_s3 + $0x80] sm:$0xff]  }
 0x3c2   : > { %4569 = vmatpush1.bf16.msra.mxu1 %v4556_v29  ;;  %4600 = vmatprep.mubr.bf16.mxu1 %v15901_v5  ;;  %v6656_v29 = vsel %vm6655_vm12, %v14463_v15, %v14445_v48  ;;  %v6807_v48 = vsel %vm6805_vm15, %v14476_v41, %v14487_v58 }
 0x3c3   : > { %11803 = vmatprep.subr.bf16.mxu1 %v4558_v32  ;;  %9335 = vrot.lane.b32.xlu1 %v13883_v54, %s15947_s30 }
 0x3c4   : > { %9331 = vrot.lane.b32.xlu0 %v13887_v59, %s15947_s30  ;;  %v14609_v30 = vpop.permute.xlu1 %7390  ;;  %6550 = vmatprep.mubr.bf16.mxu0 %v15901_v5 }
 0x3c5   : > { %v14612_v31 = vpop.permute.xlu0 %7392 }
 0x3c7   : > { %8889 = vrot.lane.b32.xlu1 %v15901_v5, %s12989_s28  ;;  %v4707_v5 = vsel %vm4705_vm3, %v14232_v37, %v14257_v35  ;;  %v12858_v35 = vld [vmem:[%s15869_s3 + $0x90] sm:$0xff]   ;;  %s15966_s28 = smov 54  }
 0x3c8   : > { %9482 = vrot.lane.b32.xlu0 %v13889_v63, %s15949_s25  ;;  %v14626_v20 = vpop.permute.xlu1 %7388 }
 0x3c9   : > { %v6354_v9 = vpop.permute.xlu0 %6353  ;;  %11001 = vmatmul.mubr.msk.bf16.vlgmr.msra.gmra.mrb[100].mxu1 %vm3390_vm2, %v12853_v56  ;;  %11131 = vmatmul.mubr.msk.bf16.vlgmr.msra.gmra.mrb[4].mxu0 %vm3390_vm2, %v14620_v11 }
 0x3ca   : > { %11804 = vmatpush3.bf16.msra.mxu1 %v4558_v32  ;;  %6669 = vmatpush1.bf16.msra.mxu0 %v6656_v29  ;;  %v14639_v44 = vsel %vm6355_vm13, %v14392_v40, %v6354_v9  ;;  %v15951_v29 = vmov 0   ;;  %v14660_v40 = vld [vmem:[%s15869_s3 + $0x158] sm:$0xff]   ;;  %vm7545_vm13 = vcmask 875520  }
 0x3cb   : > { %15950 = vst [vmem:[#allocation10_spill] sm:$0xff] %v14639_v44  ;;  %4718 = vmatprep.subr.bf16.mxu1 %v4707_v5  ;;  %9484 = vrot.lane.b32.xlu1 %v13883_v54, %s15949_s25  ;;  %v12855_v5 = vld [vmem:[%s15869_s3 + $0x88] sm:$0xff]   ;;  %15952 = vst [vmem:[#allocation11_spill] sm:$0xff] %v14660_v40 }
 0x3cc   : > { %6818 = vmatprep.subr.bf16.mxu0 %v6807_v48  ;;  %9480 = vrot.lane.b32.xlu0 %v13887_v59, %s15949_s25  ;;  %v14648_v15 = vpop.permute.xlu1 %7539 }
 0x3cd   : > { %v14650_v32 = vpop.permute.xlu0 %7541  ;;  %4610 = vmatprep.mubr.bf16.mxu1 %v15951_v29  ;;  %6560 = vmatprep.mubr.bf16.mxu0 %v15951_v29 }
 0x3cf   : > { %9039 = vrot.lane.b32.xlu1 %v15951_v29, %s12945_s12  ;;  %s12990_s12 = smov 59  }
 0x3d0   : > { %9188 = vrot.lane.b32.xlu0 %v15951_v29, %s15944_s10  ;;  %v14666_v9 = vpop.permute.xlu1 %7537 }
 0x3d1   : > { %v6504_v48 = vpop.permute.xlu0 %6503  ;;  %11002 = vmatmul.mubr.msk.bf16.gmra.mrb[104].mxu1 %vm3390_vm2, %v12855_v5  ;;  %11132 = vmatmul.mubr.msk.bf16.gmra.mrb[8].mxu0 %vm3390_vm2, %v14660_v40  ;;  %v14686_v40 = vld [vmem:[%s15869_s3 + $0x160] sm:$0xff]  }
 0x3d2   : > { %11805 = vmatprep.mubr.msk.bf16.mxu1 %vm3390_vm2, %v12853_v56  ;;  %6700 = vmatprep.mubr.bf16.mxu0 %v15951_v29  ;;  %v14675_v11 = vsel %vm6505_vm0, %v14425_v39, %v6504_v48  ;;  %15954 = vst [vmem:[#allocation13_spill] sm:$0xff] %v14686_v40  ;;  %v4706_v48 = vsel %vm4705_vm3, %v14246_v49, %v14232_v37  ;;  %vm5005_vm3 = vcmask 384000   ;;  %vm7695_vm0 = vcmask 867328  }
 0x3d3   : > { %15953 = vst [vmem:[#allocation12_spill] sm:$0xff] %v14675_v11  ;;  %9631 = vrot.lane.b32.xlu1 %v13889_v63, %s12990_s12  ;;  %v6806_v11 = vsel %vm6805_vm15, %v14494_v7, %v14476_v41 }
 0x3d4   : > { %9633 = vrot.lane.b32.xlu0 %v13883_v54, %s12990_s12  ;;  %v14681_v23 = vpop.permute.xlu1 %7689 }
 0x3d6   : > { %v14688_v56 = vpop.permute.xlu0 %7691 }
 0x3d7   : > { %9629 = vrot.lane.b32.xlu1 %v13887_v59, %s12990_s12 }
 0x3d8   : > { %9337 = vrot.lane.b32.xlu0 %v15951_v29, %s15947_s30  ;;  %v14694_v39 = vpop.permute.xlu1 %7687 }
 0x3d9   : > { %11806 = vmatmul.mubr.msk.bf16.vlgmr.msra.gmra.mrb[108].mxu1 %vm3390_vm2, %v12855_v5  ;;  %11141 = vmatmul.mubr.msk.bf16.vlgmr.msra.gmra.mrb[4].mxu0 %vm3390_vm2, %v14686_v40  ;;  %v14761_v5 = vld [vmem:[%s15869_s3 + $0x170] sm:$0xff]  }
 0x3da   : > { %v6654_v44 = vpop.permute.xlu0 %6653  ;;  %4719 = vmatpush1.bf16.msra.mxu1 %v4706_v48  ;;  %6819 = vmatpush1.bf16.msra.mxu0 %v6806_v11  ;;  %15958 = vst [vmem:[#allocation17_spill] sm:$0xff] %v14761_v5 }
 0x3db   : > { %11809 = vmatprep.subr.bf16.mxu1 %v4708_v21  ;;  %9781 = vrot.lane.b32.xlu1 %v13889_v63, %s12991_s16  ;;  %v14712_v37 = vsel %vm6655_vm12, %v14461_v3, %v6654_v44  ;;  %vm4855_vm12 = vcmask 392192  }
 0x3dc   : > { %15955 = vst [vmem:[#allocation14_spill] sm:$0xff] %v14712_v37  ;;  %6953 = vmatprep.subr.bf16.mxu0 %v13889_v63  ;;  %9783 = vrot.lane.b32.xlu0 %v13883_v54, %s12991_s16  ;;  %v7247_v37 = vsel %vm509_vm4, %v14580_v51, %v14564_v4 }
 0x3dd   : > { %v6804_v49 = vpop.permute.xlu1 %6803  ;;  %4750 = vmatprep.mubr.bf16.mxu1 %v15951_v29  ;;  %6710 = vmatprep.mubr.bf16.mxu0 %v15951_v29 }
 0x3de   : > { %v14727_v3 = vpop.permute.xlu0 %7839  ;;  %v14731_v41 = vsel %vm6805_vm15, %v14487_v58, %v6804_v49  ;;  %v4857_v58 = vsel %vm4855_vm12, %v14303_v18, %v14317_v42  ;;  %vm7845_vm15 = vcmask 859136  }
 0x3df   : > { %15957 = vst [vmem:[#allocation16_spill] sm:$0xff] %v14731_v41  ;;  %9779 = vrot.lane.b32.xlu1 %v13887_v59, %s12991_s16  ;;  %v4858_v41 = vsel %vm4855_vm12, %v14317_v42, %v14349_v14  ;;  %v14824_v42 = vld [vmem:[%s15869_s3 + $0x180] sm:$0xff]  }
 0x3e0   : > { %9486 = vrot.lane.b32.xlu0 %v15951_v29, %s15949_s25  ;;  %15964 = vst [vmem:[#allocation21_spill] sm:$0xff] %v14824_v42  ;;  %s12721_s25 = smul.u32 96, %s16066_s22 }
 0x3e1   : > { %v14737_v7 = vpop.permute.xlu1 %7841  ;;  %11011 = vmatmul.mubr.msk.bf16.vlgmr.msra.gmra.mrb[100].mxu1 %vm3390_vm2, %v12858_v35  ;;  %11142 = vmatmul.mubr.msk.bf16.gmra.mrb[8].mxu0 %vm3390_vm2, %v14725_v0  ;;  %v7099_v0 = vsel %vm290_vm1, %v14529_v47, %v14542_v50 }
 0x3e2   : > { %v14742_v44 = vpop.permute.xlu0 %7837  ;;  %11810 = vmatpush3.bf16.msra.mxu1 %v4708_v21  ;;  %4760 = vmatprep.mubr.bf16.mxu1 %v15951_v29  ;;  %v12860_v21 = vld [vmem:[%s15869_s3 + $0x98] sm:$0xff]   ;;  %s15842_s20 = scalar_lea.vmem %s15872_s6, %s12721_s25 }
 0x3e3   : > { %4868 = vmatprep.subr.bf16.mxu1 %v4857_v58  ;;  %9931 = vrot.lane.b32.xlu1 %v13889_v63, %s12992_s26 }
 0x3e4   : > { %9933 = vrot.lane.b32.xlu0 %v13883_v54, %s12992_s26  ;;  %6850 = vmatprep.mubr.bf16.mxu0 %v15951_v29 }
 0x3e5   : > { %v14753_v11 = vpop.permute.xlu1 %7989 }
 0x3e6   : > { %v14763_v48 = vpop.permute.xlu0 %7991 }
 0x3e7   : > { %9929 = vrot.lane.b32.xlu1 %v13887_v59, %s12992_s26 }
 0x3e8   : > { %9635 = vrot.lane.b32.xlu0 %v15951_v29, %s12990_s12 }
 0x3e9   : > { %v14769_v49 = vpop.permute.xlu1 %7987  ;;  %11012 = vmatmul.mubr.msk.bf16.gmra.mrb[104].mxu1 %vm3390_vm2, %v12860_v21  ;;  %11151 = vmatmul.mubr.msk.bf16.vlgmr.msra.gmra.mrb[4].mxu0 %vm3390_vm2, %v14761_v5 }
 0x3ea   : > { %v14774_v58 = vpop.permute.xlu0 %7096  ;;  %6954 = vmatpush1.bf16.msra.mxu0 %v13887_v59  ;;  %11811 = vmatprep.mubr.msk.bf16.mxu1 %vm3390_vm2, %v12858_v35  ;;  %v4856_v35 = vsel %vm4855_vm12, %v14319_v55, %v14303_v18  ;;  %v12863_v55 = vld [vmem:[%s15869_s3 + $0xa0] sm:$0xff]   ;;  %vm15985_vm12 = vcmask 654336  }
 0x3eb   : > { %15959 = vst [vmem:[#allocation18_spill] sm:$0xff] %v14774_v58  ;;  %9785 = vrot.lane.b32.xlu1 %v15951_v29, %s12991_s16  ;;  %7110 = vmatprep.subr.bf16.mxu0 %v7099_v0  ;;  %v14791_v58 = vld [vmem:[%s15869_s3 + $0x178] sm:$0xff]  }
 0x3ec   : > { %10081 = vrot.lane.b32.xlu0 %v13889_v63, %s15960_s19  ;;  %6860 = vmatprep.mubr.bf16.mxu0 %v15951_v29  ;;  %15961 = vst [vmem:[#allocation19_spill] sm:$0xff] %v14791_v58 }
 0x3ed   : > { %v14786_v5 = vpop.permute.xlu1 %8138 }
 0x3ee   : > { %v14793_v40 = vpop.permute.xlu0 %8140 }
 0x3ef   : > { %10083 = vrot.lane.b32.xlu1 %v13883_v54, %s15960_s19 }
 0x3f0   : > { %10079 = vrot.lane.b32.xlu0 %v13887_v59, %s15960_s19 }
 0x3f1   : > { %v14802_v0 = vpop.permute.xlu1 %8136  ;;  %11812 = vmatmul.mubr.msk.bf16.vlgmr.msra.gmra.mrb[108].mxu1 %vm3390_vm2, %v12860_v21  ;;  %11152 = vmatmul.mubr.msk.bf16.gmra.mrb[8].mxu0 %vm3390_vm2, %v14791_v58  ;;  %v5006_v58 = vsel %vm5005_vm3, %v14378_v33, %v14363_v25  ;;  %v10660_v33 = vld [vmem:[%s15870_s4] sm:$0xff] }
 0x3f2   : > { %v14807_v50 = vpop.permute.xlu0 %7245  ;;  %4869 = vmatpush1.bf16.msra.mxu1 %v4856_v35  ;;  %4900 = vmatprep.mubr.bf16.mxu1 %v15951_v29  ;;  %v7098_v35 = vsel %vm290_vm1, %v14545_v26, %v14529_v47  ;;  %v7248_v47 = vsel %vm509_vm4, %v14564_v4, %v14577_v43 }
 0x3f3   : > { %15962 = vst [vmem:[#allocation20_spill] sm:$0xff] %v14807_v50  ;;  %11815 = vmatprep.subr.bf16.mxu1 %v4858_v41  ;;  %9935 = vrot.lane.b32.xlu1 %v15951_v29, %s12992_s26 }
 0x3f4   : > { %10230 = vrot.lane.b32.xlu0 %v13889_v63, %s15963_s18  ;;  %6985 = vmatprep.mubr.bf16.mxu0 %v15951_v29 }
 0x3f5   : > { %v7395_v18 = vpop.permute.xlu1 %7394 }
 0x3f6   : > { %v14826_v14 = vpop.permute.xlu0 %8287  ;;  %v14830_v21 = vsel %vm631_vm5, %v14612_v31, %v7395_v18 }
 0x3f7   : > { %15965 = vst [vmem:[#allocation22_spill] sm:$0xff] %v14830_v21  ;;  %10232 = vrot.lane.b32.xlu1 %v13883_v54, %s15963_s18  ;;  %v5007_v21 = vsel %vm5005_vm3, %v14363_v25, %v14381_v17  ;;  %v7397_v25 = vsel %vm631_vm5, %v14609_v30, %v14612_v31 }
 0x3f8   : > { %10228 = vrot.lane.b32.xlu0 %v13887_v59, %s15963_s18 }
 0x3f9   : > { %v14839_v50 = vpop.permute.xlu1 %8289  ;;  %11021 = vmatmul.mubr.msk.bf16.vlgmr.msra.gmra.mrb[100].mxu1 %vm3390_vm2, %v12863_v55  ;;  %11161 = vmatmul.mubr.msk.bf16.vlgmr.msra.gmra.mrb[4].mxu0 %vm3390_vm2, %v14824_v42 }
 0x3fa   : > { %v14844_v18 = vpop.permute.xlu0 %8285  ;;  %11816 = vmatpush3.bf16.msra.mxu1 %v4858_v41  ;;  %7111 = vmatpush1.bf16.msra.mxu0 %v7098_v35  ;;  %v12865_v41 = vld [vmem:[%s15869_s3 + $0xa8] sm:$0xff]  }
 0x3fb   : > { %5018 = vmatprep.subr.bf16.mxu1 %v5007_v21  ;;  %10085 = vrot.lane.b32.xlu1 %v15951_v29, %s15960_s19  ;;  %v14864_v21 = vld [vmem:[%s15869_s3 + $0x188] sm:$0xff]  }
 0x3fc   : > { %7259 = vmatprep.subr.bf16.mxu0 %v7248_v47  ;;  %10379 = vrot.lane.b32.xlu0 %v13889_v63, %s15966_s28  ;;  %15967 = vst [vmem:[#allocation23_spill] sm:$0xff] %v14864_v21 }
 0x3fd   : > { %v7544_v26 = vpop.permute.xlu1 %7543  ;;  %4910 = vmatprep.mubr.bf16.mxu1 %v15951_v29  ;;  %6995 = vmatprep.mubr.bf16.mxu0 %v15951_v29 }
 0x3fe   : > { %v14866_v35 = vpop.permute.xlu0 %8436  ;;  %v14870_v47 = vsel %vm7545_vm13, %v14650_v32, %v7544_v26 }
 0x3ff   : > { %15968 = vst [vmem:[#allocation24_spill] sm:$0xff] %v14870_v47  ;;  %10381 = vrot.lane.b32.xlu1 %v13883_v54, %s15966_s28  ;;  %v14892_v47 = vld [vmem:[%s15869_s3 + $0x190] sm:$0xff]  }
 0x400   : > { %10377 = vrot.lane.b32.xlu0 %v13887_v59, %s15966_s28 }
 0x401   : > { %v14876_v43 = vpop.permute.xlu1 %8438  ;;  %11022 = vmatmul.mubr.msk.bf16.gmra.mrb[104].mxu1 %vm3390_vm2, %v12865_v41  ;;  %11162 = vmatmul.mubr.msk.bf16.gmra.mrb[8].mxu0 %vm3390_vm2, %v14864_v21 }
 0x402   : > { %v14881_v42 = vpop.permute.xlu0 %8434  ;;  %11817 = vmatprep.mubr.msk.bf16.mxu1 %vm3390_vm2, %v12863_v55  ;;  %7142 = vmatprep.mubr.bf16.mxu0 %v15951_v29 }
 0x403   : > { %15969 = vst [vmem:[#allocation25_spill] sm:$0xff] %v14881_v42  ;;  %10234 = vrot.lane.b32.xlu1 %v15951_v29, %s15963_s18 }
 0x404   : > { %10383 = vrot.lane.b32.xlu0 %v15951_v29, %s15966_s28 }
 0x405   : > { %v7694_v26 = vpop.permute.xlu1 %7693 }
 0x406   : > { %v14894_v21 = vpop.permute.xlu0 %8585  ;;  %v14898_v55 = vsel %vm7695_vm0, %v14688_v56, %v7694_v26 }
 0x407   : > { %15970 = vst [vmem:[#allocation26_spill] sm:$0xff] %v14898_v55  ;;  %10528 = vrot.lane.b32.xlu1 %v13889_v63, %s15971_s29  ;;  %v5008_v63 = vsel %vm5005_vm3, %v14381_v17, %v14408_v52  ;;  %v10661_v17 = vld [vmem:[%s15870_s4 + $0x8] sm:$0xff]  ;;  %v14941_v52 = vld [vmem:[%s15869_s3 + $0x198] sm:$0xff]   ;;  %v7697_v55 = vsel %vm7695_vm0, %v14681_v23, %v14688_v56  ;;  %vm15986_vm3 = vcmask 646144  }
 0x408   : > { %10530 = vrot.lane.b32.xlu0 %v13883_v54, %s15971_s29 }
 0x409   : > { %v14910_v42 = vpop.permute.xlu1 %8587  ;;  %11818 = vmatmul.mubr.msk.bf16.vlgmr.msra.gmra.mrb[108].mxu1 %vm3390_vm2, %v12865_v41  ;;  %11171 = vmatmul.mubr.msk.bf16.vlgmr.msra.gmra.mrb[4].mxu0 %vm3390_vm2, %v14892_v47 }
 0x40a   : > { %v14915_v26 = vpop.permute.xlu0 %8583  ;;  %5019 = vmatpush1.bf16.msra.mxu1 %v5006_v58  ;;  %7260 = vmatpush1.bf16.msra.mxu0 %v7247_v37  ;;  %v10662_v58 = vld [vmem:[%s15870_s4 + $0x10] sm:$0xff] }
 0x40b   : > { %11821 = vmatprep.subr.bf16.mxu1 %v5008_v63  ;;  %10526 = vrot.lane.b32.xlu1 %v13887_v59, %s15971_s29  ;;  %v12868_v59 = vld [vmem:[%s15869_s3 + $0xb0] sm:$0xff]  }
 0x40c   : > { %7408 = vmatprep.subr.bf16.mxu0 %v7397_v25  ;;  %10532 = vrot.lane.b32.xlu0 %v15951_v29, %s15971_s29  ;;  %v10663_v25 = vld [vmem:[%s15870_s4 + $0x18] sm:$0xff] }
 0x40d   : > { %v7844_v4 = vpop.permute.xlu1 %7843  ;;  %5050 = vmatprep.mubr.bf16.mxu1 %v15951_v29  ;;  %7152 = vmatprep.mubr.bf16.mxu0 %v15951_v29 }
 0x40e   : > { %v7994_v51 = vpop.permute.xlu0 %7993  ;;  %v14945_v31 = vsel %vm7845_vm15, %v14737_v7, %v7844_v4  ;;  %v5158_v4 = vsel %vm5155_vm14, %v14058_v10, %v14443_v60  ;;  %v7396_v60 = vsel %vm631_vm5, %v14626_v20, %v14609_v30  ;;  %v15003_v20 = vld [vmem:[%s15869_s3 + $0x1a8] sm:$0xff]   ;;  %vm8591_vm5 = vcmask 678912  }
 0x40f   : > { %15972 = vst [vmem:[#allocation27_spill] sm:$0xff] %v14945_v31  ;;  %10666 = vperm.xlu1 %12792, %v10660_v33   ;;  %v14949_v37 = vsel %vm875_vm7, %v14763_v48, %v7994_v51  ;;  %v12870_v51 = vld [vmem:[%s15869_s3 + $0xb8] sm:$0xff]   ;;  %v7547_v31 = vsel %vm7545_vm13, %v14648_v15, %v14650_v32  ;;  %vm8741_vm14 = vcmask 670720  }
 0x410   : > { %15973 = vst [vmem:[#allocation28_spill] sm:$0xff] %v14949_v37  ;;  %10671 = vperm.xlu0 %12791, %v10661_v17  }
 0x411   : > { %v14954_v41 = vpop.permute.xlu1 %8735  ;;  %11031 = vmatmul.mubr.msk.bf16.vlgmr.msra.gmra.mrb[100].mxu1 %vm3390_vm2, %v12868_v59  ;;  %11172 = vmatmul.mubr.msk.bf16.gmra.mrb[8].mxu0 %vm3390_vm2, %v14941_v52 }
 0x412   : > { %v14962_v33 = vpop.permute.xlu0 %8737  ;;  %11822 = vmatpush3.bf16.msra.mxu1 %v5008_v63  ;;  %5060 = vmatprep.mubr.bf16.mxu1 %v15951_v29  ;;  %v14977_v63 = vld [vmem:[%s15869_s3 + $0x1a0] sm:$0xff]  }
 0x413   : > { %11827 = vmatprep.subr.bf16.mxu1 %v5158_v4  ;;  %10676 = vperm.xlu1 %12792, %v10662_v58  }
 0x414   : > { %10681 = vperm.xlu0 %12791, %v10663_v25   ;;  %7291 = vmatprep.mubr.bf16.mxu0 %v15951_v29 }
 0x415   : > { %v14969_v17 = vpop.permute.xlu1 %8733 }
 0x416   : > { %v8143_v37 = vpop.permute.xlu0 %8142 }
 0x417   : > { %v14981_v10 = vsel %vm997_vm8, %v14793_v40, %v8143_v37 }
 0x418   : > { %15974 = vst [vmem:[#allocation29_spill] sm:$0xff] %v14981_v10 }
 0x419   : > { %v14986_v58 = vpop.permute.xlu1 %8885  ;;  %11032 = vmatmul.mubr.msk.bf16.gmra.mrb[104].mxu1 %vm3390_vm2, %v12870_v51  ;;  %11181 = vmatmul.mubr.msk.bf16.vlgmr.msra.gmra.mrb[4].mxu0 %vm3390_vm2, %v14977_v63 }
 0x41a   : > { %v14991_v25 = vpop.permute.xlu0 %8887  ;;  %7409 = vmatpush1.bf16.msra.mxu0 %v7396_v60  ;;  %11823 = vmatprep.mubr.msk.bf16.mxu1 %vm3390_vm2, %v12868_v59  ;;  %v5308_v59 = vsel %vm5305_vm11, %v14097_v46, %v14474_v8  ;;  %v7546_v8 = vsel %vm7545_vm13, %v14666_v9, %v14648_v15  ;;  %v12918_v9 = vld [vmem:[%s15869_s3 + $0xc8] sm:$0xff]   ;;  %vm8891_vm11 = vcmask 662528   ;;  %vm15988_vm13 = vcmask 203776  }
 0x41b   : > { %7558 = vmatprep.subr.bf16.mxu0 %v7547_v31  ;;  %7301 = vmatprep.mubr.bf16.mxu0 %v15951_v29  ;;  %v12917_v31 = vld [vmem:[%s15869_s3 + $0xc0] sm:$0xff]  }
 0x41d   : > { %v14998_v30 = vpop.permute.xlu1 %8883 }
 0x41e   : > { %v8292_v37 = vpop.permute.xlu0 %8291 }
 0x41f   : > { %v15007_v60 = vsel %vm1119_vm9, %v14839_v50, %v8292_v37  ;;  %v15029_v37 = vld [vmem:[%s15869_s3 + $0x1b0] sm:$0xff]  }
 0x420   : > { %15975 = vst [vmem:[#allocation30_spill] sm:$0xff] %v15007_v60 }
 0x421   : > { %v15009_v10 = vpop.permute.xlu1 %9035  ;;  %11824 = vmatmul.mubr.msk.bf16.vlgmr.msra.gmra.mrb[108].mxu1 %vm3390_vm2, %v12870_v51  ;;  %11182 = vmatmul.mubr.msk.bf16.gmra.mrb[8].mxu0 %vm3390_vm2, %v15003_v20 }
 0x422   : > { %v15014_v32 = vpop.permute.xlu0 %9037  ;;  %11828 = vmatpush3.bf16.msra.mxu1 %v5158_v4  ;;  %7440 = vmatprep.mubr.bf16.mxu0 %v15951_v29 }
 0x423   : > { %11833 = vmatprep.subr.bf16.mxu1 %v5308_v59  ;;  %11829 = vmatprep.mubr.msk.bf16.mxu1 %vm3390_vm2, %v12917_v31 }
 0x425   : > { %v15024_v51 = vpop.permute.xlu1 %9033 }
 0x426   : > { %v8441_v4 = vpop.permute.xlu0 %8440 }
 0x427   : > { %v15033_v46 = vsel %vm1241_vm10, %v14876_v43, %v8441_v4 }
 0x428   : > { %15976 = vst [vmem:[#allocation31_spill] sm:$0xff] %v15033_v46  ;;  %v7696_v46 = vsel %vm7695_vm0, %v14694_v39, %v14681_v23  ;;  %v7847_v23 = vsel %vm7845_vm15, %v14727_v3, %v14737_v7  ;;  %vm15989_vm0 = vcmask 637952  }
 0x429   : > { %v8590_v60 = vpop.permute.xlu1 %8589  ;;  %11191 = vmatmul.mubr.msk.bf16.vlgmr.msra.gmra.mrb[4].mxu0 %vm3390_vm2, %v15029_v37 }
 0x42a   : > { %v15040_v31 = vpop.permute.xlu0 %9184  ;;  %7559 = vmatpush1.bf16.msra.mxu0 %v7546_v8  ;;  %7450 = vmatprep.mubr.bf16.mxu0 %v15951_v29  ;;  %v15048_v4 = vsel %vm8591_vm5, %v14910_v42, %v8590_v60  ;;  %v15059_v8 = vld [vmem:[%s15869_s3 + $0x1b8] sm:$0xff]   ;;  %v12919_v60 = vld [vmem:[%s15869_s3 + $0xd0] sm:$0xff]  }
 0x42b   : > { %15977 = vst [vmem:[#allocation32_spill] sm:$0xff] %v15048_v4  ;;  %7708 = vmatprep.subr.bf16.mxu0 %v7697_v55  ;;  %15978 = vst [vmem:[#allocation33_spill] sm:$0xff] %v15059_v8  ;;  %v5458_v55 = vsel %vm5455_vm6, %v14147_v12, %v14509_v53  ;;  %v15084_v53 = vld [vmem:[%s15869_s3 + $0x1c0] sm:$0xff]   ;;  %vm15981_vm6 = vcmask 211968  }
 0x42d   : > { %v15050_v15 = vpop.permute.xlu1 %9186  ;;  %11830 = vmatmul.mubr.msk.bf16.vlgmr.msra.gmra.mrb[108].mxu1 %vm3390_vm2, %v12918_v9 }
 0x42e   : > { %v15061_v56 = vpop.permute.xlu0 %9182  ;;  %11834 = vmatpush3.bf16.msra.mxu1 %v5308_v59  ;;  %11835 = vmatprep.mubr.msk.bf16.mxu1 %vm3390_vm2, %v12919_v60 }
 0x42f   : > { %11839 = vmatprep.subr.bf16.mxu1 %v5458_v55 }
 0x431   : > { %v8740_v9 = vpop.permute.xlu1 %8739  ;;  %11192 = vmatmul.mubr.msk.bf16.gmra.mrb[8].mxu0 %vm3390_vm2, %v15059_v8 }
 0x432   : > { %v15072_v4 = vpop.permute.xlu0 %9333  ;;  %7590 = vmatprep.mubr.bf16.mxu0 %v15951_v29  ;;  %v15077_v59 = vsel %vm8741_vm14, %v14962_v33, %v8740_v9  ;;  %v12920_v9 = vld [vmem:[%s15869_s3 + $0xd8] sm:$0xff]  }
 0x433   : > { %15979 = vst [vmem:[#allocation34_spill] sm:$0xff] %v15077_v59 }
 0x435   : > { %v15079_v12 = vpop.permute.xlu1 %9335 }
 0x436   : > { %v15086_v60 = vpop.permute.xlu0 %9331 }
 0x437   : > { %15980 = vst [vmem:[#allocation35_spill] sm:$0xff] %v15086_v60  ;;  %v5608_v60 = vsel %vm15981_vm6, %v14175_v62, %v14511_v28  ;;  %v15119_v62 = vld [vmem:[%s15869_s3 + $0x1c8] sm:$0xff]   ;;  %vm15992_vm6 = vcmask 629760  }
 0x438   : > { %15983 = vst [vmem:[#allocation37_spill] sm:$0xff] %v15119_v62 }
 0x439   : > { %v8890_v8 = vpop.permute.xlu1 %8889  ;;  %11836 = vmatmul.mubr.msk.bf16.vlgmr.msra.gmra.mrb[108].mxu1 %vm3390_vm2, %v12920_v9  ;;  %11201 = vmatmul.mubr.msk.bf16.vlgmr.msra.gmra.mrb[4].mxu0 %vm3390_vm2, %v15084_v53 }
 0x43a   : > { %v15097_v59 = vpop.permute.xlu0 %9482  ;;  %11840 = vmatpush3.bf16.msra.mxu1 %v5458_v55  ;;  %7709 = vmatpush1.bf16.msra.mxu0 %v7696_v46  ;;  %v15107_v39 = vsel %vm8891_vm11, %v14991_v25, %v8890_v8  ;;  %v12921_v46 = vld [vmem:[%s15869_s3 + $0xe0] sm:$0xff]  }
 0x43b   : > { %15982 = vst [vmem:[#allocation36_spill] sm:$0xff] %v15107_v39  ;;  %11845 = vmatprep.subr.bf16.mxu1 %v5608_v60  ;;  %7858 = vmatprep.subr.bf16.mxu0 %v7847_v23  ;;  %v12922_v39 = vld [vmem:[%s15869_s3 + $0xe8] sm:$0xff]  }
 0x43c   : > { %7600 = vmatprep.mubr.bf16.mxu0 %v15951_v29  ;;  %11841 = vmatprep.mubr.msk.bf16.mxu1 %vm3390_vm2, %v12921_v46 }
 0x43d   : > { %v15114_v55 = vpop.permute.xlu1 %9484 }
 0x43e   : > { %v15121_v28 = vpop.permute.xlu0 %9480 }
 0x43f   : > { %15984 = vst [vmem:[#allocation38_spill] sm:$0xff] %v15121_v28  ;;  %v15143_v28 = vld [vmem:[%s15869_s3 + $0x1d0] sm:$0xff]  }
 0x441   : > { %v9040_v7 = vpop.permute.xlu1 %9039  ;;  %11202 = vmatmul.mubr.msk.bf16.gmra.mrb[8].mxu0 %vm3390_vm2, %v15119_v62 }
 0x442   : > { %v9189_v8 = vpop.permute.xlu0 %9188  ;;  %7740 = vmatprep.mubr.bf16.mxu0 %v15951_v29  ;;  %v15128_v9 = vsel %vm15985_vm12, %v15014_v32, %v9040_v7  ;;  %v5758_v7 = vsel %vm15988_vm13, %v14213_v19, %v14527_v36  ;;  %v7996_v19 = vsel %vm875_vm7, %v14753_v11, %v14763_v48  ;;  %vm9637_vm12 = vcmask 482304  }
 0x443   : > { %v15132_v23 = vsel %vm15986_vm3, %v15050_v15, %v9189_v8  ;;  %v12923_v8 = vld [vmem:[%s15869_s3 + $0xf0] sm:$0xff]   ;;  %vm15995_vm3 = vcmask 187392   ;;  %vm9937_vm13 = vcmask 465920  }
 0x444   : > { %15987 = vst [vmem:[#allocation39_spill] sm:$0xff] %v15132_v23 }
 0x445   : > { %v15134_v46 = vpop.permute.xlu1 %9631  ;;  %11842 = vmatmul.mubr.msk.bf16.vlgmr.msra.gmra.mrb[108].mxu1 %vm3390_vm2, %v12922_v39  ;;  %v7846_v39 = vsel %vm7845_vm15, %v14742_v44, %v14727_v3  ;;  %v15174_v3 = vld [vmem:[%s15869_s3 + $0x1d8] sm:$0xff]   ;;  %vm15991_vm15 = vcmask 195584  }
 0x446   : > { %v15145_v62 = vpop.permute.xlu0 %9633  ;;  %11846 = vmatpush3.bf16.msra.mxu1 %v5608_v60  ;;  %11847 = vmatprep.mubr.msk.bf16.mxu1 %vm3390_vm2, %v12923_v8 }
 0x447   : > { %11851 = vmatprep.subr.bf16.mxu1 %v5758_v7 }
 0x449   : > { %v15157_v23 = vpop.permute.xlu1 %9629  ;;  %11211 = vmatmul.mubr.msk.bf16.vlgmr.msra.gmra.mrb[4].mxu0 %vm3390_vm2, %v15143_v28 }
 0x44a   : > { %v9338_v60 = vpop.permute.xlu0 %9337  ;;  %7859 = vmatpush1.bf16.msra.mxu0 %v7846_v39  ;;  %7750 = vmatprep.mubr.bf16.mxu0 %v15951_v29 }
 0x44b   : > { %8007 = vmatprep.subr.bf16.mxu0 %v7996_v19  ;;  %v15167_v36 = vsel %vm15989_vm0, %v15079_v12, %v9338_v60  ;;  %v5908_v60 = vsel %vm15991_vm15, %v14260_v45, %v14559_v57  ;;  %v7995_v45 = vsel %vm875_vm7, %v14769_v49, %v14753_v11  ;;  %vm9787_vm7 = vcmask 474112   ;;  %v15223_v49 = vld [vmem:[%s15869_s3 + $0x1e8] sm:$0xff]  }
 0x44c   : > { %15990 = vst [vmem:[#allocation40_spill] sm:$0xff] %v15167_v36  ;;  %vm15998_vm0 = vcmask 179200   ;;  %vm16003_vm15 = vcmask 449536  }
 0x44d   : > { %v15169_v8 = vpop.permute.xlu1 %9781 }
 0x44e   : > { %v15176_v44 = vpop.permute.xlu0 %9783 }
 0x451   : > { %v15178_v39 = vpop.permute.xlu1 %9779  ;;  %11848 = vmatmul.mubr.msk.bf16.vlgmr.msra.gmra.mrb[108].mxu1 %vm3390_vm2, %v14269_v38  ;;  %11212 = vmatmul.mubr.msk.bf16.gmra.mrb[8].mxu0 %vm3390_vm2, %v15174_v3 }
 0x452   : > { %v9487_v48 = vpop.permute.xlu0 %9486  ;;  %11852 = vmatpush3.bf16.msra.mxu1 %v5758_v7  ;;  %7890 = vmatprep.mubr.bf16.mxu0 %v15951_v29  ;;  %v15199_v7 = vld [vmem:[%s15869_s3 + $0x1e0] sm:$0xff]  }
 0x453   : > { %11857 = vmatprep.subr.bf16.mxu1 %v5908_v60  ;;  %11853 = vmatprep.mubr.msk.bf16.mxu1 %vm3390_vm2, %v14293_v2  ;;  %v15192_v19 = vsel %vm15992_vm6, %v15114_v55, %v9487_v48  ;;  %v8145_v48 = vsel %vm997_vm8, %v14786_v5, %v14793_v40  ;;  %v6058_v40 = vsel %vm15995_vm3, %v14288_v1, %v14591_v16  ;;  %v15246_v1 = vld [vmem:[%s15869_s3 + $0x1f0] sm:$0xff]   ;;  %vm16005_vm6 = vcmask 441344  }
 0x454   : > { %15993 = vst [vmem:[#allocation41_spill] sm:$0xff] %v15192_v19 }
 0x455   : > { %v15194_v38 = vpop.permute.xlu1 %9931 }
 0x456   : > { %v15201_v36 = vpop.permute.xlu0 %9933 }
 0x459   : > { %v15206_v57 = vpop.permute.xlu1 %9929  ;;  %11221 = vmatmul.mubr.msk.bf16.vlgmr.msra.gmra.mrb[4].mxu0 %vm3390_vm2, %v15199_v7 }
 0x45a   : > { %v9636_v2 = vpop.permute.xlu0 %9635  ;;  %8008 = vmatpush1.bf16.msra.mxu0 %v7995_v45  ;;  %7900 = vmatprep.mubr.bf16.mxu0 %v15951_v29 }
 0x45b   : > { %8156 = vmatprep.subr.bf16.mxu0 %v8145_v48  ;;  %v15216_v19 = vsel %vm9637_vm12, %v15145_v62, %v9636_v2 }
 0x45c   : > { %15994 = vst [vmem:[#allocation42_spill] sm:$0xff] %v15216_v19 }
 0x45d   : > { %v9786_v11 = vpop.permute.xlu1 %9785  ;;  %11854 = vmatmul.mubr.msk.bf16.vlgmr.msra.gmra.mrb[108].mxu1 %vm3390_vm2, %v14329_v34 }
 0x45e   : > { %v15225_v45 = vpop.permute.xlu0 %10081  ;;  %11858 = vmatpush3.bf16.msra.mxu1 %v5908_v60  ;;  %11859 = vmatprep.mubr.msk.bf16.mxu1 %vm3390_vm2, %v14357_v27  ;;  %v15234_v2 = vsel %vm9787_vm7, %v15176_v44, %v9786_v11  ;;  %v8144_v11 = vsel %vm997_vm8, %v14802_v0, %v14786_v5  ;;  %v8294_v5 = vsel %vm1119_vm9, %v14826_v14, %v14839_v50  ;;  %v15277_v0 = vld [vmem:[%s15869_s3 + $0x1f8] sm:$0xff]   ;;  %vm15999_vm8 = vcmask 457728  }
 0x45f   : > { %15996 = vst [vmem:[#allocation43_spill] sm:$0xff] %v15234_v2  ;;  %11863 = vmatprep.subr.bf16.mxu1 %v6058_v40 }
 0x461   : > { %v15236_v34 = vpop.permute.xlu1 %10083  ;;  %11222 = vmatmul.mubr.msk.bf16.gmra.mrb[8].mxu0 %vm3390_vm2, %v15223_v49 }
 0x462   : > { %v15240_v48 = vpop.permute.xlu0 %10079  ;;  %8039 = vmatprep.mubr.bf16.mxu0 %v15951_v29 }
 0x465   : > { %v9936_v60 = vpop.permute.xlu1 %9935 }
 0x466   : > { %v15248_v27 = vpop.permute.xlu0 %10230  ;;  %v15252_v16 = vsel %vm9937_vm13, %v15201_v36, %v9936_v60  ;;  %v6208_v60 = vsel %vm15998_vm0, %v14335_v22, %v14596_v24 }
 0x467   : > { %15997 = vst [vmem:[#allocation44_spill] sm:$0xff] %v15252_v16  ;;  %v16004_v16 = vld [vmem:[#allocation10_spill] sm:$0xff] }
 0x469   : > { %v15257_v2 = vpop.permute.xlu1 %10232  ;;  %11860 = vmatmul.mubr.msk.bf16.vlgmr.msra.gmra.mrb[108].mxu1 %vm3390_vm2, %v14386_v13  ;;  %11231 = vmatmul.mubr.msk.bf16.vlgmr.msra.gmra.mrb[4].mxu0 %vm3390_vm2, %v15246_v1 }
 0x46a   : > { %v15263_v19 = vpop.permute.xlu0 %10228  ;;  %11864 = vmatpush3.bf16.msra.mxu1 %v6058_v40  ;;  %8157 = vmatpush1.bf16.msra.mxu0 %v8144_v11  ;;  %v15297_v11 = vld [vmem:[%s15869_s3 + $0x200] sm:$0xff]  }
 0x46b   : > { %11869 = vmatprep.subr.bf16.mxu1 %v6208_v60  ;;  %8305 = vmatprep.subr.bf16.mxu0 %v8294_v5 }
 0x46c   : > { %8049 = vmatprep.mubr.bf16.mxu0 %v15951_v29  ;;  %11865 = vmatprep.mubr.msk.bf16.mxu1 %vm3390_vm2, %v14419_v6 }
 0x46d   : > { %v10086_v13 = vpop.permute.xlu1 %10085 }
 0x46e   : > { %v15279_v40 = vpop.permute.xlu0 %10379  ;;  %v15283_v22 = vsel %vm15999_vm8, %v15236_v34, %v10086_v13  ;;  %v16002_v13 = vld [vmem:[#allocation3_spill] sm:$0xff] }
 0x46f   : > { %16000 = vst [vmem:[#allocation45_spill] sm:$0xff] %v15283_v22 }
 0x471   : > { %v15285_v50 = vpop.permute.xlu1 %10381  ;;  %11232 = vmatmul.mubr.msk.bf16.gmra.mrb[8].mxu0 %vm3390_vm2, %v15277_v0 }
 0x472   : > { %v15289_v24 = vpop.permute.xlu0 %10377  ;;  %8188 = vmatprep.mubr.bf16.mxu0 %v15951_v29 }
 0x473   : > { %16001 = vst [vmem:[#allocation46_spill] sm:$0xff] %v15289_v24 }
 0x475   : > { %v10235_v6 = vpop.permute.xlu1 %10234  ;;  %11866 = vmatmul.mubr.msk.bf16.vlgmr.msra.gmra.mrb[108].mxu1 %vm3390_vm2, %v14455_v61  ;;  %v8293_v61 = vsel %vm1119_vm9, %v14844_v18, %v14826_v14  ;;  %v16007_v14 = vld [vmem:[#allocation12_spill] sm:$0xff]  ;;  %v15336_v18 = vld [vmem:[%s15869_s3 + $0x210] sm:$0xff]  }
 0x476   : > { %v10384_v5 = vpop.permute.xlu0 %10383  ;;  %11870 = vmatpush3.bf16.msra.mxu1 %v6208_v60  ;;  %11871 = vmatprep.mubr.msk.bf16.mxu1 %vm3390_vm2, %v16002_v13  ;;  %v15303_v22 = vsel %vm16003_vm15, %v15257_v2, %v10235_v6  ;;  %v8443_v60 = vsel %vm1241_vm10, %v14866_v35, %v14876_v43  ;;  %v15322_v6 = vld [vmem:[%s15869_s3 + $0x208] sm:$0xff]   ;;  %v16008_v43 = vld [vmem:[#allocation6_spill] sm:$0xff]  ;;  %v16009_v13 = vld [vmem:[#allocation25_spill] sm:$0xff] }
 0x477   : > { %11875 = vmatprep.subr.bf16.mxu1 %v16004_v16  ;;  %v15308_v24 = vsel %vm16005_vm6, %v15285_v50, %v10384_v5  ;;  %v16006_v5 = vld [vmem:[#allocation4_spill] sm:$0xff] }
 0x479   : > { %11241 = vmatmul.mubr.msk.bf16.vlgmr.msra.gmra.mrb[4].mxu0 %vm3390_vm2, %v15297_v11 }
 0x47a   : > { %8306 = vmatpush1.bf16.msra.mxu0 %v8293_v61  ;;  %8198 = vmatprep.mubr.bf16.mxu0 %v15951_v29  ;;  %v8442_v61 = vsel %vm1241_vm10, %v16009_v13, %v14866_v35  ;;  %v16011_v35 = vld [vmem:[#allocation9_spill] sm:$0xff]  ;;  %v8592_v13 = vsel %vm8591_vm5, %v14915_v26, %v14894_v21  ;;  %v16016_v26 = vld [vmem:[#allocation15_spill] sm:$0xff] }
 0x47b   : > { %8454 = vmatprep.subr.bf16.mxu0 %v8443_v60  ;;  %v16010_v60 = vld [vmem:[#allocation8_spill] sm:$0xff] }
 0x481   : > { %11872 = vmatmul.mubr.msk.bf16.vlgmr.msra.gmra.mrb[108].mxu1 %vm3390_vm2, %v16006_v5  ;;  %11242 = vmatmul.mubr.msk.bf16.gmra.mrb[8].mxu0 %vm3390_vm2, %v15322_v6  ;;  %v15352_v5 = vld [vmem:[%s15869_s3 + $0x218] sm:$0xff]  }
 0x482   : > { %11876 = vmatpush3.bf16.msra.mxu1 %v16004_v16  ;;  %8337 = vmatprep.mubr.bf16.mxu0 %v15951_v29  ;;  %v8593_v16 = vsel %vm8591_vm5, %v14894_v21, %v14910_v42  ;;  %v15364_v42 = vld [vmem:[%s15869_s3 + $0x220] sm:$0xff]   ;;  %v15384_v21 = vld [vmem:[%s15869_s3 + $0x228] sm:$0xff]   ;;  %vm16031_vm5 = vcmask 637952  }
 0x483   : > { %11881 = vmatprep.subr.bf16.mxu1 %v16007_v14  ;;  %11877 = vmatprep.mubr.msk.bf16.mxu1 %vm3390_vm2, %v16008_v43  ;;  %v16012_v43 = vld [vmem:[#allocation14_spill] sm:$0xff] }
 0x489   : > { %11251 = vmatmul.mubr.msk.bf16.vlgmr.msra.gmra.mrb[4].mxu0 %vm3390_vm2, %v15336_v18 }
 0x48a   : > { %8455 = vmatpush1.bf16.msra.mxu0 %v8442_v61  ;;  %8347 = vmatprep.mubr.bf16.mxu0 %v15951_v29  ;;  %v8743_v61 = vsel %vm8741_vm14, %v14954_v41, %v14962_v33  ;;  %v15394_v33 = vld [vmem:[%s15869_s3 + $0x230] sm:$0xff]  }
 0x48b   : > { %8604 = vmatprep.subr.bf16.mxu0 %v8593_v16  ;;  %v16014_v16 = vld [vmem:[#allocation16_spill] sm:$0xff] }
 0x48d   : > { %11878 = vmatmul.mubr.msk.bf16.vlgmr.msra.gmra.mrb[108].mxu1 %vm3390_vm2, %v16010_v60  ;;  %v16015_v60 = vld [vmem:[#allocation13_spill] sm:$0xff] }
 0x48e   : > { %11882 = vmatpush3.bf16.msra.mxu1 %v16007_v14  ;;  %11883 = vmatprep.mubr.msk.bf16.mxu1 %vm3390_vm2, %v16011_v35  ;;  %v16013_v14 = vld [vmem:[#allocation11_spill] sm:$0xff]  ;;  %v16017_v35 = vld [vmem:[#allocation17_spill] sm:$0xff] }
 0x48f   : > { %11887 = vmatprep.subr.bf16.mxu1 %v16012_v43 }
 0x491   : > { %11252 = vmatmul.mubr.msk.bf16.gmra.mrb[8].mxu0 %vm3390_vm2, %v15352_v5 }
 0x492   : > { %8486 = vmatprep.mubr.bf16.mxu0 %v15951_v29 }
 0x499   : > { %11884 = vmatmul.mubr.msk.bf16.vlgmr.msra.gmra.mrb[108].mxu1 %vm3390_vm2, %v16013_v14  ;;  %11261 = vmatmul.mubr.msk.bf16.vlgmr.msra.gmra.mrb[4].mxu0 %vm3390_vm2, %v15364_v42  ;;  %v15412_v14 = vld [vmem:[%s15869_s3 + $0x238] sm:$0xff]  }
 0x49a   : > { %11888 = vmatpush3.bf16.msra.mxu1 %v16012_v43  ;;  %8605 = vmatpush1.bf16.msra.mxu0 %v8592_v13  ;;  %v8742_v43 = vsel %vm8741_vm14, %v14969_v17, %v14954_v41  ;;  %v8893_v13 = vsel %vm8891_vm11, %v14986_v58, %v14991_v25  ;;  %v16019_v41 = vld [vmem:[#allocation18_spill] sm:$0xff]  ;;  %v16020_v17 = vld [vmem:[#allocation5_spill] sm:$0xff]  ;;  %vm16035_vm14 = vmmov %vm16031_vm5 }
 0x49b   : > { %11893 = vmatprep.subr.bf16.mxu1 %v16014_v16  ;;  %8754 = vmatprep.subr.bf16.mxu0 %v8743_v61  ;;  %v16018_v61 = vld [vmem:[#allocation19_spill] sm:$0xff]  ;;  %v7100_v25 = vsel %vm290_vm1, %v16020_v17, %v16019_v41  ;;  %vm16022_vm1 = vcmask 654336   ;;  %v16028_v41 = vld [vmem:[#allocation22_spill] sm:$0xff]  ;;  %v15522_v17 = vld [vmem:[%s15869_s3 + $0x270] sm:$0xff]  }
 0x49c   : > { %8496 = vmatprep.mubr.bf16.mxu0 %v15951_v29  ;;  %11889 = vmatprep.mubr.msk.bf16.mxu1 %vm3390_vm2, %v16015_v60  ;;  %v15428_v60 = vld [vmem:[%s15869_s3 + $0x240] sm:$0xff]   ;;  %vm16026_vm9 = vmmov %vm16022_vm1 }
 0x4a1   : > { %11262 = vmatmul.mubr.msk.bf16.gmra.mrb[8].mxu0 %vm3390_vm2, %v15384_v21 }
 0x4a2   : > { %8636 = vmatprep.mubr.bf16.mxu0 %v15951_v29 }
 0x4a5   : > { %11890 = vmatmul.mubr.msk.bf16.vlgmr.msra.gmra.mrb[108].mxu1 %vm3390_vm2, %v16016_v26  ;;  %v8892_v26 = vsel %vm8891_vm11, %v14998_v30, %v14986_v58  ;;  %v16024_v58 = vld [vmem:[#allocation20_spill] sm:$0xff]  ;;  %v16025_v30 = vld [vmem:[#allocation7_spill] sm:$0xff]  ;;  %vm16036_vm11 = vcmask 629760  }
 0x4a6   : > { %11894 = vmatpush3.bf16.msra.mxu1 %v16014_v16  ;;  %11895 = vmatprep.mubr.msk.bf16.mxu1 %vm3390_vm2, %v16017_v35  ;;  %v16021_v16 = vld [vmem:[#allocation21_spill] sm:$0xff]  ;;  %v16023_v35 = vld [vmem:[#allocation23_spill] sm:$0xff]  ;;  %vm16040_vm3 = vmmov %vm16036_vm11 }
 0x4a7   : > { %11899 = vmatprep.subr.bf16.mxu1 %v13883_v54 }
 0x4a9   : > { %11271 = vmatmul.mubr.msk.bf16.vlgmr.msra.gmra.mrb[4].mxu0 %vm3390_vm2, %v15394_v33 }
 0x4aa   : > { %8755 = vmatpush1.bf16.msra.mxu0 %v8742_v43  ;;  %8646 = vmatprep.mubr.bf16.mxu0 %v15951_v29  ;;  %v15444_v43 = vld [vmem:[%s15869_s3 + $0x248] sm:$0xff]  }
 0x4ab   : > { %8904 = vmatprep.subr.bf16.mxu0 %v8893_v13  ;;  %v7249_v13 = vsel %vm509_vm4, %v16025_v30, %v16024_v58  ;;  %vm16027_vm4 = vcmask 646144   ;;  %v16037_v30 = vld [vmem:[#allocation37_spill] sm:$0xff] }
 0x4ac   : > { %vm16030_vm10 = vmmov %vm16027_vm4 }
 0x4b1   : > { %11896 = vmatmul.mubr.msk.bf16.vlgmr.msra.gmra.mrb[108].mxu1 %vm3390_vm2, %v16018_v61  ;;  %11272 = vmatmul.mubr.msk.bf16.gmra.mrb[8].mxu0 %vm3390_vm2, %v15412_v14  ;;  %v9041_v61 = vsel %vm16026_vm9, %v15024_v51, %v15009_v10  ;;  %v9190_v51 = vsel %vm16030_vm10, %v15061_v56, %v15040_v31 }
 0x4b2   : > { %11900 = vmatpush3.bf16.msra.mxu1 %v13883_v54  ;;  %8786 = vmatprep.mubr.bf16.mxu0 %v15951_v29  ;;  %v9042_v54 = vsel %vm16022_vm1, %v15009_v10, %v15014_v32  ;;  %v15457_v32 = vld [vmem:[%s15869_s3 + $0x250] sm:$0xff]   ;;  %v15486_v10 = vld [vmem:[%s15869_s3 + $0x260] sm:$0xff]  }
 0x4b3   : > { %11905 = vmatprep.subr.bf16.mxu1 %v7100_v25  ;;  %11901 = vmatprep.mubr.msk.bf16.mxu1 %vm3390_vm2, %v16021_v16 }
 0x4b9   : > { %11281 = vmatmul.mubr.msk.bf16.vlgmr.msra.gmra.mrb[4].mxu0 %vm3390_vm2, %v15428_v60 }
 0x4ba   : > { %8905 = vmatpush1.bf16.msra.mxu0 %v8892_v26  ;;  %8796 = vmatprep.mubr.bf16.mxu0 %v15951_v29  ;;  %v16034_v26 = vld [vmem:[#allocation35_spill] sm:$0xff] }
 0x4bb   : > { %9053 = vmatprep.subr.bf16.mxu0 %v9042_v54  ;;  %v9339_v54 = vsel %vm16035_vm14, %v16034_v26, %v15072_v4  ;;  %v12916_v26 = vld [vmem:[%s15869_s3 + $0x308] sm:$0xff]  }
 0x4bd   : > { %11902 = vmatmul.mubr.msk.bf16.vlgmr.msra.gmra.mrb[108].mxu1 %vm3390_vm2, %v16023_v35 }
 0x4be   : > { %11906 = vmatpush3.bf16.msra.mxu1 %v7100_v25  ;;  %11907 = vmatprep.mubr.msk.bf16.mxu1 %vm3390_vm2, %v14892_v47  ;;  %v9191_v47 = vsel %vm16027_vm4, %v15040_v31, %v15050_v15  ;;  %v16032_v15 = vld [vmem:[#allocation33_spill] sm:$0xff]  ;;  %v16033_v31 = vld [vmem:[#allocation26_spill] sm:$0xff] }
 0x4bf   : > { %11911 = vmatprep.subr.bf16.mxu1 %v7249_v13 }
 0x4c1   : > { %11282 = vmatmul.mubr.msk.bf16.gmra.mrb[8].mxu0 %vm3390_vm2, %v15444_v43 }
 0x4c2   : > { %8936 = vmatprep.mubr.bf16.mxu0 %v15951_v29 }
 0x4c9   : > { %11908 = vmatmul.mubr.msk.bf16.vlgmr.msra.gmra.mrb[108].mxu1 %vm3390_vm2, %v14941_v52  ;;  %11291 = vmatmul.mubr.msk.bf16.vlgmr.msra.gmra.mrb[4].mxu0 %vm3390_vm2, %v15457_v32  ;;  %v15476_v52 = vld [vmem:[%s15869_s3 + $0x258] sm:$0xff]  }
 0x4ca   : > { %11912 = vmatpush3.bf16.msra.mxu1 %v7249_v13  ;;  %9054 = vmatpush1.bf16.msra.mxu0 %v9041_v61 }
 0x4cb   : > { %11917 = vmatprep.subr.bf16.mxu1 %v16028_v41  ;;  %9202 = vmatprep.subr.bf16.mxu0 %v9191_v47  ;;  %v15562_v47 = vld [vmem:[%s15869_s3 + $0x280] sm:$0xff]  }
 0x4cc   : > { %8946 = vmatprep.mubr.bf16.mxu0 %v15951_v29  ;;  %11913 = vmatprep.mubr.msk.bf16.mxu1 %vm3390_vm2, %v14977_v63  ;;  %v16029_v63 = vld [vmem:[#allocation24_spill] sm:$0xff] }
 0x4d1   : > { %11292 = vmatmul.mubr.msk.bf16.gmra.mrb[8].mxu0 %vm3390_vm2, %v15476_v52 }
 0x4d2   : > { %9085 = vmatprep.mubr.bf16.mxu0 %v15951_v29 }
 0x4d5   : > { %11914 = vmatmul.mubr.msk.bf16.vlgmr.msra.gmra.mrb[108].mxu1 %vm3390_vm2, %v15003_v20  ;;  %v9340_v20 = vsel %vm16031_vm5, %v15072_v4, %v15079_v12  ;;  %v15546_v4 = vld [vmem:[%s15869_s3 + $0x278] sm:$0xff]  }
 0x4d6   : > { %11918 = vmatpush3.bf16.msra.mxu1 %v16028_v41  ;;  %11919 = vmatprep.mubr.msk.bf16.mxu1 %vm3390_vm2, %v15029_v37  ;;  %v15504_v37 = vld [vmem:[%s15869_s3 + $0x268] sm:$0xff]   ;;  %v16039_v41 = vld [vmem:[#allocation38_spill] sm:$0xff] }
 0x4d7   : > { %11923 = vmatprep.subr.bf16.mxu1 %v16029_v63 }
 0x4d9   : > { %11301 = vmatmul.mubr.msk.bf16.vlgmr.msra.gmra.mrb[4].mxu0 %vm3390_vm2, %v15486_v10 }
 0x4da   : > { %9203 = vmatpush1.bf16.msra.mxu0 %v9190_v51  ;;  %9095 = vmatprep.mubr.bf16.mxu0 %v15951_v29  ;;  %v16041_v51 = vld [vmem:[#allocation28_spill] sm:$0xff] }
 0x4db   : > { %9351 = vmatprep.subr.bf16.mxu0 %v9340_v20  ;;  %v16056_v20 = vld [vmem:[#allocation39_spill] sm:$0xff] }
 0x4e1   : > { %11920 = vmatmul.mubr.msk.bf16.vlgmr.msra.gmra.mrb[108].mxu1 %vm3390_vm2, %v16032_v15  ;;  %11302 = vmatmul.mubr.msk.bf16.gmra.mrb[8].mxu0 %vm3390_vm2, %v15504_v37 }
 0x4e2   : > { %11924 = vmatpush3.bf16.msra.mxu1 %v16029_v63  ;;  %9234 = vmatprep.mubr.bf16.mxu0 %v15951_v29  ;;  %v9488_v63 = vsel %vm16040_vm3, %v16039_v41, %v15097_v59 }
 0x4e3   : > { %11929 = vmatprep.subr.bf16.mxu1 %v16033_v31  ;;  %11925 = vmatprep.mubr.msk.bf16.mxu1 %vm3390_vm2, %v15084_v53  ;;  %v9489_v53 = vsel %vm16036_vm11, %v15097_v59, %v15114_v55  ;;  %v16038_v55 = vld [vmem:[#allocation27_spill] sm:$0xff]  ;;  %v15582_v59 = vld [vmem:[%s15869_s3 + $0x288] sm:$0xff]  }
 0x4e4   : > { %v15515_v56 = vpop.f32.mrb[100].mxu1 }
 0x4e5   : > { %v15517_v12 = vpop.f32.mrb[101].mxu1 }
 0x4e6   : > { %v15524_v25 = vpop.f32.mrb[102].mxu1 }
 0x4e7   : > { %v15526_v16 = vpop.f32.mrb[103].mxu1 }
 0x4e9   : > { %11311 = vmatmul.mubr.msk.bf16.vlgmr.msra.gmra.mrb[4].mxu0 %vm3390_vm2, %v15522_v17 }
 0x4ea   : > { %9352 = vmatpush1.bf16.msra.mxu0 %v9339_v54  ;;  %9244 = vmatprep.mubr.bf16.mxu0 %v15951_v29  ;;  %v16060_v54 = vld [vmem:[#allocation42_spill] sm:$0xff] }
 0x4eb   : > { %9500 = vmatprep.subr.bf16.mxu0 %v9489_v53  ;;  %v16062_v53 = vld [vmem:[#allocation44_spill] sm:$0xff] }
 0x4ec   : > { %v15537_v35 = vpop.f32.mrb[104].mxu1 }
 0x4ed   : > { %v15539_v58 = vpop.f32.mrb[105].mxu1  ;;  %11926 = vmatmul.mubr.msk.bf16.vlgmr.msra.gmra.mrb[108].mxu1 %vm3390_vm2, %v16037_v30  ;;  %v16063_v30 = vld [vmem:[#allocation45_spill] sm:$0xff] }
 0x4ee   : > { %11930 = vmatpush3.bf16.msra.mxu1 %v16033_v31  ;;  %v15549_v13 = vpop.f32.mrb[106].mxu1  ;;  %11931 = vmatprep.mubr.msk.bf16.mxu1 %vm3390_vm2, %v15143_v28  ;;  %v9639_v28 = vsel %vm9637_vm12, %v15134_v46, %v15145_v62  ;;  %v15592_v62 = vld [vmem:[%s15869_s3 + $0x290] sm:$0xff]  }
 0x4ef   : > { %11935 = vmatprep.subr.bf16.mxu1 %v16038_v55  ;;  %v15554_v61 = vpop.f32.mrb[107].mxu1  ;;  %v16059_v31 = vld [vmem:[#allocation41_spill] sm:$0xff] }
 0x4f1   : > { %11312 = vmatmul.mubr.msk.bf16.gmra.mrb[8].mxu0 %vm3390_vm2, %v15546_v4 }
 0x4f2   : > { %9383 = vmatprep.mubr.bf16.mxu0 %v15951_v29 }
 0x4f9   : > { %11932 = vmatmul.mubr.msk.bf16.vlgmr.msra.gmra.mrb[108].mxu1 %vm3390_vm2, %v15174_v3  ;;  %11321 = vmatmul.mubr.msk.bf16.vlgmr.msra.gmra.mrb[4].mxu0 %vm3390_vm2, %v15562_v47  ;;  %v16042_v3 = vld [vmem:[#allocation29_spill] sm:$0xff] }
 0x4fa   : > { %11936 = vmatpush3.bf16.msra.mxu1 %v16038_v55  ;;  %9501 = vmatpush1.bf16.msra.mxu0 %v9488_v63 }
 0x4fb   : > { %11941 = vmatprep.subr.bf16.mxu1 %v16041_v51  ;;  %9650 = vmatprep.subr.bf16.mxu0 %v9639_v28 }
 0x4fc   : > { %9393 = vmatprep.mubr.bf16.mxu0 %v15951_v29  ;;  %11937 = vmatprep.mubr.msk.bf16.mxu1 %vm3390_vm2, %v15199_v7  ;;  %v9638_v7 = vsel %vm9637_vm12, %v15157_v23, %v15134_v46  ;;  %v16043_v23 = vld [vmem:[#allocation30_spill] sm:$0xff]  ;;  %v15624_v46 = vld [vmem:[%s15869_s3 + $0x2a0] sm:$0xff]   ;;  %vm16045_vm12 = vmmov %vm15999_vm8 }
 0x501   : > { %11322 = vmatmul.mubr.msk.bf16.gmra.mrb[8].mxu0 %vm3390_vm2, %v15582_v59 }
 0x502   : > { %9532 = vmatprep.mubr.bf16.mxu0 %v15951_v29 }
 0x505   : > { %11938 = vmatmul.mubr.msk.bf16.vlgmr.msra.gmra.mrb[108].mxu1 %vm3390_vm2, %v15223_v49  ;;  %v9789_v49 = vsel %vm9787_vm7, %v15169_v8, %v15176_v44  ;;  %v9788_v44 = vsel %vm9787_vm7, %v15178_v39, %v15169_v8  ;;  %v16044_v8 = vld [vmem:[#allocation31_spill] sm:$0xff]  ;;  %v9938_v39 = vsel %vm9937_vm13, %v15206_v57, %v15194_v38  ;;  %vm16048_vm7 = vmmov %vm15999_vm8 }
 0x506   : > { %11942 = vmatpush3.bf16.msra.mxu1 %v16041_v51  ;;  %11943 = vmatprep.mubr.msk.bf16.mxu1 %vm3390_vm2, %v15246_v1  ;;  %v15610_v1 = vld [vmem:[%s15869_s3 + $0x298] sm:$0xff]   ;;  %v15682_v57 = vld [vmem:[%s15869_s3 + $0x2c0] sm:$0xff]   ;;  %vm16052_vm8 = vmmov %vm16005_vm6 }
 0x507   : > { %11947 = vmatprep.subr.bf16.mxu1 %v16042_v3 }
 0x509   : > { %11331 = vmatmul.mubr.msk.bf16.vlgmr.msra.gmra.mrb[4].mxu0 %vm3390_vm2, %v15592_v62 }
 0x50a   : > { %9651 = vmatpush1.bf16.msra.mxu0 %v9638_v7  ;;  %9542 = vmatprep.mubr.bf16.mxu0 %v15951_v29 }
 0x50b   : > { %9800 = vmatprep.subr.bf16.mxu0 %v9789_v49 }
 0x511   : > { %11944 = vmatmul.mubr.msk.bf16.vlgmr.msra.gmra.mrb[108].mxu1 %vm3390_vm2, %v15277_v0  ;;  %11332 = vmatmul.mubr.msk.bf16.gmra.mrb[8].mxu0 %vm3390_vm2, %v15610_v1  ;;  %v9939_v0 = vsel %vm9937_vm13, %v15194_v38, %v15201_v36  ;;  %v15652_v36 = vld [vmem:[%s15869_s3 + $0x2b0] sm:$0xff]   ;;  %v15672_v38 = vld [vmem:[%s15869_s3 + $0x2b8] sm:$0xff]   ;;  %vm16049_vm13 = vmmov %vm16003_vm15 }
 0x512   : > { %11948 = vmatpush3.bf16.msra.mxu1 %v16042_v3  ;;  %9682 = vmatprep.mubr.bf16.mxu0 %v15951_v29  ;;  %vm16051_vm0 = vmmov %vm16049_vm13 }
 0x513   : > { %11953 = vmatprep.subr.bf16.mxu1 %v16043_v23  ;;  %11949 = vmatprep.mubr.msk.bf16.mxu1 %vm3390_vm2, %v15297_v11  ;;  %v15640_v11 = vld [vmem:[%s15869_s3 + $0x2a8] sm:$0xff]   ;;  %vm16054_vm15 = vmmov %vm16005_vm6  ;;  %vm16055_vm6 = vcmask 433152  }
 0x514   : > { %vm16058_vm1 = vmmov %vm16055_vm6 }
 0x515   : > { %vm16064_vm9 = vmmov %vm16058_vm1 }
 0x519   : > { %11341 = vmatmul.mubr.msk.bf16.vlgmr.msra.gmra.mrb[4].mxu0 %vm3390_vm2, %v15624_v46 }
 0x51a   : > { %9801 = vmatpush1.bf16.msra.mxu0 %v9788_v44  ;;  %9692 = vmatprep.mubr.bf16.mxu0 %v15951_v29 }
 0x51b   : > { %9950 = vmatprep.subr.bf16.mxu0 %v9939_v0 }
 0x51d   : > { %11950 = vmatmul.mubr.msk.bf16.vlgmr.msra.gmra.mrb[108].mxu1 %vm3390_vm2, %v15322_v6  ;;  %v10088_v6 = vsel %vm16045_vm12, %v15225_v45, %v15236_v34  ;;  %v16047_v34 = vld [vmem:[#allocation34_spill] sm:$0xff] }
 0x51e   : > { %11954 = vmatpush3.bf16.msra.mxu1 %v16043_v23  ;;  %11955 = vmatprep.mubr.msk.bf16.mxu1 %vm3390_vm2, %v15336_v18  ;;  %v16046_v18 = vld [vmem:[#allocation32_spill] sm:$0xff] }
 0x51f   : > { %11959 = vmatprep.subr.bf16.mxu1 %v16044_v8 }
 0x521   : > { %11342 = vmatmul.mubr.msk.bf16.gmra.mrb[8].mxu0 %vm3390_vm2, %v15640_v11 }
 0x522   : > { %9832 = vmatprep.mubr.bf16.mxu0 %v15951_v29 }
 0x529   : > { %11956 = vmatmul.mubr.msk.bf16.vlgmr.msra.gmra.mrb[108].mxu1 %vm3390_vm2, %v15352_v5  ;;  %11351 = vmatmul.mubr.msk.bf16.vlgmr.msra.gmra.mrb[4].mxu0 %vm3390_vm2, %v15652_v36  ;;  %v10087_v5 = vsel %vm16048_vm7, %v15240_v48, %v15225_v45  ;;  %v16050_v45 = vld [vmem:[#allocation36_spill] sm:$0xff]  ;;  %v10236_v48 = vsel %vm16051_vm0, %v15263_v19, %v15248_v27  ;;  %v12911_v19 = vld [vmem:[%s15869_s3 + $0x2e0] sm:$0xff]  }
 0x52a   : > { %11960 = vmatpush3.bf16.msra.mxu1 %v16044_v8  ;;  %9951 = vmatpush1.bf16.msra.mxu0 %v9938_v39 }
 0x52b   : > { %11965 = vmatprep.subr.bf16.mxu1 %v16046_v18  ;;  %10099 = vmatprep.subr.bf16.mxu0 %v10088_v6 }
 0x52c   : > { %9842 = vmatprep.mubr.bf16.mxu0 %v15951_v29  ;;  %11961 = vmatprep.mubr.msk.bf16.mxu1 %vm3390_vm2, %v15364_v42  ;;  %v10237_v42 = vsel %vm16049_vm13, %v15248_v27, %v15257_v2  ;;  %v15714_v2 = vld [vmem:[%s15869_s3 + $0x2d0] sm:$0xff]   ;;  %v10529_v27 = vpop.permute.xlu1 %10528 }
 0x531   : > { %11352 = vmatmul.mubr.msk.bf16.gmra.mrb[8].mxu0 %vm3390_vm2, %v15672_v38 }
 0x532   : > { %9982 = vmatprep.mubr.bf16.mxu0 %v15951_v29 }
 0x535   : > { %11962 = vmatmul.mubr.msk.bf16.vlgmr.msra.gmra.mrb[108].mxu1 %vm3390_vm2, %v15384_v21  ;;  %v15700_v21 = vld [vmem:[%s15869_s3 + $0x2c8] sm:$0xff]  }
 0x536   : > { %11966 = vmatpush3.bf16.msra.mxu1 %v16046_v18  ;;  %11967 = vmatprep.mubr.msk.bf16.mxu1 %vm3390_vm2, %v15394_v33  ;;  %v10386_v33 = vsel %vm16052_vm8, %v15279_v40, %v15285_v50  ;;  %v15742_v50 = vpop.permute.xlu0 %10530 }
 0x537   : > { %11971 = vmatprep.subr.bf16.mxu1 %v16047_v34 }
 0x539   : > { %11361 = vmatmul.mubr.msk.bf16.vlgmr.msra.gmra.mrb[4].mxu0 %vm3390_vm2, %v15682_v57 }
 0x53a   : > { %10100 = vmatpush1.bf16.msra.mxu0 %v10087_v5  ;;  %9992 = vmatprep.mubr.bf16.mxu0 %v15951_v29 }
 0x53b   : > { %10248 = vmatprep.subr.bf16.mxu0 %v10237_v42 }
 0x541   : > { %11968 = vmatmul.mubr.msk.bf16.vlgmr.msra.gmra.mrb[108].mxu1 %vm3390_vm2, %v15412_v14  ;;  %11362 = vmatmul.mubr.msk.bf16.gmra.mrb[8].mxu0 %vm3390_vm2, %v15700_v21  ;;  %v15730_v14 = vld [vmem:[%s15869_s3 + $0x2d8] sm:$0xff]  }
 0x542   : > { %11972 = vmatpush3.bf16.msra.mxu1 %v16047_v34  ;;  %10131 = vmatprep.mubr.bf16.mxu0 %v15951_v29 }
 0x543   : > { %11977 = vmatprep.subr.bf16.mxu1 %v16050_v45  ;;  %11973 = vmatprep.mubr.msk.bf16.mxu1 %vm3390_vm2, %v15428_v60  ;;  %v16053_v60 = vld [vmem:[#allocation46_spill] sm:$0xff] }
 0x549   : > { %11371 = vmatmul.mubr.msk.bf16.vlgmr.msra.gmra.mrb[4].mxu0 %vm3390_vm2, %v15714_v2 }
 0x54a   : > { %10249 = vmatpush1.bf16.msra.mxu0 %v10236_v48  ;;  %10141 = vmatprep.mubr.bf16.mxu0 %v15951_v29 }
 0x54b   : > { %10397 = vmatprep.subr.bf16.mxu0 %v10386_v33 }
 0x54d   : > { %11974 = vmatmul.mubr.msk.bf16.vlgmr.msra.gmra.mrb[108].mxu1 %vm3390_vm2, %v15444_v43  ;;  %v10385_v43 = vsel %vm16054_vm15, %v16053_v60, %v15279_v40  ;;  %v12912_v40 = vld [vmem:[%s15869_s3 + $0x2e8] sm:$0xff]  }
 0x54e   : > { %11978 = vmatpush3.bf16.msra.mxu1 %v16050_v45  ;;  %11979 = vmatprep.mubr.msk.bf16.mxu1 %vm3390_vm2, %v15457_v32  ;;  %v10535_v32 = vsel %vm16055_vm6, %v10529_v27, %v15742_v50 }
 0x54f   : > { %11983 = vmatprep.subr.bf16.mxu1 %v15128_v9 }
 0x551   : > { %11372 = vmatmul.mubr.msk.bf16.gmra.mrb[8].mxu0 %vm3390_vm2, %v15730_v14 }
 0x552   : > { %10280 = vmatprep.mubr.bf16.mxu0 %v15951_v29 }
 0x559   : > { %11980 = vmatmul.mubr.msk.bf16.vlgmr.msra.gmra.mrb[108].mxu1 %vm3390_vm2, %v15476_v52  ;;  %11381 = vmatmul.mubr.msk.bf16.vlgmr.msra.gmra.mrb[4].mxu0 %vm3390_vm2, %v12911_v19  ;;  %v10527_v52 = vpop.permute.xlu1 %10526 }
 0x55a   : > { %11984 = vmatpush3.bf16.msra.mxu1 %v15128_v9  ;;  %10398 = vmatpush1.bf16.msra.mxu0 %v10385_v43  ;;  %v12913_v9 = vld [vmem:[%s15869_s3 + $0x2f0] sm:$0xff]   ;;  %v10534_v15 = vsel %vm16058_vm1, %v10527_v52, %v10529_v27 }
 0x55b   : > { %11989 = vmatprep.subr.bf16.mxu1 %v16056_v20  ;;  %10546 = vmatprep.subr.bf16.mxu0 %v10535_v32 }
 0x55c   : > { %10290 = vmatprep.mubr.bf16.mxu0 %v15951_v29  ;;  %11985 = vmatprep.mubr.msk.bf16.mxu1 %vm3390_vm2, %v15486_v10  ;;  %v16057_v10 = vld [vmem:[#allocation40_spill] sm:$0xff] }
 0x55d   : > { %v10667_v63 = vpop.permute.xlu1 %10666 }
 0x561   : > { %11382 = vmatmul.mubr.msk.bf16.gmra.mrb[8].mxu0 %vm3390_vm2, %v12912_v40 }
 0x562   : > { %10429 = vmatprep.mubr.bf16.mxu0 %v15951_v29 }
 0x565   : > { %11986 = vmatmul.mubr.msk.bf16.vlgmr.msra.gmra.mrb[108].mxu1 %vm3390_vm2, %v15504_v37  ;;  %v12914_v37 = vld [vmem:[%s15869_s3 + $0x2f8] sm:$0xff]  }
 0x566   : > { %11990 = vmatpush3.bf16.msra.mxu1 %v16056_v20  ;;  %11991 = vmatprep.mubr.msk.bf16.mxu1 %vm3390_vm2, %v15522_v17  ;;  %v12915_v17 = vld [vmem:[%s15869_s3 + $0x300] sm:$0xff]  }
 0x567   : > { %11995 = vmatprep.subr.bf16.mxu1 %v16057_v10 }
 0x569   : > { %11391 = vmatmul.mubr.msk.bf16.vlgmr.msra.gmra.mrb[4].mxu0 %vm3390_vm2, %v12913_v9 }
 0x56a   : > { %10547 = vmatpush1.bf16.msra.mxu0 %v10534_v15  ;;  %10439 = vmatprep.mubr.bf16.mxu0 %v15951_v29 }
 0x571   : > { %11992 = vmatmul.mubr.msk.bf16.vlgmr.msra.gmra.mrb[108].mxu1 %vm3390_vm2, %v15546_v4  ;;  %11392 = vmatmul.mubr.msk.bf16.gmra.mrb[8].mxu0 %vm3390_vm2, %v12914_v37  ;;  %v10533_v4 = vpop.permute.xlu0 %10532 }
 0x572   : > { %11996 = vmatpush3.bf16.msra.mxu1 %v16057_v10  ;;  %10578 = vmatprep.mubr.bf16.mxu0 %v15951_v29  ;;  %v10536_v55 = vsel %vm16064_vm9, %v15742_v50, %v10533_v4 }
 0x573   : > { %12001 = vmatprep.subr.bf16.mxu1 %v16059_v31  ;;  %11997 = vmatprep.mubr.msk.bf16.mxu1 %vm3390_vm2, %v15562_v47 }
 0x575   : > { %v10672_v3 = vpop.permute.xlu0 %10671 }
 0x579   : > { %11401 = vmatmul.mubr.msk.bf16.vlgmr.msra.gmra.mrb[4].mxu0 %vm3390_vm2, %v12915_v17 }
 0x57a   : > { %10588 = vmatprep.mubr.bf16.mxu0 %v15951_v29  ;;  %v16061_v29 = vld [vmem:[#allocation43_spill] sm:$0xff] }
 0x57d   : > { %11998 = vmatmul.mubr.msk.bf16.vlgmr.msra.gmra.mrb[108].mxu1 %vm3390_vm2, %v15582_v59 }
 0x57e   : > { %12002 = vmatpush3.bf16.msra.mxu1 %v16059_v31  ;;  %12003 = vmatprep.mubr.msk.bf16.mxu1 %vm3390_vm2, %v15592_v62 }
 0x57f   : > { %12007 = vmatprep.subr.bf16.mxu1 %v16060_v54 }
 0x581   : > { %11402 = vmatmul.mubr.msk.bf16.gmra.mrb[8].mxu0 %vm3390_vm2, %v12916_v26 }
 0x589   : > { %12004 = vmatmul.mubr.msk.bf16.vlgmr.msra.gmra.mrb[108].mxu1 %vm3390_vm2, %v15610_v1 }
 0x58a   : > { %12008 = vmatpush3.bf16.msra.mxu1 %v16060_v54  ;;  %12009 = vmatprep.mubr.msk.bf16.mxu1 %vm3390_vm2, %v15624_v46 }
 0x58b   : > { %12013 = vmatprep.subr.bf16.mxu1 %v16061_v29 }
 0x595   : > { %12010 = vmatmul.mubr.msk.bf16.vlgmr.msra.gmra.mrb[108].mxu1 %vm3390_vm2, %v15640_v11 }
 0x596   : > { %12014 = vmatpush3.bf16.msra.mxu1 %v16061_v29  ;;  %12015 = vmatprep.mubr.msk.bf16.mxu1 %vm3390_vm2, %v15652_v36  ;;  %v10682_v36 = vpop.permute.xlu0 %10681 }
 0x597   : > { %12019 = vmatprep.subr.bf16.mxu1 %v16062_v53 }
 0x5a1   : > { %12016 = vmatmul.mubr.msk.bf16.vlgmr.msra.gmra.mrb[108].mxu1 %vm3390_vm2, %v15672_v38 }
 0x5a2   : > { %12020 = vmatpush3.bf16.msra.mxu1 %v16062_v53  ;;  %12021 = vmatprep.mubr.msk.bf16.mxu1 %vm3390_vm2, %v15682_v57 }
 0x5a3   : > { %12025 = vmatprep.subr.bf16.mxu1 %v16063_v30 }
 0x5ad   : > { %12022 = vmatmul.mubr.msk.bf16.vlgmr.msra.gmra.mrb[108].mxu1 %vm3390_vm2, %v15700_v21 }
 0x5ae   : > { %12026 = vmatpush3.bf16.msra.mxu1 %v16063_v30  ;;  %12027 = vmatprep.mubr.msk.bf16.mxu1 %vm3390_vm2, %v15714_v2 }
 0x5af   : > { %12031 = vmatprep.subr.bf16.mxu1 %v15303_v22 }
 0x5b9   : > { %12028 = vmatmul.mubr.msk.bf16.vlgmr.msra.gmra.mrb[108].mxu1 %vm3390_vm2, %v15730_v14 }
 0x5ba   : > { %12032 = vmatpush3.bf16.msra.mxu1 %v15303_v22  ;;  %12033 = vmatprep.mubr.msk.bf16.mxu1 %vm3390_vm2, %v12911_v19 }
 0x5bb   : > { %12037 = vmatprep.subr.bf16.mxu1 %v15308_v24 }
 0x5c5   : > { %12034 = vmatmul.mubr.msk.bf16.vlgmr.msra.gmra.mrb[108].mxu1 %vm3390_vm2, %v12912_v40 }
 0x5c6   : > { %12038 = vmatpush3.bf16.msra.mxu1 %v15308_v24  ;;  %12039 = vmatprep.mubr.msk.bf16.mxu1 %vm3390_vm2, %v12913_v9 }
 0x5c7   : > { %12043 = vmatprep.subr.bf16.mxu1 %v10536_v55 }
 0x5d1   : > { %12040 = vmatmul.mubr.msk.bf16.vlgmr.msra.gmra.mrb[108].mxu1 %vm3390_vm2, %v12914_v37 }
 0x5d2   : > { %12044 = vmatpush3.bf16.msra.mxu1 %v10536_v55  ;;  %12045 = vmatprep.mubr.msk.bf16.mxu1 %vm3390_vm2, %v12915_v17 }
 0x5dd   : > { %12046 = vmatmul.mubr.msk.bf16.vlgmr.msra.gmra.mrb[108].mxu1 %vm3390_vm2, %v12916_v26 }
 0x64c   : > { %v10580_v22 = vpop.f32.mrb[4].mxu0 }
 0x64d   : > { %v12049_v47 = vadd.f32 %v10580_v22, %v15515_v56  ;;  %v10582_v41 = vpop.f32.mrb[5].mxu0 }
 0x64e   : > { %v12050_v24 = vadd.f32 %v10582_v41, %v15517_v12  ;;  %v10584_v28 = vpop.f32.mrb[6].mxu0 }
 0x64f   : > { %v10684_v51 = vadd.f32 %v12049_v47, %v10667_v63  ;;  %v12051_v59 = vadd.f32 %v10584_v28, %v15524_v25  ;;  %v10586_v62 = vpop.f32.mrb[7].mxu0  ;;  %v10677_v25 = vpop.permute.xlu1 %10676 }
 0x650   : > { %v10685_v56 = vadd.f32 %v12050_v24, %v10667_v63  ;;  %v12052_v7 = vadd.f32 %v10586_v62, %v15526_v16 }
 0x651   : > { %10696 = vst [vmem:[%s15842_s20] sm:$0xff] %v10684_v51  ;;  %v10687_v49 = vadd.f32 %v12051_v59, %v10672_v3 }
 0x652   : > { %10697 = vst [vmem:[%s15842_s20 + $0x8] sm:$0xff] %v10685_v56  ;;  %v10688_v1 = vadd.f32 %v12052_v7, %v10672_v3 }
 0x653   : > { %10699 = vst [vmem:[%s15842_s20 + $0x18] sm:$0xff] %v10687_v49 }
 0x654   : > { %10700 = vst [vmem:[%s15842_s20 + $0x20] sm:$0xff] %v10688_v1  ;;  %v10590_v23 = vpop.f32.mrb[8].mxu0 }
 0x655   : > { %v12053_v12 = vadd.f32 %v10590_v23, %v15537_v35  ;;  %v10592_v46 = vpop.f32.mrb[9].mxu0 }
 0x656   : > { %v12054_v44 = vadd.f32 %v10592_v46, %v15539_v58  ;;  %v10594_v0 = vpop.f32.mrb[10].mxu0 }
 0x657   : > { %v10690_v11 = vadd.f32 %v12053_v12, %v10677_v25  ;;  %v12055_v16 = vadd.f32 %v10594_v0, %v15549_v13  ;;  %v10596_v8 = vpop.f32.mrb[11].mxu0 }
 0x658   : > { %v10691_v39 = vadd.f32 %v12054_v44, %v10677_v25  ;;  %v12056_v6 = vadd.f32 %v10596_v8, %v15554_v61 }
 0x659   : > { %10702 = vst [vmem:[%s15842_s20 + $0x30] sm:$0xff] %v10690_v11  ;;  %v10693_v18 = vadd.f32 %v12055_v16, %v10682_v36 }
 0x65a   : > { %10703 = vst [vmem:[%s15842_s20 + $0x38] sm:$0xff] %v10691_v39  ;;  %v10694_v35 = vadd.f32 %v12056_v6, %v10682_v36 }
 0x65b   : > { %10705 = vst [vmem:[%s15842_s20 + $0x48] sm:$0xff] %v10693_v18 }
 0x65c   : > { %10706 = vst [vmem:[%s15842_s20 + $0x50] sm:$0xff] %v10694_v35 }
 0x6b0   : > { %v12047_v58 = vpop.f32.mrb[108].mxu1 }
 0x6b1   : > { %v10692_v38 = vadd.f32 %v12047_v58, %v10677_v25  ;;  %v10633_v57 = vpop.f32.mrb[109].mxu1 }
 0x6b2   : > { %v10686_v34 = vadd.f32 %v10667_v63, %v10633_v57  ;;  %v12048_v13 = vpop.f32.mrb[110].mxu1 }
 0x6b3   : > { %10704 = vst [vmem:[%s15842_s20 + $0x40] sm:$0xff] %v10692_v38  ;;  %v10695_v5 = vadd.f32 %v12048_v13, %v10682_v36  ;;  %v10636_v42 = vpop.f32.mrb[111].mxu1 }
 0x6b4   : > { %10698 = vst [vmem:[%s15842_s20 + $0x10] sm:$0xff] %v10686_v34  ;;  %v10689_v21 = vadd.f32 %v10672_v3, %v10636_v42 }
 0x6b5   : > { %10707 = vst [vmem:[%s15842_s20 + $0x58] sm:$0xff] %v10695_v5 }
 0x6b6   : > { %10701 = vst [vmem:[%s15842_s20 + $0x28] sm:$0xff] %v10689_v21 }
 0x6b7 PF: > { %s16_s21 = sadd.s32 1, %s12930_s21  }
 0x6b8   : > { %p13_p4 = scmp.ge.s32.totalorder %s16_s21, 4  }
 0x6ba   :  { %15 = sbr.rel (!%p13_p4) target bundleno = 1 (0x1), region = 146 }

</bundles_post_ra>
